<compile_context>
chip_gen: v7x
topology: tpu7x:2x2x1
jax: 0.10.0
libtpu: 0.0.40
codegen_flags: <defaults>
</compile_context>

<pallas_src>
import jax
import jax.numpy as jnp
import numpy as np
from jax.experimental import pallas as pl
from jax.experimental.pallas import tpu as pltpu

# ---- arch constants (SPACE config) ----
IMG_SIZE = 32          # arch.img_shape = (32, 32) -> embed_size = 32 // 16 = 2
Z_COMP_DIM = 32        # arch.z_comp_dim
BN_EPS = 1e-5


# ----------------- fused Pallas kernel -----------------
def _comp_encoder_kernel(x_ref,
                         w1, s1, b1, w2, s2, b2, w3, s3, b3, w4, s4, b4,
                         wh, bh, o_ref):
    """Full CompEncoder forward for one batch block (BT images), VMEM resident.

    Activation layout: (H, BT, W*C) -- H in a leading dim, batch on sublanes,
    (W, C) merged into lanes.  Each conv layer = one bf16 matmul against a
    host-built block-Toeplitz weight that already encodes the W taps/stride.
    """
    x = x_ref[...]                                      # (32, BT, 128) bf16

    for w_ref, s_ref, b_ref in ((w1, s1, b1), (w2, s2, b2),
                                (w3, s3, b3), (w4, s4, b4)):
        hin, bt, wc = x.shape
        ho = hin // 2
        n = w_ref.shape[1]                              # Wo * Cout

        # H taps: output row ho reads input rows 2*ho-1, 2*ho, 2*ho+1.
        xr = x.reshape(ho, 2, bt, wc)                   # leading-dim split (free)
        x_h0 = xr[:, 0]                                 # rows 2*ho     (kh = 1)
        x_h1 = xr[:, 1]                                 # rows 2*ho + 1 (kh = 2)
        x_hm1 = jnp.concatenate(                        # rows 2*ho - 1 (kh = 0)
            [jnp.zeros((1, bt, wc), x.dtype), x_h1[:ho - 1]], axis=0)

        # Fuse the 3 H taps into K (lane-aligned concat, wc multiple of 128).
        a = jnp.concatenate(
            [t.reshape(ho * bt, wc) for t in (x_hm1, x_h0, x_h1)], axis=1)

        y = jnp.dot(a, w_ref[...], preferred_element_type=jnp.float32)
        y = y * s_ref[...] + b_ref[...]                 # folded conv-bias + BN
        # ELU; exp() instead of expm1() stays on guaranteed Mosaic lowerings.
        y = jnp.where(y > 0.0, y, jnp.exp(jnp.minimum(y, 0.0)) - 1.0)
        x = y.astype(jnp.bfloat16).reshape(ho, bt, n)

    # x: (2, BT, 2*64) -> gather the 2x2x64 features per image along lanes.
    feat = jnp.concatenate([x[0], x[1]], axis=1)        # (BT, 256)
    out = jnp.dot(feat, wh[...], preferred_element_type=jnp.float32) + bh[...]

    lane = jax.lax.broadcasted_iota(jnp.int32, out.shape, 1)
    softplus = jnp.maximum(out, 0.0) + jnp.log(1.0 + jnp.exp(-jnp.abs(out)))
    o_ref[...] = jnp.where(lane < Z_COMP_DIM, out, softplus + 1e-4)


# ----------------- host-side weight folding -----------------
def _toeplitz_conv_weight(w_pt, win):
    """Fold 3x3 taps, stride-2 W decimation and W zero-padding of one conv
    layer into a block-Toeplitz matmul weight (3*win*cin, (win//2)*cout)."""
    cout, cin = w_pt.shape[0], w_pt.shape[1]
    wo = win // 2
    ind = np.zeros((win, 3, wo), np.float32)            # wi == 2*j + kw - 1
    for j in range(wo):
        for kw in range(3):
            wi = 2 * j + kw - 1
            if 0 <= wi < win:
                ind[wi, kw, j] = 1.0
    w_taps = jnp.transpose(w_pt, (2, 3, 1, 0))           # (kh, kw, cin, cout)
    wk = jnp.einsum('wkj,hkio->hwijo', jnp.asarray(ind), w_taps)
    return wk.reshape(3 * win * cin, wo * cout).astype(jnp.bfloat16)


# ----------------- wrapper (parameter folding + pallas_call) -----------------
def comp_encoder_forward(x_nchw, params):
    B, C0, H, W = x_nchw.shape
    D = Z_COMP_DIM
    BT = min(32, ((B + 7) // 8) * 8)                     # batch block, mult of 8
    B_pad = ((B + BT - 1) // BT) * BT
    nb = B_pad // BT

    # Input: NCHW -> (H, B_pad, W*C) with (W, C) merged into a 128-wide lane dim.
    x = jnp.transpose(x_nchw.astype(jnp.float32), (0, 2, 3, 1)).reshape(B, H, W * C0)
    x = jnp.pad(x, ((0, B_pad - B), (0, 0), (0, 0)))
    x = jnp.transpose(x, (1, 0, 2)).astype(jnp.bfloat16)  # (32, B_pad, 128)

    conv_inputs, conv_specs = [], []
    win = W
    for (w, b, gamma, beta, mean, var) in params["convs"]:
        cout = w.shape[0]
        wo = win // 2
        wk = _toeplitz_conv_weight(w, win)
        s = gamma / jnp.sqrt(var + BN_EPS)
        scale = jnp.tile(s, wo).reshape(1, wo * cout).astype(jnp.float32)
        bias = jnp.tile(beta + (b - mean) * s, wo).reshape(1, wo * cout).astype(jnp.float32)
        conv_inputs += [wk, scale, bias]
        conv_specs += [
            pl.BlockSpec(wk.shape, lambda g: (0, 0)),
            pl.BlockSpec(scale.shape, lambda g: (0, 0)),
            pl.BlockSpec(bias.shape, lambda g: (0, 0)),
        ]
        win = wo

    # Head: permute PyTorch's channel-major Flatten into the kernel's
    # (h, w, c) lane order so the head is a single (BT, 256) @ (256, 2D) matmul.
    cfin = params["convs"][-1][0].shape[0]               # 64
    wl = params["lin_w"].T.reshape(cfin, 2, 2, 2 * D)    # (c, h, w, out)
    w_head = jnp.transpose(wl, (1, 2, 0, 3)).reshape(4 * cfin, 2 * D).astype(jnp.bfloat16)
    b_head = params["lin_b"].reshape(1, 2 * D).astype(jnp.float32)

    out = pl.pallas_call(
        _comp_encoder_kernel,
        out_shape=jax.ShapeDtypeStruct((B_pad, 2 * D), jnp.float32),
        grid=(nb,),
        in_specs=[pl.BlockSpec((H, BT, W * C0), lambda g: (0, g, 0))]
                 + conv_specs
                 + [pl.BlockSpec(w_head.shape, lambda g: (0, 0)),
                    pl.BlockSpec(b_head.shape, lambda g: (0, 0))],
        out_specs=pl.BlockSpec((BT, 2 * D), lambda g: (g, 0)),
        compiler_params=pltpu.CompilerParams(
            dimension_semantics=("parallel",)),
    )(x, *conv_inputs, w_head, b_head)

    out = out[:B]
    return out[:, :D], out[:, D:]


comp_encoder_forward_jit = jax.jit(comp_encoder_forward)


# ----------------- deterministic parameter init -----------------
def init_params(key):
    specs = [(4, 32), (32, 32), (32, 64), (64, 64)]
    params = {"convs": []}
    for i, (cin, cout) in enumerate(specs):
        k = jax.random.fold_in(key, i)
        kw, kb, kg, kbt, km, kv = jax.random.split(k, 6)
        w = 0.1 * jax.random.normal(kw, (cout, cin, 3, 3), jnp.float32)
        b = 0.1 * jax.random.normal(kb, (cout,), jnp.float32)
        gamma = 1.0 + 0.1 * jax.random.normal(kg, (cout,), jnp.float32)
        beta = 0.1 * jax.random.normal(kbt, (cout,), jnp.float32)
        mean = 0.1 * jax.random.normal(km, (cout,), jnp.float32)
        var = 1.0 + 0.1 * jax.random.uniform(kv, (cout,), jnp.float32)
        params["convs"].append((w, b, gamma, beta, mean, var))
    kf = jax.random.fold_in(key, 100)
    kw, kb = jax.random.split(kf)
    embed = IMG_SIZE // 16
    lin_in = 64 * embed * embed
    params["lin_w"] = 0.05 * jax.random.normal(kw, (2 * Z_COMP_DIM, lin_in), jnp.float32)
    params["lin_b"] = 0.05 * jax.random.normal(kb, (2 * Z_COMP_DIM,), jnp.float32)
    return params


# ----------------- pure-JAX f32 reference (correctness check) -----------------
def reference_forward(x_nchw, params):
    y = x_nchw.astype(jnp.float32)
    for (w, b, gamma, beta, mean, var) in params["convs"]:
        y = jax.lax.conv_general_dilated(
            y, w, window_strides=(2, 2), padding=((1, 1), (1, 1)),
            dimension_numbers=("NCHW", "OIHW", "NCHW"))
        y = y + b[None, :, None, None]
        y = gamma[None, :, None, None] * (y - mean[None, :, None, None]) \
            / jnp.sqrt(var[None, :, None, None] + BN_EPS) + beta[None, :, None, None]
        y = jnp.where(y > 0, y, jnp.expm1(y))
    B = y.shape[0]
    flat = y.reshape(B, -1)
    out = flat @ params["lin_w"].T + params["lin_b"]
    loc = out[:, :Z_COMP_DIM]
    scale = jax.nn.softplus(out[:, Z_COMP_DIM:]) + 1e-4
    return loc, scale


if __name__ == "__main__":
    key = jax.random.PRNGKey(0)
    kx, kp = jax.random.split(key)
    x = jax.random.normal(kx, (2, 4, IMG_SIZE, IMG_SIZE), jnp.float32)  # (B, 3+1, H, W)
    params = init_params(kp)

    loc, scale = comp_encoder_forward_jit(x, params)
    loc, scale = jax.block_until_ready((loc, scale))

    # Tolerance accounts for bf16 MXU operands (f32 accumulation) vs f32 ref;
    # observed error is well below this, while real bugs produce O(1) errors.
    ref_loc, ref_scale = reference_forward(x, params)
    np.testing.assert_allclose(np.asarray(loc), np.asarray(ref_loc), rtol=2e-2, atol=2e-2)
    np.testing.assert_allclose(np.asarray(scale), np.asarray(ref_scale), rtol=2e-2, atol=2e-2)

    assert loc.shape == (2, Z_COMP_DIM) and scale.shape == (2, Z_COMP_DIM)
    print("KERNEL_OK")
</pallas_src>

<mosaic_0001>
module attributes {stable_mosaic.version = 11 : i64} {
  func.func @_comp_encoder_kernel(%arg0: i32, %arg1: memref<32x8x128xbf16, #tpu.memory_space<vmem>>, %arg2: memref<384x512xbf16, #tpu.memory_space<vmem>>, %arg3: memref<1x512xf32, #tpu.memory_space<vmem>>, %arg4: memref<1x512xf32, #tpu.memory_space<vmem>>, %arg5: memref<1536x256xbf16, #tpu.memory_space<vmem>>, %arg6: memref<1x256xf32, #tpu.memory_space<vmem>>, %arg7: memref<1x256xf32, #tpu.memory_space<vmem>>, %arg8: memref<768x256xbf16, #tpu.memory_space<vmem>>, %arg9: memref<1x256xf32, #tpu.memory_space<vmem>>, %arg10: memref<1x256xf32, #tpu.memory_space<vmem>>, %arg11: memref<768x128xbf16, #tpu.memory_space<vmem>>, %arg12: memref<1x128xf32, #tpu.memory_space<vmem>>, %arg13: memref<1x128xf32, #tpu.memory_space<vmem>>, %arg14: memref<256x64xbf16, #tpu.memory_space<vmem>>, %arg15: memref<1x64xf32, #tpu.memory_space<vmem>>, %arg16: memref<8x64xf32, #tpu.memory_space<vmem>>) attributes {dimension_semantics = [#tpu.dimension_semantics<parallel>], iteration_bounds = array<i64: 1>, scalar_prefetch = 0 : i64, scratch_operands = 0 : i64, tpu.core_type = #tpu.core_type<tc>, window_params = [{transform_indices = @transform_0, window_bounds = array<i64: 32, 8, 128>}, {pipeline_mode = #tpu.pipeline_mode<synchronous>, transform_indices = @transform_1, window_bounds = array<i64: 384, 512>}, {pipeline_mode = #tpu.pipeline_mode<synchronous>, transform_indices = @transform_2, window_bounds = array<i64: 1, 512>}, {pipeline_mode = #tpu.pipeline_mode<synchronous>, transform_indices = @transform_3, window_bounds = array<i64: 1, 512>}, {pipeline_mode = #tpu.pipeline_mode<synchronous>, transform_indices = @transform_4, window_bounds = array<i64: 1536, 256>}, {pipeline_mode = #tpu.pipeline_mode<synchronous>, transform_indices = @transform_5, window_bounds = array<i64: 1, 256>}, {pipeline_mode = #tpu.pipeline_mode<synchronous>, transform_indices = @transform_6, window_bounds = array<i64: 1, 256>}, {pipeline_mode = #tpu.pipeline_mode<synchronous>, transform_indices = @transform_7, window_bounds = array<i64: 768, 256>}, {pipeline_mode = #tpu.pipeline_mode<synchronous>, transform_indices = @transform_8, window_bounds = array<i64: 1, 256>}, {pipeline_mode = #tpu.pipeline_mode<synchronous>, transform_indices = @transform_9, window_bounds = array<i64: 1, 256>}, {pipeline_mode = #tpu.pipeline_mode<synchronous>, transform_indices = @transform_10, window_bounds = array<i64: 768, 128>}, {pipeline_mode = #tpu.pipeline_mode<synchronous>, transform_indices = @transform_11, window_bounds = array<i64: 1, 128>}, {pipeline_mode = #tpu.pipeline_mode<synchronous>, transform_indices = @transform_12, window_bounds = array<i64: 1, 128>}, {pipeline_mode = #tpu.pipeline_mode<synchronous>, transform_indices = @transform_13, window_bounds = array<i64: 256, 64>}, {pipeline_mode = #tpu.pipeline_mode<synchronous>, transform_indices = @transform_14, window_bounds = array<i64: 1, 64>}, {transform_indices = @transform_15, window_bounds = array<i64: 8, 64>}]} {
    %c0 = arith.constant 0 : index
    %c0_0 = arith.constant 0 : index
    %c0_1 = arith.constant 0 : index
    %0 = vector.load %arg1[%c0, %c0_0, %c0_1] : memref<32x8x128xbf16, #tpu.memory_space<vmem>>, vector<32x8x128xbf16>
    %1 = vector.shape_cast %0 : vector<32x8x128xbf16> to vector<16x2x8x128xbf16>
    %2 = vector.extract_strided_slice %1 {offsets = [0, 0, 0, 0], sizes = [16, 1, 8, 128], strides = [1, 1, 1, 1]} : vector<16x2x8x128xbf16> to vector<16x1x8x128xbf16>
    %3 = vector.shape_cast %2 : vector<16x1x8x128xbf16> to vector<16x8x128xbf16>
    %4 = vector.extract_strided_slice %1 {offsets = [0, 1, 0, 0], sizes = [16, 1, 8, 128], strides = [1, 1, 1, 1]} : vector<16x2x8x128xbf16> to vector<16x1x8x128xbf16>
    %5 = vector.shape_cast %4 : vector<16x1x8x128xbf16> to vector<16x8x128xbf16>
    %cst = arith.constant 0.000000e+00 : bf16
    %6 = vector.broadcast %cst : bf16 to vector<1x8x128xbf16>
    %7 = vector.extract_strided_slice %5 {offsets = [0, 0, 0], sizes = [15, 8, 128], strides = [1, 1, 1]} : vector<16x8x128xbf16> to vector<15x8x128xbf16>
    %8 = tpu.concatenate %6, %7 in 0 : vector<1x8x128xbf16>, vector<15x8x128xbf16> -> vector<16x8x128xbf16>
    %9 = vector.shape_cast %8 : vector<16x8x128xbf16> to vector<128x128xbf16>
    %10 = vector.shape_cast %3 : vector<16x8x128xbf16> to vector<128x128xbf16>
    %11 = vector.shape_cast %5 : vector<16x8x128xbf16> to vector<128x128xbf16>
    %12 = tpu.concatenate %9, %10, %11 in 1 : vector<128x128xbf16>, vector<128x128xbf16>, vector<128x128xbf16> -> vector<128x384xbf16>
    %c0_2 = arith.constant 0 : index
    %c0_3 = arith.constant 0 : index
    %13 = vector.load %arg2[%c0_2, %c0_3] : memref<384x512xbf16, #tpu.memory_space<vmem>>, vector<384x512xbf16>
    %cst_4 = arith.constant dense<0.000000e+00> : vector<128x512xf32>
    %14 = tpu.matmul %12, %13, %cst_4 {dimension_numbers = #tpu.dot_dimension_numbers<[1], [0], [0], [1], [0, 0, 1, 1], [], []>} : vector<128x384xbf16>, vector<384x512xbf16>, vector<128x512xf32> -> vector<128x512xf32>
    %c0_5 = arith.constant 0 : index
    %c0_6 = arith.constant 0 : index
    %15 = vector.load %arg3[%c0_5, %c0_6] : memref<1x512xf32, #tpu.memory_space<vmem>>, vector<1x512xf32>
    %16 = vector.broadcast %15 : vector<1x512xf32> to vector<128x512xf32>
    %17 = arith.mulf %14, %16 : vector<128x512xf32>
    %c0_7 = arith.constant 0 : index
    %c0_8 = arith.constant 0 : index
    %18 = vector.load %arg4[%c0_7, %c0_8] : memref<1x512xf32, #tpu.memory_space<vmem>>, vector<1x512xf32>
    %19 = vector.broadcast %18 : vector<1x512xf32> to vector<128x512xf32>
    %20 = arith.addf %17, %19 : vector<128x512xf32>
    %cst_9 = arith.constant 0.000000e+00 : f32
    %21 = vector.broadcast %cst_9 : f32 to vector<128x512xf32>
    %22 = arith.cmpf ogt, %20, %21 : vector<128x512xf32>
    %cst_10 = arith.constant 0.000000e+00 : f32
    %23 = vector.broadcast %cst_10 : f32 to vector<128x512xf32>
    %24 = arith.minimumf %20, %23 : vector<128x512xf32>
    %25 = math.exp %24 : vector<128x512xf32>
    %cst_11 = arith.constant 1.000000e+00 : f32
    %26 = vector.broadcast %cst_11 : f32 to vector<128x512xf32>
    %27 = arith.subf %25, %26 : vector<128x512xf32>
    %28 = arith.select %22, %20, %27 : vector<128x512xi1>, vector<128x512xf32>
    %29 = arith.truncf %28 : vector<128x512xf32> to vector<128x512xbf16>
    %30 = vector.shape_cast %29 : vector<128x512xbf16> to vector<16x8x512xbf16>
    %31 = vector.shape_cast %30 : vector<16x8x512xbf16> to vector<8x2x8x512xbf16>
    %32 = vector.extract_strided_slice %31 {offsets = [0, 0, 0, 0], sizes = [8, 1, 8, 512], strides = [1, 1, 1, 1]} : vector<8x2x8x512xbf16> to vector<8x1x8x512xbf16>
    %33 = vector.shape_cast %32 : vector<8x1x8x512xbf16> to vector<8x8x512xbf16>
    %34 = vector.extract_strided_slice %31 {offsets = [0, 1, 0, 0], sizes = [8, 1, 8, 512], strides = [1, 1, 1, 1]} : vector<8x2x8x512xbf16> to vector<8x1x8x512xbf16>
    %35 = vector.shape_cast %34 : vector<8x1x8x512xbf16> to vector<8x8x512xbf16>
    %cst_12 = arith.constant 0.000000e+00 : bf16
    %36 = vector.broadcast %cst_12 : bf16 to vector<1x8x512xbf16>
    %37 = vector.extract_strided_slice %35 {offsets = [0, 0, 0], sizes = [7, 8, 512], strides = [1, 1, 1]} : vector<8x8x512xbf16> to vector<7x8x512xbf16>
    %38 = tpu.concatenate %36, %37 in 0 : vector<1x8x512xbf16>, vector<7x8x512xbf16> -> vector<8x8x512xbf16>
    %39 = vector.shape_cast %38 : vector<8x8x512xbf16> to vector<64x512xbf16>
    %40 = vector.shape_cast %33 : vector<8x8x512xbf16> to vector<64x512xbf16>
    %41 = vector.shape_cast %35 : vector<8x8x512xbf16> to vector<64x512xbf16>
    %42 = tpu.concatenate %39, %40, %41 in 1 : vector<64x512xbf16>, vector<64x512xbf16>, vector<64x512xbf16> -> vector<64x1536xbf16>
    %c0_13 = arith.constant 0 : index
    %c0_14 = arith.constant 0 : index
    %43 = vector.load %arg5[%c0_13, %c0_14] : memref<1536x256xbf16, #tpu.memory_space<vmem>>, vector<1536x256xbf16>
    %cst_15 = arith.constant dense<0.000000e+00> : vector<64x256xf32>
    %44 = tpu.matmul %42, %43, %cst_15 {dimension_numbers = #tpu.dot_dimension_numbers<[1], [0], [0], [1], [0, 0, 1, 1], [], []>} : vector<64x1536xbf16>, vector<1536x256xbf16>, vector<64x256xf32> -> vector<64x256xf32>
    %c0_16 = arith.constant 0 : index
    %c0_17 = arith.constant 0 : index
    %45 = vector.load %arg6[%c0_16, %c0_17] : memref<1x256xf32, #tpu.memory_space<vmem>>, vector<1x256xf32>
    %46 = vector.broadcast %45 : vector<1x256xf32> to vector<64x256xf32>
    %47 = arith.mulf %44, %46 : vector<64x256xf32>
    %c0_18 = arith.constant 0 : index
    %c0_19 = arith.constant 0 : index
    %48 = vector.load %arg7[%c0_18, %c0_19] : memref<1x256xf32, #tpu.memory_space<vmem>>, vector<1x256xf32>
    %49 = vector.broadcast %48 : vector<1x256xf32> to vector<64x256xf32>
    %50 = arith.addf %47, %49 : vector<64x256xf32>
    %cst_20 = arith.constant 0.000000e+00 : f32
    %51 = vector.broadcast %cst_20 : f32 to vector<64x256xf32>
    %52 = arith.cmpf ogt, %50, %51 : vector<64x256xf32>
    %cst_21 = arith.constant 0.000000e+00 : f32
    %53 = vector.broadcast %cst_21 : f32 to vector<64x256xf32>
    %54 = arith.minimumf %50, %53 : vector<64x256xf32>
    %55 = math.exp %54 : vector<64x256xf32>
    %cst_22 = arith.constant 1.000000e+00 : f32
    %56 = vector.broadcast %cst_22 : f32 to vector<64x256xf32>
    %57 = arith.subf %55, %56 : vector<64x256xf32>
    %58 = arith.select %52, %50, %57 : vector<64x256xi1>, vector<64x256xf32>
    %59 = arith.truncf %58 : vector<64x256xf32> to vector<64x256xbf16>
    %60 = vector.shape_cast %59 : vector<64x256xbf16> to vector<8x8x256xbf16>
    %61 = vector.shape_cast %60 : vector<8x8x256xbf16> to vector<4x2x8x256xbf16>
    %62 = vector.extract_strided_slice %61 {offsets = [0, 0, 0, 0], sizes = [4, 1, 8, 256], strides = [1, 1, 1, 1]} : vector<4x2x8x256xbf16> to vector<4x1x8x256xbf16>
    %63 = vector.shape_cast %62 : vector<4x1x8x256xbf16> to vector<4x8x256xbf16>
    %64 = vector.extract_strided_slice %61 {offsets = [0, 1, 0, 0], sizes = [4, 1, 8, 256], strides = [1, 1, 1, 1]} : vector<4x2x8x256xbf16> to vector<4x1x8x256xbf16>
    %65 = vector.shape_cast %64 : vector<4x1x8x256xbf16> to vector<4x8x256xbf16>
    %cst_23 = arith.constant 0.000000e+00 : bf16
    %66 = vector.broadcast %cst_23 : bf16 to vector<1x8x256xbf16>
    %67 = vector.extract_strided_slice %65 {offsets = [0, 0, 0], sizes = [3, 8, 256], strides = [1, 1, 1]} : vector<4x8x256xbf16> to vector<3x8x256xbf16>
    %68 = tpu.concatenate %66, %67 in 0 : vector<1x8x256xbf16>, vector<3x8x256xbf16> -> vector<4x8x256xbf16>
    %69 = vector.shape_cast %68 : vector<4x8x256xbf16> to vector<32x256xbf16>
    %70 = vector.shape_cast %63 : vector<4x8x256xbf16> to vector<32x256xbf16>
    %71 = vector.shape_cast %65 : vector<4x8x256xbf16> to vector<32x256xbf16>
    %72 = tpu.concatenate %69, %70, %71 in 1 : vector<32x256xbf16>, vector<32x256xbf16>, vector<32x256xbf16> -> vector<32x768xbf16>
    %c0_24 = arith.constant 0 : index
    %c0_25 = arith.constant 0 : index
    %73 = vector.load %arg8[%c0_24, %c0_25] : memref<768x256xbf16, #tpu.memory_space<vmem>>, vector<768x256xbf16>
    %cst_26 = arith.constant dense<0.000000e+00> : vector<32x256xf32>
    %74 = tpu.matmul %72, %73, %cst_26 {dimension_numbers = #tpu.dot_dimension_numbers<[1], [0], [0], [1], [0, 0, 1, 1], [], []>} : vector<32x768xbf16>, vector<768x256xbf16>, vector<32x256xf32> -> vector<32x256xf32>
    %c0_27 = arith.constant 0 : index
    %c0_28 = arith.constant 0 : index
    %75 = vector.load %arg9[%c0_27, %c0_28] : memref<1x256xf32, #tpu.memory_space<vmem>>, vector<1x256xf32>
    %76 = vector.broadcast %75 : vector<1x256xf32> to vector<32x256xf32>
    %77 = arith.mulf %74, %76 : vector<32x256xf32>
    %c0_29 = arith.constant 0 : index
    %c0_30 = arith.constant 0 : index
    %78 = vector.load %arg10[%c0_29, %c0_30] : memref<1x256xf32, #tpu.memory_space<vmem>>, vector<1x256xf32>
    %79 = vector.broadcast %78 : vector<1x256xf32> to vector<32x256xf32>
    %80 = arith.addf %77, %79 : vector<32x256xf32>
    %cst_31 = arith.constant 0.000000e+00 : f32
    %81 = vector.broadcast %cst_31 : f32 to vector<32x256xf32>
    %82 = arith.cmpf ogt, %80, %81 : vector<32x256xf32>
    %cst_32 = arith.constant 0.000000e+00 : f32
    %83 = vector.broadcast %cst_32 : f32 to vector<32x256xf32>
    %84 = arith.minimumf %80, %83 : vector<32x256xf32>
    %85 = math.exp %84 : vector<32x256xf32>
    %cst_33 = arith.constant 1.000000e+00 : f32
    %86 = vector.broadcast %cst_33 : f32 to vector<32x256xf32>
    %87 = arith.subf %85, %86 : vector<32x256xf32>
    %88 = arith.select %82, %80, %87 : vector<32x256xi1>, vector<32x256xf32>
    %89 = arith.truncf %88 : vector<32x256xf32> to vector<32x256xbf16>
    %90 = vector.shape_cast %89 : vector<32x256xbf16> to vector<4x8x256xbf16>
    %91 = vector.shape_cast %90 : vector<4x8x256xbf16> to vector<2x2x8x256xbf16>
    %92 = vector.extract_strided_slice %91 {offsets = [0, 0, 0, 0], sizes = [2, 1, 8, 256], strides = [1, 1, 1, 1]} : vector<2x2x8x256xbf16> to vector<2x1x8x256xbf16>
    %93 = vector.shape_cast %92 : vector<2x1x8x256xbf16> to vector<2x8x256xbf16>
    %94 = vector.extract_strided_slice %91 {offsets = [0, 1, 0, 0], sizes = [2, 1, 8, 256], strides = [1, 1, 1, 1]} : vector<2x2x8x256xbf16> to vector<2x1x8x256xbf16>
    %95 = vector.shape_cast %94 : vector<2x1x8x256xbf16> to vector<2x8x256xbf16>
    %cst_34 = arith.constant 0.000000e+00 : bf16
    %96 = vector.broadcast %cst_34 : bf16 to vector<1x8x256xbf16>
    %97 = vector.extract_strided_slice %95 {offsets = [0, 0, 0], sizes = [1, 8, 256], strides = [1, 1, 1]} : vector<2x8x256xbf16> to vector<1x8x256xbf16>
    %98 = tpu.concatenate %96, %97 in 0 : vector<1x8x256xbf16>, vector<1x8x256xbf16> -> vector<2x8x256xbf16>
    %99 = vector.shape_cast %98 : vector<2x8x256xbf16> to vector<16x256xbf16>
    %100 = vector.shape_cast %93 : vector<2x8x256xbf16> to vector<16x256xbf16>
    %101 = vector.shape_cast %95 : vector<2x8x256xbf16> to vector<16x256xbf16>
    %102 = tpu.concatenate %99, %100, %101 in 1 : vector<16x256xbf16>, vector<16x256xbf16>, vector<16x256xbf16> -> vector<16x768xbf16>
    %c0_35 = arith.constant 0 : index
    %c0_36 = arith.constant 0 : index
    %103 = vector.load %arg11[%c0_35, %c0_36] : memref<768x128xbf16, #tpu.memory_space<vmem>>, vector<768x128xbf16>
    %cst_37 = arith.constant dense<0.000000e+00> : vector<16x128xf32>
    %104 = tpu.matmul %102, %103, %cst_37 {dimension_numbers = #tpu.dot_dimension_numbers<[1], [0], [0], [1], [0, 0, 1, 1], [], []>} : vector<16x768xbf16>, vector<768x128xbf16>, vector<16x128xf32> -> vector<16x128xf32>
    %c0_38 = arith.constant 0 : index
    %c0_39 = arith.constant 0 : index
    %105 = vector.load %arg12[%c0_38, %c0_39] : memref<1x128xf32, #tpu.memory_space<vmem>>, vector<1x128xf32>
    %106 = vector.broadcast %105 : vector<1x128xf32> to vector<16x128xf32>
    %107 = arith.mulf %104, %106 : vector<16x128xf32>
    %c0_40 = arith.constant 0 : index
    %c0_41 = arith.constant 0 : index
    %108 = vector.load %arg13[%c0_40, %c0_41] : memref<1x128xf32, #tpu.memory_space<vmem>>, vector<1x128xf32>
    %109 = vector.broadcast %108 : vector<1x128xf32> to vector<16x128xf32>
    %110 = arith.addf %107, %109 : vector<16x128xf32>
    %cst_42 = arith.constant 0.000000e+00 : f32
    %111 = vector.broadcast %cst_42 : f32 to vector<16x128xf32>
    %112 = arith.cmpf ogt, %110, %111 : vector<16x128xf32>
    %cst_43 = arith.constant 0.000000e+00 : f32
    %113 = vector.broadcast %cst_43 : f32 to vector<16x128xf32>
    %114 = arith.minimumf %110, %113 : vector<16x128xf32>
    %115 = math.exp %114 : vector<16x128xf32>
    %cst_44 = arith.constant 1.000000e+00 : f32
    %116 = vector.broadcast %cst_44 : f32 to vector<16x128xf32>
    %117 = arith.subf %115, %116 : vector<16x128xf32>
    %118 = arith.select %112, %110, %117 : vector<16x128xi1>, vector<16x128xf32>
    %119 = arith.truncf %118 : vector<16x128xf32> to vector<16x128xbf16>
    %120 = vector.shape_cast %119 : vector<16x128xbf16> to vector<2x8x128xbf16>
    %121 = vector.extract_strided_slice %120 {offsets = [0, 0, 0], sizes = [1, 8, 128], strides = [1, 1, 1]} : vector<2x8x128xbf16> to vector<1x8x128xbf16>
    %122 = vector.shape_cast %121 : vector<1x8x128xbf16> to vector<8x128xbf16>
    %123 = vector.extract_strided_slice %120 {offsets = [1, 0, 0], sizes = [1, 8, 128], strides = [1, 1, 1]} : vector<2x8x128xbf16> to vector<1x8x128xbf16>
    %124 = vector.shape_cast %123 : vector<1x8x128xbf16> to vector<8x128xbf16>
    %125 = tpu.concatenate %122, %124 in 1 : vector<8x128xbf16>, vector<8x128xbf16> -> vector<8x256xbf16>
    %c0_45 = arith.constant 0 : index
    %c0_46 = arith.constant 0 : index
    %126 = vector.load %arg14[%c0_45, %c0_46] : memref<256x64xbf16, #tpu.memory_space<vmem>>, vector<256x64xbf16>
    %cst_47 = arith.constant dense<0.000000e+00> : vector<8x64xf32>
    %127 = tpu.matmul %125, %126, %cst_47 {dimension_numbers = #tpu.dot_dimension_numbers<[1], [0], [0], [1], [0, 0, 1, 1], [], []>} : vector<8x256xbf16>, vector<256x64xbf16>, vector<8x64xf32> -> vector<8x64xf32>
    %c0_48 = arith.constant 0 : index
    %c0_49 = arith.constant 0 : index
    %128 = vector.load %arg15[%c0_48, %c0_49] : memref<1x64xf32, #tpu.memory_space<vmem>>, vector<1x64xf32>
    %129 = vector.broadcast %128 : vector<1x64xf32> to vector<8x64xf32>
    %130 = arith.addf %127, %129 : vector<8x64xf32>
    %131 = tpu.iota {dimensions = array<i32: 1>} : vector<8x64xi32>
    %cst_50 = arith.constant 0.000000e+00 : f32
    %132 = vector.broadcast %cst_50 : f32 to vector<8x64xf32>
    %133 = arith.maximumf %130, %132 : vector<8x64xf32>
    %134 = math.absf %130 : vector<8x64xf32>
    %cst_51 = arith.constant 0.000000e+00 : f32
    %135 = vector.broadcast %cst_51 : f32 to vector<8x64xf32>
    %136 = arith.subf %135, %134 : vector<8x64xf32>
    %137 = math.exp %136 : vector<8x64xf32>
    %cst_52 = arith.constant 1.000000e+00 : f32
    %138 = vector.broadcast %cst_52 : f32 to vector<8x64xf32>
    %139 = arith.addf %138, %137 : vector<8x64xf32>
    %140 = math.log %139 : vector<8x64xf32>
    %141 = arith.addf %133, %140 : vector<8x64xf32>
    %c32_i32 = arith.constant 32 : i32
    %142 = vector.broadcast %c32_i32 : i32 to vector<8x64xi32>
    %143 = arith.cmpi slt, %131, %142 : vector<8x64xi32>
    %cst_53 = arith.constant 9.99999974E-5 : f32
    %144 = vector.broadcast %cst_53 : f32 to vector<8x64xf32>
    %145 = arith.addf %141, %144 : vector<8x64xf32>
    %146 = arith.select %143, %130, %145 : vector<8x64xi1>, vector<8x64xf32>
    %c0_54 = arith.constant 0 : index
    %c0_55 = arith.constant 0 : index
    %147 = vector.load %arg16[%c0_54, %c0_55] : memref<8x64xf32, #tpu.memory_space<vmem>>, vector<8x64xf32>
    tpu.vector_store %arg16[%c0_54, %c0_55], %146 {strides = array<i32>} : memref<8x64xf32, #tpu.memory_space<vmem>>, vector<8x64xf32>,
    return
  }
  func.func @transform_0(%arg0: i32) -> (i32, i32, i32) {
    %c0_i32 = arith.constant 0 : i32
    %c0_i32_0 = arith.constant 0 : i32
    %c0_i32_1 = arith.constant 0 : i32
    return %c0_i32, %arg0, %c0_i32_0 : i32, i32, i32
  }
  func.func @transform_1(%arg0: i32) -> (i32, i32) {
    %c0_i32 = arith.constant 0 : i32
    %c0_i32_0 = arith.constant 0 : i32
    %c0_i32_1 = arith.constant 0 : i32
    return %c0_i32, %c0_i32_0 : i32, i32
  }
  func.func @transform_2(%arg0: i32) -> (i32, i32) {
    %c0_i32 = arith.constant 0 : i32
    %c0_i32_0 = arith.constant 0 : i32
    %c0_i32_1 = arith.constant 0 : i32
    return %c0_i32, %c0_i32_0 : i32, i32
  }
  func.func @transform_3(%arg0: i32) -> (i32, i32) {
    %c0_i32 = arith.constant 0 : i32
    %c0_i32_0 = arith.constant 0 : i32
    %c0_i32_1 = arith.constant 0 : i32
    return %c0_i32, %c0_i32_0 : i32, i32
  }
  func.func @transform_4(%arg0: i32) -> (i32, i32) {
    %c0_i32 = arith.constant 0 : i32
    %c0_i32_0 = arith.constant 0 : i32
    %c0_i32_1 = arith.constant 0 : i32
    return %c0_i32, %c0_i32_0 : i32, i32
  }
  func.func @transform_5(%arg0: i32) -> (i32, i32) {
    %c0_i32 = arith.constant 0 : i32
    %c0_i32_0 = arith.constant 0 : i32
    %c0_i32_1 = arith.constant 0 : i32
    return %c0_i32, %c0_i32_0 : i32, i32
  }
  func.func @transform_6(%arg0: i32) -> (i32, i32) {
    %c0_i32 = arith.constant 0 : i32
    %c0_i32_0 = arith.constant 0 : i32
    %c0_i32_1 = arith.constant 0 : i32
    return %c0_i32, %c0_i32_0 : i32, i32
  }
  func.func @transform_7(%arg0: i32) -> (i32, i32) {
    %c0_i32 = arith.constant 0 : i32
    %c0_i32_0 = arith.constant 0 : i32
    %c0_i32_1 = arith.constant 0 : i32
    return %c0_i32, %c0_i32_0 : i32, i32
  }
  func.func @transform_8(%arg0: i32) -> (i32, i32) {
    %c0_i32 = arith.constant 0 : i32
    %c0_i32_0 = arith.constant 0 : i32
    %c0_i32_1 = arith.constant 0 : i32
    return %c0_i32, %c0_i32_0 : i32, i32
  }
  func.func @transform_9(%arg0: i32) -> (i32, i32) {
    %c0_i32 = arith.constant 0 : i32
    %c0_i32_0 = arith.constant 0 : i32
    %c0_i32_1 = arith.constant 0 : i32
    return %c0_i32, %c0_i32_0 : i32, i32
  }
  func.func @transform_10(%arg0: i32) -> (i32, i32) {
    %c0_i32 = arith.constant 0 : i32
    %c0_i32_0 = arith.constant 0 : i32
    %c0_i32_1 = arith.constant 0 : i32
    return %c0_i32, %c0_i32_0 : i32, i32
  }
  func.func @transform_11(%arg0: i32) -> (i32, i32) {
    %c0_i32 = arith.constant 0 : i32
    %c0_i32_0 = arith.constant 0 : i32
    %c0_i32_1 = arith.constant 0 : i32
    return %c0_i32, %c0_i32_0 : i32, i32
  }
  func.func @transform_12(%arg0: i32) -> (i32, i32) {
    %c0_i32 = arith.constant 0 : i32
    %c0_i32_0 = arith.constant 0 : i32
    %c0_i32_1 = arith.constant 0 : i32
    return %c0_i32, %c0_i32_0 : i32, i32
  }
  func.func @transform_13(%arg0: i32) -> (i32, i32) {
    %c0_i32 = arith.constant 0 : i32
    %c0_i32_0 = arith.constant 0 : i32
    %c0_i32_1 = arith.constant 0 : i32
    return %c0_i32, %c0_i32_0 : i32, i32
  }
  func.func @transform_14(%arg0: i32) -> (i32, i32) {
    %c0_i32 = arith.constant 0 : i32
    %c0_i32_0 = arith.constant 0 : i32
    %c0_i32_1 = arith.constant 0 : i32
    return %c0_i32, %c0_i32_0 : i32, i32
  }
  func.func @transform_15(%arg0: i32) -> (i32, i32) {
    %c0_i32 = arith.constant 0 : i32
    %c0_i32_0 = arith.constant 0 : i32
    return %arg0, %c0_i32 : i32, i32
  }
}

</mosaic_0001>

<bundles_post_ra>
// kernel: tile.43
= control target key start
LH: loop header
LB: loop body
LE: loop exit
PB: predicated region body
PF: predicated region fallthrough
CT: control target
= control target key end

     0   :  { %s28_s0 = inlined_call_operand.vmem [shape: f32[32], index: 0, kind: input, shape index: {}]   ;;  %s29_s1 = inlined_call_operand.vmem [shape: f32[16,32], index: 1, kind: output, shape index: {}]  }
   0x1   :  { %v4_v0 = vld [vmem:[%s28_s0] ss:$0 sm:$0xff] }
   0x2   :  { %5 = vst [vmem:[%s29_s1] sm:$0xff] %v4_v0  ;;  %8 = vst [vmem:[%s29_s1 + $0x8] sm:$0xff] %v4_v0 }

// kernel: tile.53
= control target key start
LH: loop header
LB: loop body
LE: loop exit
PB: predicated region body
PF: predicated region fallthrough
CT: control target
= control target key end

     0   :  { %s22_s0 = inlined_call_operand.vmem [shape: f32[32], index: 0, kind: input, shape index: {}]   ;;  %s23_s1 = inlined_call_operand.vmem [shape: f32[8,32], index: 1, kind: output, shape index: {}]  }
   0x1   :  { %v4_v0 = vld [vmem:[%s22_s0] ss:$0 sm:$0xff] }
   0x2   :  { %5 = vst [vmem:[%s23_s1] sm:$0xff] %v4_v0 }

// kernel: tile.44
= control target key start
LH: loop header
LB: loop body
LE: loop exit
PB: predicated region body
PF: predicated region fallthrough
CT: control target
= control target key end

     0   :  { %s57_s8 = smov 96   ;;  %vm3_vm0 = vcmask 261120   ;;  %s59_s15 = smov 64   ;;  %vm9_vm1 = vcmask 1048320   ;;  %vm15_vm2 = vcmask 785920   ;;  %vm21_vm3 = vcmask 523520   ;;  %s94_s0 = inlined_call_operand.vmem [shape: f32[16,32], index: 0, kind: input, shape index: {}]   ;;  %s95_s1 = inlined_call_operand.vmem [shape: f32[1,512], index: 1, kind: output, shape index: {}]  }
   0x1   :  { %v48_v0 = vld [vmem:[%s94_s0 + $0x3] ss:$4 sm:$0xf]   ;;  %v49_v1 = vld [vmem:[%s94_s0 + $0x2] ss:$4 sm:$0xf]  }
   0x2   :  { %7 = vrot.lane.b32.xlu0 %v48_v0, %s57_s8  ;;  %v50_v2 = vld [vmem:[%s94_s0 + $0x1] ss:$4 sm:$0xf]   ;;  %v2_v3 = vld [vmem:[%s94_s0] ss:$4 sm:$0xf]  }
   0x3   :  { %s58_s0 = smov 32   ;;  %4 = vst.msk [vmem:[#allocation0] ss:$8 sm:$0xf] %vm3_vm0, %v2_v3  }
   0x4   :  { %19 = vrot.lane.b32.xlu1 %v50_v2, %s58_s0 }
   0x6   :  { %13 = vrot.lane.b32.xlu0 %v49_v1, %s59_s15 }
  0x74   :  { %v8_v4 = vpop.permute.xlu0 %7  }
  0x75   :  { %10 = vst.msk [vmem:[#allocation0] ss:$8 sm:$0xf] %vm9_vm1, %v8_v4  }
  0x76   :  { %v20_v5 = vpop.permute.xlu1 %19  }
  0x78   :  { %v14_v6 = vpop.permute.xlu0 %13  }
  0x79   :  { %16 = vst.msk [vmem:[#allocation0] ss:$8 sm:$0xf] %vm15_vm2, %v14_v6  }
  0x7a   :  { %22 = vst.msk [vmem:[#allocation0] ss:$8 sm:$0xf] %vm21_vm3, %v20_v5  }
  0x81   :  { %v26_v7 = vld [vmem:[#allocation0] sm:$0x1]  ;;  %v30_v8 = vld [vmem:[#allocation0 + $0x8] sm:$0x1]  ;;  %v35_v9 = vld [vmem:[#allocation0 + $0x10] sm:$0x1] }
  0x82   :  { %28 = vst [vmem:[%s95_s1] sm:$0x1] %v26_v7  ;;  %51 = vst [vmem:[%s95_s1 + $0x1] sm:$0x1] %v30_v8  ;;  %v41_v10 = vld [vmem:[#allocation0 + $0x18] sm:$0x1] }
  0x83   :  { %52 = vst [vmem:[%s95_s1 + $0x2] sm:$0x1] %v35_v9  ;;  %53 = vst [vmem:[%s95_s1 + $0x3] sm:$0x1] %v41_v10 }

// kernel: tile.54
= control target key start
LH: loop header
LB: loop body
LE: loop exit
PB: predicated region body
PF: predicated region fallthrough
CT: control target
= control target key end

     0   :  { %s7_s6 = smov 3  ;;  %s14_s9 = smov 3  ;;  %vm4_vm0 = vcmask 261120   ;;  %vm11_vm1 = vcmask 1048320   ;;  %vm18_vm2 = vcmask 785920   ;;  %vm25_vm3 = vcmask 523520   ;;  %s76_s0 = inlined_call_operand.vmem [shape: f32[8,32], index: 0, kind: input, shape index: {}]   ;;  %s77_s1 = inlined_call_operand.vmem [shape: f32[1,256], index: 1, kind: output, shape index: {}]  }
   0x1   :  { %v38_v0 = vld [vmem:[%s76_s0 + $0x3] ss:$4 sm:%s7_s6]   ;;  %s45_s10 = smov 96   ;;  %s21_s11 = smov 3  ;;  %v39_v1 = vld [vmem:[%s76_s0 + $0x2] ss:$4 sm:%s14_s9]  }
   0x2   :  { %9 = vrot.lane.b32.xlu0 %v38_v0, %s45_s10  ;;  %v40_v2 = vld [vmem:[%s76_s0 + $0x1] ss:$4 sm:%s21_s11]   ;;  %s2_s16 = smov 3  ;;  %s46_s17 = smov 32  }
   0x3   :  { %23 = vrot.lane.b32.xlu1 %v40_v2, %s46_s17  ;;  %v3_v3 = vld [vmem:[%s76_s0] ss:$4 sm:%s2_s16]   ;;  %s47_s0 = smov 64  }
   0x4   :  { %5 = vst.msk [vmem:[#allocation0] ss:$8 sm:$0x3] %vm4_vm0, %v3_v3  }
   0x6   :  { %16 = vrot.lane.b32.xlu0 %v39_v1, %s47_s0 }
  0x74   :  { %v10_v4 = vpop.permute.xlu0 %9  }
  0x75   :  { %12 = vst.msk [vmem:[#allocation0] ss:$8 sm:$0x3] %vm11_vm1, %v10_v4   ;;  %v24_v5 = vpop.permute.xlu1 %23  }
  0x78   :  { %v17_v6 = vpop.permute.xlu0 %16  }
  0x79   :  { %19 = vst.msk [vmem:[#allocation0] ss:$8 sm:$0x3] %vm18_vm2, %v17_v6  }
  0x7a   :  { %26 = vst.msk [vmem:[#allocation0] ss:$8 sm:$0x3] %vm25_vm3, %v24_v5  }
  0x81   :  { %v30_v7 = vld [vmem:[#allocation0] sm:$0x1]  ;;  %v34_v8 = vld [vmem:[#allocation0 + $0x8] sm:$0x1] }
  0x82   :  { %32 = vst [vmem:[%s77_s1] sm:$0x1] %v30_v7  ;;  %41 = vst [vmem:[%s77_s1 + $0x1] sm:$0x1] %v34_v8 }

// kernel: tile.63
= control target key start
LH: loop header
LB: loop body
LE: loop exit
PB: predicated region body
PF: predicated region fallthrough
CT: control target
= control target key end

     0   :  { %s22_s0 = inlined_call_operand.vmem [shape: f32[64], index: 0, kind: input, shape index: {}]   ;;  %s23_s1 = inlined_call_operand.vmem [shape: f32[4,64], index: 1, kind: output, shape index: {}]  }
   0x1   :  { %v4_v0 = vld [vmem:[%s22_s0] ss:$0 sm:$0xff] }
   0x2   :  { %5 = vst [vmem:[%s23_s1] sm:$0xf] %v4_v0 }

// kernel: tile.74
= control target key start
LH: loop header
LB: loop body
LE: loop exit
PB: predicated region body
PF: predicated region fallthrough
CT: control target
= control target key end

     0   :  { %vm7_vm0 = vcmask 523264   ;;  %vm13_vm1 = vcmask 1048064   ;;  %s39_s0 = inlined_call_operand.vmem [shape: f32[2,64], index: 0, kind: input, shape index: {}]   ;;  %s40_s1 = inlined_call_operand.vmem [shape: f32[1,128], index: 1, kind: output, shape index: {}]  }
   0x1   :  { %v4_v0 = vld [vmem:[%s39_s0] sm:$0x3]  ;;  %s22_s0 = smov 64  }
   0x2   :  { %5 = vst [vmem:[#allocation1] sm:$0x3] %v4_v0 }
   0x9   :  { %v10_v1 = vld [vmem:[#allocation1 + $0x1] sm:$0x1]   ;;  %v6_v2 = vld [vmem:[#allocation1] sm:$0x1]  }
   0xa   :  { %11 = vrot.lane.b32.xlu0 %v10_v1, %s22_s0  ;;  %8 = vst.msk [vmem:[#allocation0] sm:$0x1] %vm7_vm0, %v6_v2  }
  0x7c   :  { %v12_v3 = vpop.permute.xlu0 %11  }
  0x7d   :  { %14 = vst.msk [vmem:[#allocation0] sm:$0x1] %vm13_vm1, %v12_v3  }
  0x84   :  { %v18_v4 = vld [vmem:[#allocation0] sm:$0x1] }
  0x85   :  { %20 = vst [vmem:[%s40_s1] sm:$0x1] %v18_v4 }

// kernel: tile.64
= control target key start
LH: loop header
LB: loop body
LE: loop exit
PB: predicated region body
PF: predicated region fallthrough
CT: control target
= control target key end

     0   :  { %s6_s8 = smov 3  ;;  %vm8_vm0 = vcmask 523264   ;;  %s30_s9 = smov 64   ;;  %vm15_vm1 = vcmask 1048064   ;;  %s50_s0 = inlined_call_operand.vmem [shape: f32[4,64], index: 0, kind: input, shape index: {}]   ;;  %s51_s1 = inlined_call_operand.vmem [shape: f32[1,256], index: 1, kind: output, shape index: {}]  }
   0x1   :  { %v4_v0 = vld [vmem:[%s50_s0] sm:$0xf]  ;;  %s11_s0 = smov 3 }
   0x2   :  { %5 = vst [vmem:[#allocation1] sm:$0xf] %v4_v0 }
   0x9   :  { %v12_v1 = vld [vmem:[#allocation1 + $0x1] ss:$2 sm:%s11_s0]   ;;  %v7_v2 = vld [vmem:[#allocation1] ss:$2 sm:%s6_s8]  }
   0xa   :  { %13 = vrot.lane.b32.xlu0 %v12_v1, %s30_s9  ;;  %9 = vst.msk [vmem:[#allocation0] ss:$8 sm:$0x3] %vm8_vm0, %v7_v2  }
  0x7c   :  { %v14_v3 = vpop.permute.xlu0 %13  }
  0x7d   :  { %16 = vst.msk [vmem:[#allocation0] ss:$8 sm:$0x3] %vm15_vm1, %v14_v3  }
  0x84   :  { %v20_v4 = vld [vmem:[#allocation0] sm:$0x1]  ;;  %v24_v5 = vld [vmem:[#allocation0 + $0x8] sm:$0x1] }
  0x85   :  { %22 = vst [vmem:[%s51_s1] sm:$0x1] %v20_v4  ;;  %28 = vst [vmem:[%s51_s1 + $0x1] sm:$0x1] %v24_v5 }

// kernel: tile.73
= control target key start
LH: loop header
LB: loop body
LE: loop exit
PB: predicated region body
PF: predicated region fallthrough
CT: control target
= control target key end

     0   :  { %s22_s0 = inlined_call_operand.vmem [shape: f32[64], index: 0, kind: input, shape index: {}]   ;;  %s23_s1 = inlined_call_operand.vmem [shape: f32[2,64], index: 1, kind: output, shape index: {}]  }
   0x1   :  { %v4_v0 = vld [vmem:[%s22_s0] ss:$0 sm:$0xff] }
   0x2   :  { %5 = vst [vmem:[%s23_s1] sm:$0x3] %v4_v0 }

// kernel: comp_encoder_forward.1
= control target key start
LH: loop header
LB: loop body
LE: loop exit
PB: predicated region body
PF: predicated region fallthrough
CT: control target
= control target key end

     0   :  { %v7175_v1 = vmov 0   ;;  %s10112_s1 = inlined_call_operand.vmem [shape: bf16[384,512], index: 1, kind: input, shape index: {}]   ;;  %s10113_s0 = inlined_call_operand.vmem [shape: bf16[32,8,128], index: 0, kind: input, shape index: {}]   ;;  %s10114_s4 = inlined_call_operand.vmem [shape: bf16[1536,256], index: 4, kind: input, shape index: {}]   ;;  %s10115_s2 = inlined_call_operand.vmem [shape: f32[1,512], index: 2, kind: input, shape index: {}]   ;;  %s10116_s3 = inlined_call_operand.vmem [shape: f32[1,512], index: 3, kind: input, shape index: {}]   ;;  %s10117_s7 = inlined_call_operand.vmem [shape: bf16[768,256], index: 7, kind: input, shape index: {}]   ;;  %s10118_s5 = inlined_call_operand.vmem [shape: f32[1,256], index: 5, kind: input, shape index: {}]   ;;  %s10119_s6 = inlined_call_operand.vmem [shape: f32[1,256], index: 6, kind: input, shape index: {}]   ;;  %s10120_s10 = inlined_call_operand.vmem [shape: bf16[768,128], index: 10, kind: input, shape index: {}]   ;;  %s10121_s8 = inlined_call_operand.vmem [shape: f32[1,256], index: 8, kind: input, shape index: {}]   ;;  %s10122_s9 = inlined_call_operand.vmem [shape: f32[1,256], index: 9, kind: input, shape index: {}]   ;;  %s10123_s13 = inlined_call_operand.vmem [shape: bf16[256,64], index: 13, kind: input, shape index: {}]   ;;  %s10124_s11 = inlined_call_operand.vmem [shape: f32[1,128], index: 11, kind: input, shape index: {}]   ;;  %s10125_s12 = inlined_call_operand.vmem [shape: f32[1,128], index: 12, kind: input, shape index: {}]   ;;  %s10126_s14 = inlined_call_operand.vmem [shape: f32[1,64], index: 14, kind: input, shape index: {}]   ;;  %s10127_s15 = inlined_call_operand.vmem [shape: f32[8,64], index: 15, kind: output, shape index: {}]  }
   0x1   :  { %v6328_v0 = vld [vmem:[%s10112_s1 + $0x4] ss:$16 sps:$4 sm:$0xff]   ;;  %918 = vmatprep.mubr.bf16.mxu1 %v7175_v1  ;;  %v6332_v3 = vld [vmem:[%s10112_s1] ss:$16 sps:$4 sm:$0xff]   ;;  %v7364_v35 = vld [vmem:[%s10113_s0 + $0xc] sm:$0xf] }
   0x2   :  { %v6330_v2 = vld [vmem:[%s10112_s1 + $0x204] ss:$16 sps:$4 sm:$0xff]   ;;  %773 = vmatprep.subr.bf16.mxu0 %v6328_v0  ;;  %v6333_v4 = vld [vmem:[%s10112_s1 + $0x200] ss:$16 sps:$4 sm:$0xff]   ;;  %v6381_v36 = vld [vmem:[%s10112_s1 + $0xc] ss:$16 sps:$4 sm:$0xff]  }
   0x3   :  { %886 = vmatprep.subr.bf16.mxu1 %v6330_v2  ;;  %v6334_v5 = vld [vmem:[%s10112_s1 + $0x24] ss:$16 sps:$4 sm:$0xff]   ;;  %774 = vmatpush1.bf16.msra.mxu0 %v6332_v3  ;;  %v6338_v7 = vld [vmem:[%s10112_s1 + $0x20] ss:$16 sps:$4 sm:$0xff]   ;;  %v6379_v38 = vld [vmem:[%s10112_s1 + $0x8] ss:$16 sps:$4 sm:$0xff]  }
   0x4   :  { %887 = vmatpush1.bf16.msra.mxu1 %v6333_v4  ;;  %v6336_v6 = vld [vmem:[%s10112_s1 + $0x224] ss:$16 sps:$4 sm:$0xff]   ;;  %775 = vmatprep.subr.bf16.mxu0 %v6334_v5  ;;  %v6339_v8 = vld [vmem:[%s10112_s1 + $0x220] ss:$16 sps:$4 sm:$0xff]   ;;  %v6387_v41 = vld [vmem:[%s10112_s1 + $0x2c] ss:$16 sps:$4 sm:$0xff]  }
   0x5   :  { %888 = vmatprep.subr.bf16.mxu1 %v6336_v6  ;;  %v6340_v9 = vld [vmem:[%s10112_s1 + $0x44] ss:$16 sps:$4 sm:$0xff]   ;;  %v6344_v11 = vld [vmem:[%s10112_s1 + $0x40] ss:$16 sps:$4 sm:$0xff]   ;;  %v6385_v42 = vld [vmem:[%s10112_s1 + $0x28] ss:$16 sps:$4 sm:$0xff]  }
   0x6   :  { %v6342_v10 = vld [vmem:[%s10112_s1 + $0x244] ss:$16 sps:$4 sm:$0xff]   ;;  %v6345_v12 = vld [vmem:[%s10112_s1 + $0x240] ss:$16 sps:$4 sm:$0xff]   ;;  %v7403_v46 = vld [vmem:[%s10113_s0 + $0x1c] sm:$0xf] }
   0x7   :  { %776 = vmatpush1.bf16.msra.mxu0 %v6338_v7  ;;  %v6346_v13 = vld [vmem:[%s10112_s1 + $0x64] ss:$16 sps:$4 sm:$0xff]   ;;  %v6350_v15 = vld [vmem:[%s10112_s1 + $0x60] ss:$16 sps:$4 sm:$0xff]   ;;  %v6394_v47 = vld [vmem:[%s10112_s1 + $0x4c] ss:$16 sps:$4 sm:$0xff]  }
   0x8   :  { %889 = vmatpush1.bf16.msra.mxu1 %v6339_v8  ;;  %777 = vmatprep.subr.bf16.mxu0 %v6340_v9  ;;  %v6348_v14 = vld [vmem:[%s10112_s1 + $0x264] ss:$16 sps:$4 sm:$0xff]   ;;  %v6351_v16 = vld [vmem:[%s10112_s1 + $0x260] ss:$16 sps:$4 sm:$0xff]   ;;  %v6392_v49 = vld [vmem:[%s10112_s1 + $0x48] ss:$16 sps:$4 sm:$0xff]  }
   0x9   :  { %890 = vmatprep.subr.bf16.mxu1 %v6342_v10  ;;  %v6352_v17 = vld [vmem:[%s10112_s1 + $0x84] ss:$16 sps:$4 sm:$0xff]   ;;  %v6356_v19 = vld [vmem:[%s10112_s1 + $0x80] ss:$16 sps:$4 sm:$0xff]   ;;  %v6400_v52 = vld [vmem:[%s10112_s1 + $0x6c] ss:$16 sps:$4 sm:$0xff]  }
   0xa   :  { %v6354_v18 = vld [vmem:[%s10112_s1 + $0x284] ss:$16 sps:$4 sm:$0xff]   ;;  %v6357_v20 = vld [vmem:[%s10112_s1 + $0x280] ss:$16 sps:$4 sm:$0xff]   ;;  %v6398_v53 = vld [vmem:[%s10112_s1 + $0x68] ss:$16 sps:$4 sm:$0xff]  }
   0xb   :  { %778 = vmatpush1.bf16.msra.mxu0 %v6344_v11  ;;  %v6358_v21 = vld [vmem:[%s10112_s1 + $0xa4] ss:$16 sps:$4 sm:$0xff]   ;;  %v6362_v23 = vld [vmem:[%s10112_s1 + $0xa0] ss:$16 sps:$4 sm:$0xff]   ;;  %v7443_v57 = vld [vmem:[%s10113_s0 + $0x2c] sm:$0xf] }
   0xc   :  { %891 = vmatpush1.bf16.msra.mxu1 %v6345_v12  ;;  %779 = vmatprep.subr.bf16.mxu0 %v6346_v13  ;;  %v6360_v22 = vld [vmem:[%s10112_s1 + $0x2a4] ss:$16 sps:$4 sm:$0xff]   ;;  %v6363_v24 = vld [vmem:[%s10112_s1 + $0x2a0] ss:$16 sps:$4 sm:$0xff]   ;;  %v6407_v58 = vld [vmem:[%s10112_s1 + $0x8c] ss:$16 sps:$4 sm:$0xff]  }
   0xd   :  { %892 = vmatprep.subr.bf16.mxu1 %v6348_v14  ;;  %v6364_v25 = vld [vmem:[%s10112_s1 + $0xc4] ss:$16 sps:$4 sm:$0xff]   ;;  %v6368_v27 = vld [vmem:[%s10112_s1 + $0xc0] ss:$16 sps:$4 sm:$0xff]   ;;  %v6405_v61 = vld [vmem:[%s10112_s1 + $0x88] ss:$16 sps:$4 sm:$0xff]  }
   0xe   :  { %v6366_v26 = vld [vmem:[%s10112_s1 + $0x2c4] ss:$16 sps:$4 sm:$0xff]   ;;  %v6369_v28 = vld [vmem:[%s10112_s1 + $0x2c0] ss:$16 sps:$4 sm:$0xff]   ;;  %v6413_v0 = vld [vmem:[%s10112_s1 + $0xac] ss:$16 sps:$4 sm:$0xff]  }
   0xf   :  { %780 = vmatpush1.bf16.msra.mxu0 %v6350_v15  ;;  %v6370_v29 = vld [vmem:[%s10112_s1 + $0xe4] ss:$16 sps:$4 sm:$0xff]   ;;  %v6374_v31 = vld [vmem:[%s10112_s1 + $0xe0] ss:$16 sps:$4 sm:$0xff]   ;;  %v6411_v2 = vld [vmem:[%s10112_s1 + $0xa8] ss:$16 sps:$4 sm:$0xff]  }
  0x10   :  { %893 = vmatpush1.bf16.msra.mxu1 %v6351_v16  ;;  %781 = vmatprep.subr.bf16.mxu0 %v6352_v17  ;;  %v6372_v30 = vld [vmem:[%s10112_s1 + $0x2e4] ss:$16 sps:$4 sm:$0xff]   ;;  %v6375_v32 = vld [vmem:[%s10112_s1 + $0x2e0] ss:$16 sps:$4 sm:$0xff]   ;;  %v7486_v5 = vld [vmem:[%s10113_s0 + $0x3c] sm:$0xf] }
  0x11   :  { %894 = vmatprep.subr.bf16.mxu1 %v6354_v18  ;;  %v6376_v33 = vld [vmem:[%s10112_s1 + $0x104] ss:$16 sps:$4 sm:$0xff]   ;;  %v6382_v39 = vld [vmem:[%s10112_s1 + $0x100] ss:$16 sps:$4 sm:$0xff]   ;;  %v6420_v7 = vld [vmem:[%s10112_s1 + $0xcc] ss:$16 sps:$4 sm:$0xff]  }
  0x12   :  { %v7359_v34 = vld [vmem:[%s10113_s0 + $0x4] sm:$0xf]  ;;  %v6388_v43 = vld [vmem:[%s10112_s1 + $0x120] ss:$16 sps:$4 sm:$0xff]   ;;  %v7398_v45 = vld [vmem:[%s10113_s0 + $0x14] sm:$0xf] }
  0x13   :  { %782 = vmatpush1.bf16.msra.mxu0 %v6356_v19  ;;  %v7371_v37 = vcombine.low %v7359_v34, %v7364_v35  ;;  %v6383_v40 = vld [vmem:[%s10112_s1 + $0x124] ss:$16 sps:$4 sm:$0xff]   ;;  %v7411_v48 = vcombine.low %v7398_v45, %v7403_v46  ;;  %v6395_v50 = vld [vmem:[%s10112_s1 + $0x140] ss:$16 sps:$4 sm:$0xff]   ;;  %v6418_v9 = vld [vmem:[%s10112_s1 + $0xc8] ss:$16 sps:$4 sm:$0xff]   ;;  %v7534_v18 = vcombine.low %v7175_v1, %v7359_v34 }
  0x14   :  { %895 = vmatpush1.bf16.msra.mxu1 %v6357_v20  ;;  %783 = vmatprep.subr.bf16.mxu0 %v6358_v21  ;;  %v6389_v44 = vld [vmem:[%s10112_s1 + $0x144] ss:$16 sps:$4 sm:$0xff]   ;;  %v6401_v54 = vld [vmem:[%s10112_s1 + $0x160] ss:$16 sps:$4 sm:$0xff]   ;;  %v6426_v12 = vld [vmem:[%s10112_s1 + $0xec] ss:$16 sps:$4 sm:$0xff]  }
  0x15   :  { %896 = vmatprep.subr.bf16.mxu1 %v6360_v22  ;;  %v6396_v51 = vld [vmem:[%s10112_s1 + $0x164] ss:$16 sps:$4 sm:$0xff]   ;;  %v7452_v59 = vld [vmem:[%s10113_s0] ss:$8 sps:$4 sm:$0xff]   ;;  %v7526_v16 = vld [vmem:[%s10113_s0 + $0x4c] sm:$0xf] }
  0x16   :  { %v6402_v55 = vld [vmem:[%s10112_s1 + $0x184] ss:$16 sps:$4 sm:$0xff]   ;;  %v6408_v62 = vld [vmem:[%s10112_s1 + $0x180] ss:$16 sps:$4 sm:$0xff]   ;;  %805 = vmatprep.mubr.bf16.mxu0 %v7452_v59  ;;  %v6424_v13 = vld [vmem:[%s10112_s1 + $0xe8] ss:$16 sps:$4 sm:$0xff]  }
  0x17   :  { %784 = vmatpush1.bf16.msra.mxu0 %v6362_v23  ;;  %v7438_v56 = vld [vmem:[%s10113_s0 + $0x24] sm:$0xf]  ;;  %v6414_v3 = vld [vmem:[%s10112_s1 + $0x1a0] ss:$16 sps:$4 sm:$0xff]   ;;  %v7481_v4 = vld [vmem:[%s10113_s0 + $0x34] sm:$0xf] }
  0x18   :  { %897 = vmatpush1.bf16.msra.mxu1 %v6363_v24  ;;  %785 = vmatprep.subr.bf16.mxu0 %v6364_v25  ;;  %v7456_v60 = vcombine.low %v7438_v56, %v7443_v57  ;;  %v6409_v63 = vld [vmem:[%s10112_s1 + $0x1a4] ss:$16 sps:$4 sm:$0xff]   ;;  %v7497_v8 = vcombine.low %v7481_v4, %v7486_v5  ;;  %v6421_v10 = vld [vmem:[%s10112_s1 + $0x1c0] ss:$16 sps:$4 sm:$0xff]   ;;  %v6432_v17 = vld [vmem:[%s10112_s1 + $0x10c] ss:$16 sps:$4 sm:$0xff]  }
  0x19   :  { %898 = vmatprep.subr.bf16.mxu1 %v6366_v26  ;;  %v6415_v6 = vld [vmem:[%s10112_s1 + $0x1c4] ss:$16 sps:$4 sm:$0xff]   ;;  %v6427_v14 = vld [vmem:[%s10112_s1 + $0x1e0] ss:$16 sps:$4 sm:$0xff]   ;;  %v6430_v20 = vld [vmem:[%s10112_s1 + $0x108] ss:$16 sps:$4 sm:$0xff]  }
  0x1a   :  { %v6422_v11 = vld [vmem:[%s10112_s1 + $0x1e4] ss:$16 sps:$4 sm:$0xff]   ;;  %v7546_v21 = vld [vmem:[%s10113_s0 + $0x10] ss:$8 sps:$4 sm:$0xff]   ;;  %v6435_v22 = vld [vmem:[%s10112_s1 + $0x12c] ss:$16 sps:$4 sm:$0xff]  }
  0x1b   :  { %786 = vmatpush1.bf16.msra.mxu0 %v6368_v27  ;;  %v7521_v15 = vld [vmem:[%s10113_s0 + $0x44] sm:$0xf]  ;;  %v6433_v23 = vld [vmem:[%s10112_s1 + $0x128] ss:$16 sps:$4 sm:$0xff]   ;;  %v7559_v24 = vld [vmem:[%s10113_s0 + $0x54] sm:$0xf]  ;;  %v7573_v27 = vcombine.low %v7364_v35, %v7398_v45 }
  0x1c   :  { %899 = vmatpush1.bf16.msra.mxu1 %v6369_v28  ;;  %787 = vmatprep.subr.bf16.mxu0 %v6370_v29  ;;  %v7538_v19 = vcombine.low %v7521_v15, %v7526_v16  ;;  %v7565_v25 = vld [vmem:[%s10113_s0 + $0x5c] sm:$0xf]  ;;  %v6439_v29 = vld [vmem:[%s10112_s1 + $0x148] ss:$16 sps:$4 sm:$0xff]   ;;  %v7604_v34 = vld [vmem:[%s10113_s0 + $0x6c] sm:$0xf] }
  0x1d   :  { %900 = vmatprep.subr.bf16.mxu1 %v6372_v30  ;;  %v6441_v26 = vld [vmem:[%s10112_s1 + $0x14c] ss:$16 sps:$4 sm:$0xff]   ;;  %v7577_v28 = vcombine.low %v7559_v24, %v7565_v25  ;;  %v7585_v30 = vld [vmem:[%s10113_s0 + $0x20] ss:$8 sps:$4 sm:$0xff]  }
  0x1e   :  { %v6450_v35 = vld [vmem:[%s10112_s1 + $0x18c] ss:$16 sps:$4 sm:$0xff]  }
  0x1f   :  { %788 = vmatpush1.bf16.msra.mxu0 %v6374_v31  ;;  %v6444_v31 = vld [vmem:[%s10112_s1 + $0x16c] ss:$16 sps:$4 sm:$0xff]  }
  0x20   :  { %901 = vmatpush1.bf16.msra.mxu1 %v6375_v32  ;;  %789 = vmatprep.subr.bf16.mxu0 %v6376_v33  ;;  %v6442_v32 = vld [vmem:[%s10112_s1 + $0x168] ss:$16 sps:$4 sm:$0xff]   ;;  %v7598_v33 = vld [vmem:[%s10113_s0 + $0x64] sm:$0xf]  ;;  %v6459_v45 = vld [vmem:[%s10112_s1 + $0x1cc] ss:$16 sps:$4 sm:$0xff]  }
  0x21   :  { %999 = vmatprep.subr.bf16.mxu1 %v6381_v36  ;;  %v7612_v36 = vcombine.low %v7403_v46, %v7438_v56  ;;  %v7649_v46 = vcombine.low %v7443_v57, %v7481_v4  ;;  %v7685_v56 = vld [vmem:[%s10113_s0 + $0x50] ss:$8 sps:$4 sm:$0xff]   ;;  %v6472_v57 = vld [vmem:[%s10112_s1 + $0x22c] ss:$16 sps:$4 sm:$0xff]   ;;  %v5400_v4 = vcombine.low %v7565_v25, %v7598_v33  ;;  %v6507_v25 = vld [vmem:[%s10114_s4 + $0x40] ss:$8 sps:$4 sm:$0xff]  }
  0x23   :  { %919 = vmatmul.mubr.bf16.vlgmr.msra.gmra.mrb[0].mxu1 %v7371_v37  ;;  %790 = vmatpush1.bf16.msra.mxu0 %v6382_v39  ;;  %v6448_v39 = vld [vmem:[%s10112_s1 + $0x188] ss:$16 sps:$4 sm:$0xff]  }
  0x24   :  { %1000 = vmatpush1.bf16.msra.mxu1 %v6379_v38  ;;  %791 = vmatprep.subr.bf16.mxu0 %v6383_v40  ;;  %v7616_v38 = vcombine.low %v7598_v33, %v7604_v34  ;;  %v7624_v40 = vld [vmem:[%s10113_s0 + $0x30] ss:$8 sps:$4 sm:$0xff]   ;;  %v6521_v33 = vld [vmem:[%s10114_s4 + $0x84] ss:$8 sps:$4 sm:$0xff]  }
  0x25   :  { %1001 = vmatprep.subr.bf16.mxu1 %v6387_v41  ;;  %928 = vmatprep.mubr.bf16.mxu1 %v7175_v1  ;;  %v6453_v41 = vld [vmem:[%s10112_s1 + $0x1ac] ss:$16 sps:$4 sm:$0xff]  }
  0x27   :  { %792 = vmatpush1.bf16.msra.mxu0 %v6388_v43  ;;  %v7638_v43 = vld [vmem:[%s10113_s0 + $0x74] sm:$0xf] }
  0x28   :  { %1002 = vmatpush1.bf16.msra.mxu1 %v6385_v42  ;;  %793 = vmatprep.subr.bf16.mxu0 %v6389_v44  ;;  %v6451_v42 = vld [vmem:[%s10112_s1 + $0x1a8] ss:$16 sps:$4 sm:$0xff]   ;;  %v82_v44 = vld [vmem:[%s10113_s0 + $0x7c] sm:$0xf] }
  0x29   :  { %1003 = vmatprep.subr.bf16.mxu1 %v6394_v47  ;;  %v7652_v47 = vcombine.low %v7638_v43, %v82_v44  ;;  %v6536_v44 = vld [vmem:[%s10114_s4 + $0xd4] ss:$8 sps:$4 sm:$0xff]  }
  0x2b   :  { %929 = vmatmul.mubr.bf16.gmra.mrb[4].mxu1 %v7411_v48  ;;  %794 = vmatpush1.bf16.msra.mxu0 %v6395_v50  ;;  %v7660_v50 = vld [vmem:[%s10113_s0 + $0x40] ss:$8 sps:$4 sm:$0xff]  }
  0x2c   :  { %1004 = vmatpush1.bf16.msra.mxu1 %v6392_v49  ;;  %795 = vmatprep.subr.bf16.mxu0 %v6396_v51  ;;  %v6457_v49 = vld [vmem:[%s10112_s1 + $0x1c8] ss:$16 sps:$4 sm:$0xff]   ;;  %v6462_v51 = vld [vmem:[%s10112_s1 + $0x1ec] ss:$16 sps:$4 sm:$0xff]  }
  0x2d   :  { %1005 = vmatprep.subr.bf16.mxu1 %v6400_v52  ;;  %938 = vmatprep.mubr.bf16.mxu1 %v7175_v1  ;;  %v6460_v52 = vld [vmem:[%s10112_s1 + $0x1e8] ss:$16 sps:$4 sm:$0xff]  }
  0x2f   :  { %796 = vmatpush1.bf16.msra.mxu0 %v6401_v54  ;;  %v7677_v54 = vcombine.low %v7486_v5, %v7521_v15  ;;  %v6478_v5 = vld [vmem:[%s10113_s0 + $0x70] ss:$8 sps:$4 sm:$0xff]   ;;  %v6495_v15 = vld [vmem:[%s10114_s4] ss:$8 sps:$4 sm:$0xff]  }
  0x30   :  { %1006 = vmatpush1.bf16.msra.mxu1 %v6398_v53  ;;  %797 = vmatprep.subr.bf16.mxu0 %v6402_v55  ;;  %v6467_v53 = vld [vmem:[%s10112_s1 + $0x20c] ss:$16 sps:$4 sm:$0xff]   ;;  %v6465_v55 = vld [vmem:[%s10112_s1 + $0x208] ss:$16 sps:$4 sm:$0xff]  }
  0x31   :  { %1007 = vmatprep.subr.bf16.mxu1 %v6407_v58  ;;  %v6470_v58 = vld [vmem:[%s10112_s1 + $0x228] ss:$16 sps:$4 sm:$0xff]  }
  0x33   :  { %939 = vmatmul.mubr.bf16.gmra.mrb[8].mxu1 %v7456_v60  ;;  %798 = vmatpush1.bf16.msra.mxu0 %v6408_v62  ;;  %v7707_v62 = vld [vmem:[%s10113_s0 + $0x60] ss:$8 sps:$4 sm:$0xff]  }
  0x34   :  { %1008 = vmatpush1.bf16.msra.mxu1 %v6405_v61  ;;  %799 = vmatprep.subr.bf16.mxu0 %v6409_v63  ;;  %v7702_v61 = vcombine.low %v7526_v16, %v7559_v24  ;;  %v6475_v63 = vld [vmem:[%s10112_s1 + $0x248] ss:$16 sps:$4 sm:$0xff]   ;;  %v6509_v24 = vld [vmem:[%s10114_s4 + $0x44] ss:$8 sps:$4 sm:$0xff]  }
  0x35   :  { %1009 = vmatprep.subr.bf16.mxu1 %v6413_v0  ;;  %948 = vmatprep.mubr.bf16.mxu1 %v7175_v1  ;;  %v6482_v0 = vld [vmem:[%s10112_s1 + $0x26c] ss:$16 sps:$4 sm:$0xff]   ;;  %v6498_v16 = vld [vmem:[%s10114_s4 + $0x10] ss:$8 sps:$4 sm:$0xff]  }
  0x37   :  { %800 = vmatpush1.bf16.msra.mxu0 %v6414_v3  ;;  %v6485_v3 = vld [vmem:[%s10112_s1 + $0x28c] ss:$16 sps:$4 sm:$0xff]  }
  0x38   :  { %1010 = vmatpush1.bf16.msra.mxu1 %v6411_v2  ;;  %801 = vmatprep.subr.bf16.mxu0 %v6415_v6  ;;  %v6480_v2 = vld [vmem:[%s10112_s1 + $0x268] ss:$16 sps:$4 sm:$0xff]  }
  0x39   :  { %1011 = vmatprep.subr.bf16.mxu1 %v6420_v7  ;;  %v6483_v6 = vld [vmem:[%s10112_s1 + $0x288] ss:$16 sps:$4 sm:$0xff]   ;;  %v6488_v7 = vld [vmem:[%s10112_s1 + $0x2ac] ss:$16 sps:$4 sm:$0xff]  }
  0x3b   :  { %949 = vmatmul.mubr.bf16.gmra.mrb[12].mxu1 %v7497_v8  ;;  %802 = vmatpush1.bf16.msra.mxu0 %v6421_v10  ;;  %v6491_v10 = vld [vmem:[%s10112_s1 + $0x2cc] ss:$16 sps:$4 sm:$0xff]  }
  0x3c   :  { %1012 = vmatpush1.bf16.msra.mxu1 %v6418_v9  ;;  %803 = vmatprep.subr.bf16.mxu0 %v6422_v11  ;;  %v6486_v9 = vld [vmem:[%s10112_s1 + $0x2a8] ss:$16 sps:$4 sm:$0xff]   ;;  %v5401_v11 = vcombine.low %v7604_v34, %v7638_v43  ;;  %v6533_v43 = vld [vmem:[%s10114_s4 + $0xc4] ss:$8 sps:$4 sm:$0xff]  }
  0x3d   :  { %1013 = vmatprep.subr.bf16.mxu1 %v6426_v12  ;;  %958 = vmatprep.mubr.bf16.mxu1 %v7175_v1  ;;  %v6489_v12 = vld [vmem:[%s10112_s1 + $0x2c8] ss:$16 sps:$4 sm:$0xff]  }
  0x3e   :  { %v6519_v34 = vld [vmem:[%s10114_s4 + $0x80] ss:$8 sps:$4 sm:$0xff]  }
  0x3f   :  { %804 = vmatpush1.bf16.msra.mxu0 %v6427_v14  ;;  %v6494_v14 = vld [vmem:[%s10112_s1 + $0x2ec] ss:$16 sps:$4 sm:$0xff]  }
  0x40   :  { %1014 = vmatpush1.bf16.msra.mxu1 %v6424_v13  ;;  %v6497_v13 = vld [vmem:[%s10114_s4 + $0x4] ss:$8 sps:$4 sm:$0xff]  }
  0x41   :  { %1015 = vmatprep.subr.bf16.mxu1 %v6432_v17  ;;  %3157 = vmatprep.subr.bf16.mxu0 %v6497_v13  ;;  %v6500_v17 = vld [vmem:[%s10114_s4 + $0x14] ss:$8 sps:$4 sm:$0xff]  }
  0x42   :  { %806 = vmatmul.mubr.bf16.vlgmr.msra.gmra.mrb[0].mxu0 %v7534_v18 }
  0x43   :  { %959 = vmatmul.mubr.bf16.gmra.mrb[16].mxu1 %v7538_v19  ;;  %815 = vmatprep.mubr.bf16.mxu0 %v7546_v21 }
  0x44   :  { %1016 = vmatpush1.bf16.msra.mxu1 %v6430_v20  ;;  %968 = vmatprep.mubr.bf16.mxu1 %v7175_v1  ;;  %v6503_v20 = vld [vmem:[%s10114_s4 + $0x24] ss:$8 sps:$4 sm:$0xff]  }
  0x45   :  { %1017 = vmatprep.subr.bf16.mxu1 %v6435_v22  ;;  %3158 = vmatpush1.bf16.msra.mxu0 %v6495_v15  ;;  %v6504_v22 = vld [vmem:[%s10114_s4 + $0x30] ss:$8 sps:$4 sm:$0xff]  }
  0x46   :  { %3159 = vmatprep.subr.bf16.mxu0 %v6500_v17 }
  0x48   :  { %1018 = vmatpush1.bf16.msra.mxu1 %v6433_v23  ;;  %v6506_v23 = vld [vmem:[%s10114_s4 + $0x34] ss:$8 sps:$4 sm:$0xff]  }
  0x49   :  { %1019 = vmatprep.subr.bf16.mxu1 %v6441_v26  ;;  %3160 = vmatpush1.bf16.msra.mxu0 %v6498_v16  ;;  %v6510_v26 = vld [vmem:[%s10114_s4 + $0x50] ss:$8 sps:$4 sm:$0xff]  }
  0x4a   :  { %816 = vmatmul.mubr.bf16.gmra.mrb[4].mxu0 %v7573_v27  ;;  %3161 = vmatprep.subr.bf16.mxu0 %v6503_v20 }
  0x4b   :  { %969 = vmatmul.mubr.bf16.gmra.mrb[20].mxu1 %v7577_v28  ;;  %825 = vmatprep.mubr.bf16.mxu0 %v7585_v30 }
  0x4c   :  { %1020 = vmatpush1.bf16.msra.mxu1 %v6439_v29  ;;  %978 = vmatprep.mubr.bf16.mxu1 %v7175_v1  ;;  %v6515_v29 = vld [vmem:[%s10114_s4 + $0x64] ss:$8 sps:$4 sm:$0xff]  }
  0x4d   :  { %1021 = vmatprep.subr.bf16.mxu1 %v6444_v31  ;;  %v6516_v31 = vld [vmem:[%s10114_s4 + $0x70] ss:$8 sps:$4 sm:$0xff]  }
  0x50   :  { %1022 = vmatpush1.bf16.msra.mxu1 %v6442_v32  ;;  %v6518_v32 = vld [vmem:[%s10114_s4 + $0x74] ss:$8 sps:$4 sm:$0xff]  }
  0x51   :  { %1023 = vmatprep.subr.bf16.mxu1 %v6450_v35  ;;  %v6524_v35 = vld [vmem:[%s10114_s4 + $0x94] ss:$8 sps:$4 sm:$0xff]  }
  0x52   :  { %826 = vmatmul.mubr.bf16.gmra.mrb[8].mxu0 %v7612_v36 }
  0x53   :  { %979 = vmatmul.mubr.bf16.gmra.mrb[24].mxu1 %v7616_v38  ;;  %835 = vmatprep.mubr.bf16.mxu0 %v7624_v40 }
  0x54   :  { %1024 = vmatpush1.bf16.msra.mxu1 %v6448_v39  ;;  %988 = vmatprep.mubr.bf16.mxu1 %v7175_v1  ;;  %v6527_v39 = vld [vmem:[%s10114_s4 + $0xa4] ss:$8 sps:$4 sm:$0xff]  }
  0x55   :  { %1025 = vmatprep.subr.bf16.mxu1 %v6453_v41  ;;  %v6530_v41 = vld [vmem:[%s10114_s4 + $0xb4] ss:$8 sps:$4 sm:$0xff]  }
  0x58   :  { %1026 = vmatpush1.bf16.msra.mxu1 %v6451_v42  ;;  %v6528_v42 = vld [vmem:[%s10114_s4 + $0xb0] ss:$8 sps:$4 sm:$0xff]  }
  0x59   :  { %1027 = vmatprep.subr.bf16.mxu1 %v6459_v45  ;;  %v6534_v45 = vld [vmem:[%s10114_s4 + $0xd0] ss:$8 sps:$4 sm:$0xff]  }
  0x5a   :  { %836 = vmatmul.mubr.bf16.gmra.mrb[12].mxu0 %v7649_v46 }
  0x5b   :  { %989 = vmatmul.mubr.bf16.gmra.mrb[28].mxu1 %v7652_v47  ;;  %845 = vmatprep.mubr.bf16.mxu0 %v7660_v50 }
  0x5c   :  { %1028 = vmatpush1.bf16.msra.mxu1 %v6457_v49  ;;  %1031 = vmatprep.mubr.bf16.mxu1 %v7452_v59  ;;  %v6477_v59 = vld [vmem:[%s10112_s1 + $0x24c] ss:$16 sps:$4 sm:$0xff]  }
  0x5d   :  { %1029 = vmatprep.subr.bf16.mxu1 %v6462_v51  ;;  %v6542_v49 = vld [vmem:[%s10114_s4 + $0xf4] ss:$8 sps:$4 sm:$0xff]  }
  0x60   :  { %1030 = vmatpush1.bf16.msra.mxu1 %v6460_v52 }
  0x61   :  { %1112 = vmatprep.subr.bf16.mxu1 %v6467_v53 }
  0x62   :  { %846 = vmatmul.mubr.bf16.gmra.mrb[16].mxu0 %v7677_v54 }
  0x63   :  { %1032 = vmatmul.mubr.bf16.vlgmr.msra.gmra.mrb[32].mxu1 %v7534_v18  ;;  %855 = vmatprep.mubr.bf16.mxu0 %v7685_v56  ;;  %v6492_v18 = vld [vmem:[%s10112_s1 + $0x2e8] ss:$16 sps:$4 sm:$0xff]  }
  0x64   :  { %1113 = vmatpush1.bf16.msra.mxu1 %v6465_v55  ;;  %1041 = vmatprep.mubr.bf16.mxu1 %v7546_v21  ;;  %v6501_v21 = vld [vmem:[%s10114_s4 + $0x20] ss:$8 sps:$4 sm:$0xff]  }
  0x65   :  { %1114 = vmatprep.subr.bf16.mxu1 %v6472_v57  ;;  %3162 = vmatpush1.bf16.msra.mxu0 %v6501_v21 }
  0x66   :  { %3163 = vmatprep.subr.bf16.mxu0 %v6506_v23 }
  0x68   :  { %1115 = vmatpush1.bf16.msra.mxu1 %v6470_v58  ;;  %v10128_v58 = vlaneseq }
  0x69   :  { %1116 = vmatprep.subr.bf16.mxu1 %v6477_v59  ;;  %3164 = vmatpush1.bf16.msra.mxu0 %v6504_v22 }
  0x6a   :  { %856 = vmatmul.mubr.bf16.gmra.mrb[20].mxu0 %v7702_v61  ;;  %3165 = vmatprep.subr.bf16.mxu0 %v6509_v24  ;;  %v7887_v59 = vshrl.u32 %v10128_v58, 7 }
  0x6b   :  { %1042 = vmatmul.mubr.bf16.gmra.mrb[36].mxu1 %v7573_v27  ;;  %865 = vmatprep.mubr.bf16.mxu0 %v7707_v62  ;;  %v6512_v27 = vld [vmem:[%s10114_s4 + $0x54] ss:$8 sps:$4 sm:$0xff]  }
  0x6c   :  { %1051 = vmatprep.mubr.bf16.mxu1 %v7585_v30  ;;  %1117 = vmatpush1.bf16.msra.mxu1 %v6475_v63  ;;  %v6513_v30 = vld [vmem:[%s10114_s4 + $0x60] ss:$8 sps:$4 sm:$0xff]  }
  0x6d   :  { %1118 = vmatprep.subr.bf16.mxu1 %v6482_v0  ;;  %3166 = vmatpush1.bf16.msra.mxu0 %v6507_v25 }
  0x6e   :  { %3167 = vmatprep.subr.bf16.mxu0 %v6512_v27 }
  0x70   :  { %1119 = vmatpush1.bf16.msra.mxu1 %v6480_v2  ;;  %v7898_v2 = vsub.s32 0, %v7887_v59 }
  0x71   :  { %1120 = vmatprep.subr.bf16.mxu1 %v6485_v3  ;;  %3168 = vmatpush1.bf16.msra.mxu0 %v6510_v26  ;;  %v7903_v3 = vld [vmem:[%s10115_s2] sm:$0xf] }
  0x72   :  { %866 = vmatmul.mubr.bf16.gmra.mrb[24].mxu0 %v5400_v4  ;;  %3169 = vmatprep.subr.bf16.mxu0 %v6515_v29  ;;  %10159 = vst [vmem:[#allocation2_spill] sm:$0xff] %v7898_v2 }
  0x73   :  { %1052 = vmatmul.mubr.bf16.gmra.mrb[40].mxu1 %v7612_v36  ;;  %875 = vmatprep.mubr.bf16.mxu0 %v6478_v5  ;;  %v6522_v36 = vld [vmem:[%s10114_s4 + $0x90] ss:$8 sps:$4 sm:$0xff]  }
  0x74   :  { %1061 = vmatprep.mubr.bf16.mxu1 %v7624_v40  ;;  %1121 = vmatpush1.bf16.msra.mxu1 %v6483_v6  ;;  %v6525_v40 = vld [vmem:[%s10114_s4 + $0xa0] ss:$8 sps:$4 sm:$0xff]   ;;  %v7915_v6 = vrot.slane %v7903_v3, %v7898_v2 }
  0x75   :  { %1122 = vmatprep.subr.bf16.mxu1 %v6488_v7  ;;  %3170 = vmatpush1.bf16.msra.mxu0 %v6513_v30 }
  0x76   :  { %3171 = vmatprep.subr.bf16.mxu0 %v6518_v32 }
  0x78   :  { %1123 = vmatpush1.bf16.msra.mxu1 %v6486_v9 }
  0x79   :  { %1124 = vmatprep.subr.bf16.mxu1 %v6491_v10  ;;  %3172 = vmatpush1.bf16.msra.mxu0 %v6516_v31 }
  0x7a   :  { %876 = vmatmul.mubr.bf16.gmra.mrb[28].mxu0 %v5401_v11  ;;  %3173 = vmatprep.subr.bf16.mxu0 %v6521_v33 }
  0x7b   :  { %1062 = vmatmul.mubr.bf16.gmra.mrb[44].mxu1 %v7649_v46  ;;  %v6539_v46 = vld [vmem:[%s10114_s4 + $0xe4] ss:$8 sps:$4 sm:$0xff]  }
  0x7c   :  { %1071 = vmatprep.mubr.bf16.mxu1 %v7660_v50  ;;  %1125 = vmatpush1.bf16.msra.mxu1 %v6489_v12  ;;  %v6540_v50 = vld [vmem:[%s10114_s4 + $0xf0] ss:$8 sps:$4 sm:$0xff]  }
  0x7d   :  { %1126 = vmatprep.subr.bf16.mxu1 %v6494_v14  ;;  %3174 = vmatpush1.bf16.msra.mxu0 %v6519_v34 }
  0x7e   :  { %3175 = vmatprep.subr.bf16.mxu0 %v6524_v35 }
  0x80   :  { %1127 = vmatpush1.bf16.msra.mxu1 %v6492_v18 }
  0x81   :  { %3176 = vmatpush1.bf16.msra.mxu0 %v6522_v36 }
  0x82   :  { %3177 = vmatprep.subr.bf16.mxu0 %v6527_v39 }
  0x83   :  { %1072 = vmatmul.mubr.bf16.gmra.mrb[48].mxu1 %v7677_v54 }
  0x84   :  { %1081 = vmatprep.mubr.bf16.mxu1 %v7685_v56 }
  0x85   :  { %3178 = vmatpush1.bf16.msra.mxu0 %v6525_v40 }
  0x86   :  { %3179 = vmatprep.subr.bf16.mxu0 %v6530_v41 }
  0x89   :  { %3180 = vmatpush1.bf16.msra.mxu0 %v6528_v42 }
  0x8a   :  { %3181 = vmatprep.subr.bf16.mxu0 %v6533_v43 }
  0x8b   :  { %1082 = vmatmul.mubr.bf16.gmra.mrb[52].mxu1 %v7702_v61 }
  0x8c   :  { %1091 = vmatprep.mubr.bf16.mxu1 %v7707_v62 }
  0x93   :  { %1092 = vmatmul.mubr.bf16.gmra.mrb[56].mxu1 %v5400_v4  ;;  %v7906_v4 = vsub.s32 1, %v7887_v59 }
  0x94   :  { %1101 = vmatprep.mubr.bf16.mxu1 %v6478_v5  ;;  %v7911_v5 = vld [vmem:[%s10116_s3] sm:$0xf] }
  0x95   :  { %10160 = vst [vmem:[#allocation3_spill] sm:$0xff] %v7906_v4  ;;  %v7921_v10 = vrot.slane %v7903_v3, %v7906_v4  ;;  %v7925_v12 = vrot.slane %v7911_v5, %v7898_v2  ;;  %v7931_v16 = vrot.slane %v7911_v5, %v7906_v4 }
  0x9b   :  { %1102 = vmatmul.mubr.bf16.gmra.mrb[60].mxu1 %v5401_v11 }
  0x9c   :  { %1144 = vmatprep.mubr.bf16.mxu1 %v7175_v1 }
  0xa3   :  { %1145 = vmatmul.mubr.bf16.vlgmr.msra.gmra.mrb[32].mxu1 %v7371_v37  ;;  %v6531_v37 = vld [vmem:[%s10114_s4 + $0xc0] ss:$8 sps:$4 sm:$0xff]  }
  0xa4   :  { %1154 = vmatprep.mubr.bf16.mxu1 %v7175_v1  ;;  %3182 = vmatpush1.bf16.msra.mxu0 %v6531_v37 }
  0xa5   :  { %3183 = vmatprep.subr.bf16.mxu0 %v6536_v44 }
  0xa8   :  { %3184 = vmatpush1.bf16.msra.mxu0 %v6534_v45 }
  0xa9   :  { %3185 = vmatprep.subr.bf16.mxu0 %v6539_v46 }
  0xab   :  { %1155 = vmatmul.mubr.bf16.gmra.mrb[36].mxu1 %v7411_v48  ;;  %v6537_v48 = vld [vmem:[%s10114_s4 + $0xe0] ss:$8 sps:$4 sm:$0xff]  }
  0xac   :  { %1164 = vmatprep.mubr.bf16.mxu1 %v7175_v1  ;;  %3186 = vmatpush1.bf16.msra.mxu0 %v6537_v48 }
  0xad   :  { %3187 = vmatprep.subr.bf16.mxu0 %v6542_v49 }
  0xb0   :  { %3188 = vmatpush1.bf16.msra.mxu0 %v6540_v50 }
  0xb3   :  { %1165 = vmatmul.mubr.bf16.gmra.mrb[40].mxu1 %v7456_v60  ;;  %v6545_v60 = vld [vmem:[%s10114_s4 + $0x104] ss:$8 sps:$4 sm:$0xff]  }
  0xb4   :  { %1174 = vmatprep.mubr.bf16.mxu1 %v7175_v1  ;;  %3230 = vmatprep.subr.bf16.mxu0 %v6545_v60 }
  0xbb   :  { %1175 = vmatmul.mubr.bf16.gmra.mrb[44].mxu1 %v7497_v8 }
  0xbc   :  { %1184 = vmatprep.mubr.bf16.mxu1 %v7175_v1 }
  0xc3   :  { %1185 = vmatmul.mubr.bf16.gmra.mrb[48].mxu1 %v7538_v19 }
  0xc4   :  { %1194 = vmatprep.mubr.bf16.mxu1 %v7175_v1 }
  0xcb   :  { %1195 = vmatmul.mubr.bf16.gmra.mrb[52].mxu1 %v7577_v28 }
  0xcc   :  { %1204 = vmatprep.mubr.bf16.mxu1 %v7175_v1 }
  0xd3   :  { %1205 = vmatmul.mubr.bf16.gmra.mrb[56].mxu1 %v7616_v38 }
  0xd4   :  { %1214 = vmatprep.mubr.bf16.mxu1 %v7175_v1 }
  0xdb   :  { %1215 = vmatmul.mubr.bf16.gmra.mrb[60].mxu1 %v7652_v47 }
  0xf6   :  { %v920_v8 = vpop.f32.mrb[0].mxu1 }
  0xf7   :  { %v922_v51 = vpop.f32.mrb[1].mxu1 }
  0xf8   :  { %v924_v19 = vpop.f32.mrb[2].mxu1 }
  0xf9   :  { %v926_v52 = vpop.f32.mrb[3].mxu1 }
  0xfe   :  { %v930_v53 = vpop.f32.mrb[4].mxu1 }
  0xff   :  { %v932_v54 = vpop.f32.mrb[5].mxu1 }
 0x100   :  { %v934_v28 = vpop.f32.mrb[6].mxu1 }
 0x101   :  { %v7876_v55 = vpop.f32.mrb[7].mxu1 }
 0x106   :  { %v7878_v56 = vpop.f32.mrb[8].mxu1 }
 0x107   :  { %v7880_v38 = vpop.f32.mrb[9].mxu1 }
 0x108   :  { %v7882_v57 = vpop.f32.mrb[10].mxu1 }
 0x109   :  { %v7884_v47 = vpop.f32.mrb[11].mxu1 }
 0x10e   :  { %v7889_v61 = vpop.f32.mrb[12].mxu1 }
 0x10f   :  { %v7891_v62 = vpop.f32.mrb[13].mxu1 }
 0x110   :  { %v7893_v63 = vpop.f32.mrb[14].mxu1 }
 0x111   :  { %v7895_v0 = vpop.f32.mrb[15].mxu1 }
 0x115   :  { %v807_v7 = vpop.f32.mrb[0].mxu0 }
 0x116   :  { %v7917_v9 = vpop.f32.mrb[16].mxu1  ;;  %v921_v11 = vadd.f32 %v920_v8, %v807_v7  ;;  %v809_v13 = vpop.f32.mrb[1].mxu0 }
 0x117   :  { %v7927_v14 = vpop.f32.mrb[17].mxu1  ;;  %v923_v15 = vadd.f32 %v922_v51, %v809_v13  ;;  %v811_v17 = vpop.f32.mrb[2].mxu0 }
 0x118   :  { %v7933_v18 = vpop.f32.mrb[18].mxu1  ;;  %v1247_v20 = vmul.f32 %v7915_v6, %v921_v11  ;;  %v925_v21 = vadd.f32 %v924_v19, %v811_v17  ;;  %v813_v22 = vpop.f32.mrb[3].mxu0 }
 0x119   :  { %v7936_v23 = vpop.f32.mrb[19].mxu1  ;;  %v1248_v24 = vmul.f32 %v7921_v10, %v923_v15  ;;  %v927_v25 = vadd.f32 %v926_v52, %v813_v22 }
 0x11a   :  { %v7940_v26 = vadd.f32 %v7925_v12, %v1247_v20  ;;  %v1251_v27 = vmul.f32 %v7915_v6, %v925_v21 }
 0x11b   :  { %v7944_v29 = vadd.f32 %v7931_v16, %v1248_v24  ;;  %v1252_v30 = vmul.f32 %v7921_v10, %v927_v25 }
 0x11c   :  { %v1461_v31 = vmin.f32 %v7940_v26, 0.0  ;;  %v7949_v32 = vadd.f32 %v7925_v12, %v1251_v27  ;;  %vm1397_vm0 = vcmp.gt.f32.partialorder %v7940_v26, 0.0 }
 0x11d   :  { %v1462_v33 = vmin.f32 %v7944_v29, 0.0  ;;  %v7953_v34 = vadd.f32 %v7931_v16, %v1252_v30  ;;  %v817_v35 = vpop.f32.mrb[4].mxu0  ;;  %vm1398_vm2 = vcmp.gt.f32.partialorder %v7944_v29, 0.0 }
 0x11e   :  { %v7955_v36 = vpop.f32.mrb[20].mxu1  ;;  %v1525_v39 = vmul.f32 1.442695, %v1461_v31  ;;  %v1465_v40 = vmin.f32 %v7949_v32, 0.0  ;;  %v931_v41 = vadd.f32 %v930_v53, %v817_v35  ;;  %v819_v42 = vpop.f32.mrb[5].mxu0  ;;  %vm1401_vm1 = vcmp.gt.f32.partialorder %v7949_v32, 0.0 }
 0x11f   :  { %v7958_v43 = vpop.f32.mrb[21].mxu1  ;;  %v1527_v37 = vmul.f32 1.442695, %v1462_v33  ;;  %v1466_v44 = vmin.f32 %v7953_v34, 0.0  ;;  %v933_v45 = vadd.f32 %v932_v54, %v819_v42  ;;  %v821_v46 = vpop.f32.mrb[6].mxu0  ;;  %vm1402_vm3 = vcmp.gt.f32.partialorder %v7953_v34, 0.0 }
 0x120   :  { %v7961_v48 = vpop.f32.mrb[22].mxu1  ;;  %6991 = vpow2.f32 %v1525_v39  ;;  %v1533_v49 = vmul.f32 1.442695, %v1465_v40  ;;  %v1255_v50 = vmul.f32 %v7915_v6, %v931_v41  ;;  %v935_v60 = vadd.f32 %v934_v28, %v821_v46  ;;  %v823_v8 = vpop.f32.mrb[7].mxu0 }
 0x121   :  { %v7964_v51 = vpop.f32.mrb[23].mxu1  ;;  %6993 = vpow2.f32 %v1527_v37  ;;  %v1535_v19 = vmul.f32 1.442695, %v1466_v44  ;;  %v1256_v52 = vmul.f32 %v7921_v10, %v933_v45  ;;  %v937_v53 = vadd.f32 %v7876_v55, %v823_v8 }
 0x122   :  { %6995 = vpow2.f32 %v1533_v49  ;;  %v7969_v54 = vadd.f32 %v7925_v12, %v1255_v50  ;;  %v1259_v7 = vmul.f32 %v7915_v6, %v935_v60  ;;  %v7995_v41 = vunpack.c.l.b16 %v7175_v1 }
 0x123   :  { %6997 = vpow2.f32 %v1535_v19  ;;  %v7973_v11 = vadd.f32 %v7931_v16, %v1256_v52  ;;  %v1260_v28 = vmul.f32 %v7921_v10, %v937_v53 }
 0x124   :  { %v1469_v13 = vmin.f32 %v7969_v54, 0.0  ;;  %v7978_v15 = vadd.f32 %v7925_v12, %v1259_v7  ;;  %10161 = vst [vmem:[#allocation4_spill] sm:$0xff] %v7995_v41  ;;  %vm1405_vm4 = vcmp.gt.f32.partialorder %v7969_v54, 0.0 }
 0x125   :  { %v1470_v17 = vmin.f32 %v7973_v11, 0.0  ;;  %v7982_v55 = vadd.f32 %v7931_v16, %v1260_v28  ;;  %v827_v20 = vpop.f32.mrb[8].mxu0  ;;  %vm1406_vm13 = vcmp.gt.f32.partialorder %v7973_v11, 0.0 }
 0x126   :  { %v7984_v21 = vpop.f32.mrb[24].mxu1  ;;  %v1541_v22 = vmul.f32 1.442695, %v1469_v13  ;;  %v1473_v24 = vmin.f32 %v7978_v15, 0.0  ;;  %v941_v25 = vadd.f32 %v7878_v56, %v827_v20  ;;  %v829_v27 = vpop.f32.mrb[9].mxu0  ;;  %vm1409_vm6 = vcmp.gt.f32.partialorder %v7978_v15, 0.0 }
 0x127   :  { %v7988_v30 = vpop.f32.mrb[25].mxu1  ;;  %v1543_v31 = vmul.f32 1.442695, %v1470_v17  ;;  %v1474_v33 = vmin.f32 %v7982_v55, 0.0  ;;  %v943_v35 = vadd.f32 %v7880_v38, %v829_v27  ;;  %v831_v39 = vpop.f32.mrb[10].mxu0  ;;  %vm1410_vm5 = vcmp.gt.f32.partialorder %v7982_v55, 0.0 }
 0x128   :  { %v7992_v40 = vpop.f32.mrb[26].mxu1  ;;  %6999 = vpow2.f32 %v1541_v22  ;;  %v1549_v42 = vmul.f32 1.442695, %v1473_v24  ;;  %v1263_v37 = vmul.f32 %v7915_v6, %v941_v25  ;;  %v945_v56 = vadd.f32 %v7882_v57, %v831_v39  ;;  %v833_v44 = vpop.f32.mrb[11].mxu0 }
 0x129   :  { %v7999_v45 = vpop.f32.mrb[27].mxu1  ;;  %v1551_v46 = vmul.f32 1.442695, %v1474_v33  ;;  %v1264_v38 = vmul.f32 %v7921_v10, %v943_v35  ;;  %v947_v49 = vadd.f32 %v7884_v47, %v833_v44  ;;  %7001 = vpow2.f32 %v1543_v31 }
 0x12a   :  { %v6992_v50 = vpop.eup %6991  ;;  %v8006_v1 = vadd.f32 %v7925_v12, %v1263_v37  ;;  %v1267_v60 = vmul.f32 %v7915_v6, %v945_v56  ;;  %7003 = vpow2.f32 %v1549_v42 }
 0x12b   :  { %v6994_v57 = vpop.eup %6993  ;;  %v5514_v8 = vadd.f32 -1.0, %v6992_v50  ;;  %v8012_v19 = vadd.f32 %v7931_v16, %v1264_v38  ;;  %v1268_v47 = vmul.f32 %v7921_v10, %v947_v49  ;;  %7005 = vpow2.f32 %v1551_v46 }
 0x12c   :  { %v6996_v52 = vpop.eup %6995  ;;  %v1477_v53 = vmin.f32 %v8006_v1, 0.0  ;;  %v8018_v7 = vadd.f32 %v7925_v12, %v1267_v60  ;;  %v5515_v28 = vadd.f32 -1.0, %v6994_v57  ;;  %vm1413_vm14 = vcmp.gt.f32.partialorder %v8006_v1, 0.0 }
 0x12d   :  { %v6998_v13 = vpop.eup %6997  ;;  %v8023_v17 = vsel %vm1397_vm0, %v7940_v26, %v5514_v8  ;;  %v5518_v20 = vadd.f32 -1.0, %v6996_v52  ;;  %v1478_v22 = vmin.f32 %v8012_v19, 0.0  ;;  %v8027_v24 = vadd.f32 %v7931_v16, %v1268_v47  ;;  %v837_v25 = vpop.f32.mrb[12].mxu0 }
 0x12e   :  { %10162 = vst [vmem:[#allocation5_spill] sm:$0xff] %v8023_v17  ;;  %v8029_v27 = vpop.f32.mrb[28].mxu1  ;;  %v1557_v31 = vmul.f32 1.442695, %v1477_v53  ;;  %v1481_v33 = vmin.f32 %v8018_v7, 0.0  ;;  %v951_v35 = vadd.f32 %v7889_v61, %v837_v25  ;;  %v839_v39 = vpop.f32.mrb[13].mxu0 }
 0x12f   :  { %v8033_v42 = vpop.f32.mrb[29].mxu1  ;;  %v5519_v37 = vadd.f32 -1.0, %v6998_v13  ;;  %v8038_v26 = vsel %vm1401_vm1, %v7949_v32, %v5518_v20  ;;  %v1559_v56 = vmul.f32 1.442695, %v1478_v22  ;;  %v1482_v44 = vmin.f32 %v8027_v24, 0.0  ;;  %v841_v38 = vpop.f32.mrb[14].mxu0 }
 0x130   :  { %10163 = vst [vmem:[#allocation6_spill] sm:$0xff] %v8038_v26  ;;  %v953_v46 = vadd.f32 %v7891_v62, %v839_v39  ;;  %v8042_v49 = vpop.f32.mrb[30].mxu1  ;;  %v1781_v61 = vpack.c.bf16 %v8038_v26, %v8023_v17  ;;  %7007 = vpow2.f32 %v1557_v31  ;;  %v1565_v50 = vmul.f32 1.442695, %v1481_v33  ;;  %v843_v57 = vpop.f32.mrb[15].mxu0 }
 0x131   :  { %v1271_v60 = vmul.f32 %v7915_v6, %v951_v35  ;;  %v8047_v8 = vpop.f32.mrb[31].mxu1  ;;  %7009 = vpow2.f32 %v1559_v56  ;;  %v1567_v32 = vmul.f32 1.442695, %v1482_v44  ;;  %v955_v52 = vadd.f32 %v7893_v63, %v841_v38 }
 0x132   :  { %v1272_v47 = vmul.f32 %v7921_v10, %v953_v46  ;;  %v7000_v62 = vpop.eup %6999  ;;  %v1849_v53 = vunpack.c.h.b16 %v1781_v61  ;;  %7011 = vpow2.f32 %v1565_v50  ;;  %v957_v20 = vadd.f32 %v7895_v0, %v843_v57 }
 0x133   :  { %v8052_v13 = vadd.f32 %v7925_v12, %v1271_v60  ;;  %v5522_v22 = vadd.f32 -1.0, %v7000_v62  ;;  %7013 = vpow2.f32 %v1567_v32  ;;  %v1275_v31 = vmul.f32 %v7915_v6, %v955_v52  ;;  %v8059_v33 = vpop.eup %7001 }
 0x134   :  { %v8056_v25 = vadd.f32 %v7931_v16, %v1272_v47  ;;  %v1276_v63 = vmul.f32 %v7921_v10, %v957_v20  ;;  %v8066_v39 = vsel %vm1398_vm2, %v7944_v29, %v5515_v28  ;;  %v8071_v0 = vsel %vm1402_vm3, %v7953_v34, %v5519_v37  ;;  %v8073_v56 = vpop.eup %7003 }
 0x135   :  { %v1485_v35 = vmin.f32 %v8052_v13, 0.0  ;;  %10164 = vst [vmem:[#allocation7_spill] sm:$0xff] %v8071_v0  ;;  %v8078_v44 = vsel %vm1405_vm4, %v7969_v54, %v5522_v22  ;;  %v8082_v38 = vadd.f32 %v7925_v12, %v1275_v31  ;;  %v847_v61 = vpop.f32.mrb[16].mxu0  ;;  %v1782_v29 = vpack.c.bf16 %v8071_v0, %v8066_v39  ;;  %v7006_v28 = vpop.eup %7005 }
 0x136   :  { %v1486_v46 = vmin.f32 %v8056_v25, 0.0  ;;  %v8089_v50 = vadd.f32 %v7931_v16, %v1276_v63  ;;  %v961_v54 = vadd.f32 %v7917_v9, %v847_v61  ;;  %v849_v60 = vpop.f32.mrb[17].mxu0  ;;  %vm1418_vm7 = vcmp.gt.f32.partialorder %v8027_v24, 0.0 }
 0x137   :  { %v1573_v37 = vmul.f32 1.442695, %v1485_v35  ;;  %v1489_v32 = vmin.f32 %v8082_v38, 0.0  ;;  %v963_v47 = vadd.f32 %v7927_v14, %v849_v60  ;;  %v851_v52 = vpop.f32.mrb[18].mxu0  ;;  %v1850_v62 = vunpack.c.h.b16 %v1782_v29 }
 0x138   :  { %v1575_v57 = vmul.f32 1.442695, %v1486_v46  ;;  %v1490_v20 = vmin.f32 %v8089_v50, 0.0  ;;  %v1279_v22 = vmul.f32 %v7915_v6, %v961_v54  ;;  %v965_v31 = vadd.f32 %v7933_v18, %v851_v52  ;;  %v853_v35 = vpop.f32.mrb[19].mxu0  ;;  %v6543_v18 = vld [vmem:[%s10114_s4 + $0x100] ss:$8 sps:$4 sm:$0xff]  }
 0x139   :  { %7015 = vpow2.f32 %v1573_v37  ;;  %v1581_v63 = vmul.f32 1.442695, %v1489_v32  ;;  %v1280_v9 = vmul.f32 %v7921_v10, %v963_v47  ;;  %v1910_v46 = vpack.c.b16 %v1850_v62, %v7995_v41 }
 0x13a   :  { %7017 = vpow2.f32 %v1575_v57  ;;  %v8099_v61 = vpop.eup %7007  ;;  %v1583_v58 = vmul.f32 1.442695, %v1490_v20  ;;  %v8102_v14 = vadd.f32 %v7925_v12, %v1279_v22  ;;  %v1283_v29 = vmul.f32 %v7915_v6, %v965_v31 }
 0x13b   :  { %v967_v37 = vadd.f32 %v7936_v23, %v853_v35  ;;  %v8109_v54 = vpop.eup %7009  ;;  %7019 = vpow2.f32 %v1581_v63  ;;  %v8112_v60 = vadd.f32 %v7931_v16, %v1280_v9  ;;  %3189 = vmatprep.mubr.bf16.mxu0 %v1910_v46  ;;  %v1909_v57 = vpack.c.b16 %v1849_v53, %v7995_v41  ;;  %v6548_v23 = vld [vmem:[%s10114_s4 + $0x114] ss:$8 sps:$4 sm:$0xff]   ;;  %v6546_v35 = vld [vmem:[%s10114_s4 + $0x110] ss:$8 sps:$4 sm:$0xff]  }
 0x13c   :  { %v7012_v32 = vpop.eup %7011  ;;  %v1493_v47 = vmin.f32 %v8102_v14, 0.0  ;;  %v8122_v52 = vadd.f32 %v7925_v12, %v1283_v29  ;;  %7021 = vpow2.f32 %v1583_v58  ;;  %v5527_v31 = vadd.f32 -1.0, %v7006_v28  ;;  %v6551_v28 = vld [vmem:[%s10114_s4 + $0x124] ss:$8 sps:$4 sm:$0xff]  }
 0x13d   :  { %v1284_v62 = vmul.f32 %v7921_v10, %v967_v37  ;;  %v7014_v20 = vpop.eup %7013  ;;  %v1494_v53 = vmin.f32 %v8112_v60, 0.0  ;;  %3190 = vmatmul.mubr.bf16.vlgmr.msra.gmra.mrb[32].mxu0 %v1909_v57  ;;  %v857_v22 = vpop.f32.mrb[20].mxu0  ;;  %vm1417_vm8 = vcmp.gt.f32.partialorder %v8018_v7, 0.0  ;;  %vm1426_vm9 = vcmp.gt.f32.partialorder %v8089_v50, 0.0 }
 0x13e   :  { %v1589_v63 = vmul.f32 1.442695, %v1493_v47  ;;  %v1497_v9 = vmin.f32 %v8122_v52, 0.0  ;;  %v971_v29 = vadd.f32 %v7955_v36, %v857_v22  ;;  %v859_v58 = vpop.f32.mrb[21].mxu0  ;;  %3231 = vmatpush1.bf16.msra.mxu0 %v6543_v18  ;;  %v5535_v4 = vadd.f32 -1.0, %v7014_v20 }
 0x13f   :  { %v8133_v46 = vadd.f32 %v7931_v16, %v1284_v62  ;;  %v1591_v37 = vmul.f32 1.442695, %v1494_v53  ;;  %v973_v57 = vadd.f32 %v7958_v43, %v859_v58  ;;  %v861_v34 = vpop.f32.mrb[22].mxu0  ;;  %v5526_v47 = vadd.f32 -1.0, %v8073_v56  ;;  %3232 = vmatprep.subr.bf16.mxu0 %v6548_v23 }
 0x140   :  { %v1597_v2 = vmul.f32 1.442695, %v1497_v9  ;;  %v1287_v17 = vmul.f32 %v7915_v6, %v971_v29  ;;  %v863_v36 = vpop.f32.mrb[23].mxu0  ;;  %v8146_v18 = vsel %vm1410_vm5, %v7982_v55, %v5527_v31  ;;  %7023 = vpow2.f32 %v1589_v63  ;;  %v6549_v55 = vld [vmem:[%s10114_s4 + $0x120] ss:$8 sps:$4 sm:$0xff]  }
 0x141   :  { %v1498_v62 = vmin.f32 %v8133_v46, 0.0  ;;  %10165 = vst [vmem:[#allocation8_spill] sm:$0xff] %v8146_v18  ;;  %v1288_v53 = vmul.f32 %v7921_v10, %v973_v57  ;;  %v975_v43 = vadd.f32 %v7961_v48, %v861_v34  ;;  %v977_v20 = vadd.f32 %v7964_v51, %v863_v36 }
 0x142   :  { %7025 = vpow2.f32 %v1597_v2  ;;  %v8154_v22 = vadd.f32 %v7925_v12, %v1287_v17  ;;  %v8159_v9 = vsel %vm1418_vm7, %v8027_v24, %v5535_v4  ;;  %3233 = vmatpush1.bf16.msra.mxu0 %v6546_v35  ;;  %v6554_v4 = vld [vmem:[%s10114_s4 + $0x134] ss:$8 sps:$4 sm:$0xff]   ;;  %v5534_v31 = vadd.f32 -1.0, %v7012_v32  ;;  %v6552_v32 = vld [vmem:[%s10114_s4 + $0x130] ss:$8 sps:$4 sm:$0xff]  }
 0x143   :  { %v8151_v56 = vpop.eup %7015  ;;  %v1599_v23 = vmul.f32 1.442695, %v1498_v62  ;;  %10166 = vst [vmem:[#allocation9_spill] sm:$0xff] %v8159_v9  ;;  %v8167_v51 = vadd.f32 %v7931_v16, %v1288_v53  ;;  %v1291_v2 = vmul.f32 %v7915_v6, %v975_v43  ;;  %v1292_v17 = vmul.f32 %v7921_v10, %v977_v20  ;;  %3234 = vmatprep.subr.bf16.mxu0 %v6551_v28  ;;  %v6557_v43 = vld [vmem:[%s10114_s4 + $0x144] ss:$8 sps:$4 sm:$0xff]  }
 0x144   :  { %v8164_v48 = vpop.eup %7017  ;;  %v6020_v34 = vpack.c.bf16 %v8159_v9, %v8146_v18  ;;  %v1501_v24 = vmin.f32 %v8154_v22, 0.0  ;;  %v8180_v35 = vsel %vm1409_vm6, %v7978_v15, %v5526_v47  ;;  %v8197_v47 = vsel %vm1417_vm8, %v8018_v7, %v5534_v31 }
 0x145   :  { %7027 = vpow2.f32 %v1599_v23  ;;  %10167 = vst [vmem:[#allocation10_spill] sm:$0xff] %v8180_v35  ;;  %v7020_v63 = vpop.eup %7019  ;;  %v1502_v29 = vmin.f32 %v8167_v51, 0.0  ;;  %v8184_v58 = vadd.f32 %v7925_v12, %v1291_v2  ;;  %v8187_v28 = vadd.f32 %v7931_v16, %v1292_v17  ;;  %v867_v62 = vpop.f32.mrb[24].mxu0  ;;  %10168 = vst [vmem:[#allocation11_spill] sm:$0xff] %v8197_v47 }
 0x146   :  { %3199 = vmatprep.mubr.bf16.mxu0 %v6020_v34  ;;  %7029 = vpow2.f32 %v1591_v37  ;;  %v1605_v15 = vmul.f32 1.442695, %v1501_v24  ;;  %v981_v36 = vadd.f32 %v7984_v21, %v867_v62  ;;  %v869_v53 = vpop.f32.mrb[25].mxu0  ;;  %3235 = vmatpush1.bf16.msra.mxu0 %v6549_v55  ;;  %v7022_v20 = vpop.eup %7021  ;;  %v6019_v17 = vpack.c.bf16 %v8197_v47, %v8180_v35 }
 0x147   :  { %v1607_v23 = vmul.f32 1.442695, %v1502_v29  ;;  %v1505_v2 = vmin.f32 %v8184_v58, 0.0  ;;  %v1506_v37 = vmin.f32 %v8187_v28, 0.0  ;;  %v871_v34 = vpop.f32.mrb[26].mxu0  ;;  %3236 = vmatprep.subr.bf16.mxu0 %v6554_v4  ;;  %v983_v21 = vadd.f32 %v7988_v30, %v869_v53 }
 0x148   :  { %v1295_v7 = vmul.f32 %v7915_v6, %v981_v36  ;;  %v985_v55 = vadd.f32 %v7992_v40, %v871_v34  ;;  %v873_v24 = vpop.f32.mrb[27].mxu0  ;;  %7031 = vpow2.f32 %v1605_v15  ;;  %3200 = vmatmul.mubr.bf16.gmra.mrb[36].mxu0 %v6019_v17  ;;  %v6555_v30 = vld [vmem:[%s10114_s4 + $0x140] ss:$8 sps:$4 sm:$0xff]   ;;  %vm1434_vm10 = vcmp.gt.f32.partialorder %v8133_v46, 0.0  ;;  %v6560_v53 = vld [vmem:[%s10114_s4 + $0x154] ss:$8 sps:$4 sm:$0xff]  }
 0x149   :  { %v1613_v31 = vmul.f32 1.442695, %v1505_v2  ;;  %v1615_v29 = vmul.f32 1.442695, %v1506_v37  ;;  %v987_v62 = vadd.f32 %v7999_v45, %v873_v24  ;;  %7033 = vpow2.f32 %v1607_v23 }
 0x14a   :  { %v8213_v57 = vadd.f32 %v7925_v12, %v1295_v7  ;;  %v1296_v4 = vmul.f32 %v7921_v10, %v983_v21  ;;  %v1299_v36 = vmul.f32 %v7915_v6, %v985_v55  ;;  %3237 = vmatpush1.bf16.msra.mxu0 %v6552_v32  ;;  %v8220_v40 = vpop.eup %7023  ;;  %v5543_v45 = vadd.f32 -1.0, %v7022_v20  ;;  %v6558_v7 = vld [vmem:[%s10114_s4 + $0x150] ss:$8 sps:$4 sm:$0xff]  }
 0x14b   :  { %7035 = vpow2.f32 %v1613_v31  ;;  %v1300_v15 = vmul.f32 %v7921_v10, %v987_v62  ;;  %3238 = vmatprep.subr.bf16.mxu0 %v6557_v43  ;;  %vm1425_vm11 = vcmp.gt.f32.partialorder %v8082_v38, 0.0  ;;  %v5542_v20 = vadd.f32 -1.0, %v7020_v63 }
 0x14c   :  { %v7026_v23 = vpop.eup %7025  ;;  %7037 = vpow2.f32 %v1615_v29  ;;  %v1509_v32 = vmin.f32 %v8213_v57, 0.0  ;;  %v8229_v2 = vadd.f32 %v7931_v16, %v1296_v4  ;;  %v8232_v37 = vadd.f32 %v7925_v12, %v1299_v36 }
 0x14d   :  { %v8235_v17 = vadd.f32 %v7931_v16, %v1300_v15  ;;  %v877_v34 = vpop.f32.mrb[28].mxu0  ;;  %v8240_v43 = vsel %vm1426_vm9, %v8089_v50, %v5543_v45  ;;  %vm1433_vm12 = vcmp.gt.f32.partialorder %v8122_v52, 0.0  ;;  %v6563_v15 = vld [vmem:[%s10114_s4 + $0x164] ss:$8 sps:$4 sm:$0xff]   ;;  %vm1442_vm15 = vcmp.gt.f32.partialorder %v8187_v28, 0.0 }
 0x14e   :  { %10169 = vst [vmem:[#allocation12_spill] sm:$0xff] %v8240_v43  ;;  %v1621_v55 = vmul.f32 1.442695, %v1509_v32  ;;  %v1510_v24 = vmin.f32 %v8229_v2, 0.0  ;;  %v1513_v31 = vmin.f32 %v8232_v37, 0.0  ;;  %v991_v29 = vadd.f32 %v8029_v27, %v877_v34  ;;  %v879_v62 = vpop.f32.mrb[29].mxu0  ;;  %3239 = vmatpush1.bf16.msra.mxu0 %v6555_v30 }
 0x14f   :  { %v7028_v21 = vpop.eup %7027  ;;  %v1514_v50 = vmin.f32 %v8235_v17, 0.0  ;;  %v993_v4 = vadd.f32 %v8033_v42, %v879_v62  ;;  %v881_v36 = vpop.f32.mrb[30].mxu0  ;;  %3240 = vmatprep.subr.bf16.mxu0 %v6560_v53  ;;  %v5550_v34 = vadd.f32 -1.0, %v7026_v23  ;;  %v8273_v23 = vsel %vm1425_vm11, %v8082_v38, %v5542_v20  ;;  %v6566_v38 = vld [vmem:[%s10114_s4 + $0x174] ss:$8 sps:$4 sm:$0xff]  }
 0x150   :  { %v5551_v63 = vadd.f32 -1.0, %v7028_v21  ;;  %v8255_v45 = vpop.eup %7029  ;;  %7039 = vpow2.f32 %v1621_v55  ;;  %v1629_v32 = vmul.f32 1.442695, %v1513_v31  ;;  %v1303_v27 = vmul.f32 %v7915_v6, %v991_v29  ;;  %v883_v30 = vpop.f32.mrb[31].mxu0  ;;  %10171 = vst [vmem:[#allocation14_spill] sm:$0xff] %v8273_v23 }
 0x151   :  { %v1631_v26 = vmul.f32 1.442695, %v1514_v50  ;;  %v1304_v42 = vmul.f32 %v7921_v10, %v993_v4  ;;  %v995_v21 = vadd.f32 %v8042_v49, %v881_v36  ;;  %v997_v62 = vadd.f32 %v8047_v8, %v883_v30  ;;  %v6561_v49 = vld [vmem:[%s10114_s4 + $0x160] ss:$8 sps:$4 sm:$0xff]  }
 0x152   :  { %v1623_v53 = vmul.f32 1.442695, %v1510_v24  ;;  %v8263_v35 = vadd.f32 %v7925_v12, %v1303_v27  ;;  %v8268_v55 = vsel %vm1434_vm10, %v8133_v46, %v5551_v63  ;;  %3241 = vmatpush1.bf16.msra.mxu0 %v6558_v7  ;;  %v8278_v8 = vpop.eup %7031  ;;  %7041 = vpow2.f32 %v1629_v32  ;;  %v6564_v63 = vld [vmem:[%s10114_s4 + $0x170] ss:$8 sps:$4 sm:$0xff]  }
 0x153   :  { %10170 = vst [vmem:[#allocation13_spill] sm:$0xff] %v8268_v55  ;;  %v8281_v24 = vadd.f32 %v7931_v16, %v1304_v42  ;;  %v1307_v31 = vmul.f32 %v7915_v6, %v995_v21  ;;  %v1308_v46 = vmul.f32 %v7921_v10, %v997_v62  ;;  %3242 = vmatprep.subr.bf16.mxu0 %v6563_v15  ;;  %v8288_v20 = vpop.eup %7033  ;;  %7043 = vpow2.f32 %v1631_v26 }
 0x154   :  { %v1517_v7 = vmin.f32 %v8263_v35, 0.0  ;;  %v6024_v29 = vpack.c.bf16 %v8268_v55, %v8240_v43  ;;  %v8296_v50 = vsel %vm1433_vm12, %v8122_v52, %v5550_v34  ;;  %7045 = vpow2.f32 %v1623_v53 }
 0x155   :  { %10172 = vst [vmem:[#allocation15_spill] sm:$0xff] %v8296_v50  ;;  %v7036_v6 = vpop.eup %7035  ;;  %v1518_v10 = vmin.f32 %v8281_v24, 0.0  ;;  %v8300_v4 = vadd.f32 %v7925_v12, %v1307_v31  ;;  %v8303_v36 = vadd.f32 %v7931_v16, %v1308_v46  ;;  %v6023_v26 = vpack.c.bf16 %v8296_v50, %v8273_v23  ;;  %v6569_v12 = vld [vmem:[%s10114_s4 + $0x184] ss:$8 sps:$4 sm:$0xff]   ;;  %v6567_v46 = vld [vmem:[%s10114_s4 + $0x180] ss:$8 sps:$4 sm:$0xff]  }
 0x156   :  { %v7038_v52 = vpop.eup %7037  ;;  %v1637_v15 = vmul.f32 1.442695, %v1517_v7  ;;  %3209 = vmatprep.mubr.bf16.mxu0 %v6024_v29  ;;  %vm1441_vm0 = vcmp.gt.f32.partialorder %v8184_v58, 0.0  ;;  %3243 = vmatpush1.bf16.msra.mxu0 %v6561_v49  ;;  %vm1450_vm1 = vcmp.gt.f32.partialorder %v8235_v17, 0.0  ;;  %vm1449_vm2 = vcmp.gt.f32.partialorder %v8232_v37, 0.0 }
 0x157   :  { %v1639_v16 = vmul.f32 1.442695, %v1518_v10  ;;  %v1521_v32 = vmin.f32 %v8300_v4, 0.0  ;;  %v1522_v27 = vmin.f32 %v8303_v36, 0.0  ;;  %3210 = vmatmul.mubr.bf16.gmra.mrb[40].mxu0 %v6023_v26  ;;  %v5559_v30 = vadd.f32 -1.0, %v7038_v52  ;;  %3244 = vmatprep.subr.bf16.mxu0 %v6566_v38 }
 0x158   :  { %7047 = vpow2.f32 %v1637_v15  ;;  %v5558_v34 = vadd.f32 -1.0, %v7036_v6  ;;  %v5523_v42 = vadd.f32 -1.0, %v8059_v33  ;;  %vm1414_vm3 = vcmp.gt.f32.partialorder %v8012_v19, 0.0  ;;  %v6575_v52 = vld [vmem:[%s10114_s4 + $0x1a4] ss:$8 sps:$4 sm:$0xff]  }
 0x159   :  { %7049 = vpow2.f32 %v1639_v16  ;;  %v1645_v21 = vmul.f32 1.442695, %v1521_v32  ;;  %v1647_v62 = vmul.f32 1.442695, %v1522_v27  ;;  %v8324_v53 = vsel %vm1442_vm15, %v8187_v28, %v5559_v30 }
 0x15a   :  { %10173 = vst [vmem:[#allocation16_spill] sm:$0xff] %v8324_v53  ;;  %v7040_v49 = vpop.eup %7039  ;;  %v8329_v31 = vsel %vm1441_vm0, %v8184_v58, %v5558_v34  ;;  %3245 = vmatpush1.bf16.msra.mxu0 %v6564_v63  ;;  %v8337_v33 = vsel %vm1406_vm13, %v7973_v11, %v5523_v42  ;;  %vm1422_vm4 = vcmp.gt.f32.partialorder %v8056_v25, 0.0  ;;  %v6572_v58 = vld [vmem:[%s10114_s4 + $0x194] ss:$8 sps:$4 sm:$0xff]   ;;  %v5531_v38 = vadd.f32 -1.0, %v8109_v54 }
 0x15b   :  { %10174 = vst [vmem:[#allocation17_spill] sm:$0xff] %v8329_v31  ;;  %7051 = vpow2.f32 %v1645_v21  ;;  %3246 = vmatprep.subr.bf16.mxu0 %v6569_v12  ;;  %v5539_v7 = vadd.f32 -1.0, %v8164_v48  ;;  %vm1421_vm5 = vcmp.gt.f32.partialorder %v8052_v13, 0.0  ;;  %v5530_v11 = vadd.f32 -1.0, %v8099_v61  ;;  %v6570_v61 = vld [vmem:[%s10114_s4 + $0x190] ss:$8 sps:$4 sm:$0xff]  }
 0x15c   :  { %7053 = vpow2.f32 %v1647_v62  ;;  %v5538_v29 = vadd.f32 -1.0, %v8151_v56  ;;  %v7042_v6 = vpop.eup %7041  ;;  %v8352_v10 = vsel %vm1414_vm3, %v8012_v19, %v5531_v38  ;;  %vm1430_vm6 = vcmp.gt.f32.partialorder %v8112_v60, 0.0 }
 0x15d   :  { %v8355_v26 = vsel %vm1422_vm4, %v8056_v25, %v5539_v7  ;;  %vm1438_vm7 = vcmp.gt.f32.partialorder %v8167_v51, 0.0  ;;  %v7044_v54 = vpop.eup %7043  ;;  %v5566_v48 = vadd.f32 -1.0, %v7042_v6  ;;  %v8367_v19 = vsel %vm1413_vm14, %v8006_v1, %v5530_v11 }
 0x15e   :  { %3247 = vmatpush1.bf16.msra.mxu0 %v6567_v46  ;;  %v8370_v25 = vsel %vm1421_vm5, %v8052_v13, %v5538_v29  ;;  %v5567_v63 = vadd.f32 -1.0, %v7044_v54  ;;  %v5547_v12 = vadd.f32 -1.0, %v8255_v45  ;;  %v5555_v16 = vadd.f32 -1.0, %v8288_v20  ;;  %v7046_v32 = vpop.eup %7045 }
 0x15f   :  { %3248 = vmatprep.subr.bf16.mxu0 %v6572_v58  ;;  %v8382_v1 = vsel %vm1449_vm2, %v8232_v37, %v5566_v48  ;;  %vm1429_vm8 = vcmp.gt.f32.partialorder %v8102_v14, 0.0  ;;  %vm1437_vm9 = vcmp.gt.f32.partialorder %v8154_v22, 0.0  ;;  %v5546_v13 = vadd.f32 -1.0, %v8220_v40 }
 0x160   :  { %10175 = vst [vmem:[#allocation18_spill] sm:$0xff] %v8382_v1  ;;  %v8390_v27 = vsel %vm1450_vm1, %v8235_v17, %v5567_v63  ;;  %v6027_v45 = vpack.c.bf16 %v8382_v1, %v8329_v31  ;;  %v8397_v20 = vsel %vm1430_vm6, %v8112_v60, %v5547_v12  ;;  %v8402_v37 = vsel %vm1438_vm7, %v8167_v51, %v5555_v16  ;;  %v6573_v17 = vld [vmem:[%s10114_s4 + $0x1a0] ss:$8 sps:$4 sm:$0xff]   ;;  %v6578_v51 = vld [vmem:[%s10114_s4 + $0x1b4] ss:$8 sps:$4 sm:$0xff]  }
 0x161   :  { %10176 = vst [vmem:[#allocation19_spill] sm:$0xff] %v8390_v27  ;;  %v6028_v40 = vpack.c.bf16 %v8390_v27, %v8324_v53  ;;  %v5554_v60 = vadd.f32 -1.0, %v8278_v8  ;;  %v8413_v42 = vsel %vm1429_vm8, %v8102_v14, %v5546_v13  ;;  %vm1446_vm10 = vcmp.gt.f32.partialorder %v8229_v2, 0.0  ;;  %v6579_v13 = vld [vmem:[%s10114_s4 + $0x1c0] ss:$8 sps:$4 sm:$0xff]  }
 0x162   :  { %v7048_v30 = vpop.eup %7047  ;;  %3249 = vmatpush1.bf16.msra.mxu0 %v6570_v61  ;;  %vm1454_vm11 = vcmp.gt.f32.partialorder %v8281_v24, 0.0  ;;  %v5563_v62 = vadd.f32 -1.0, %v7046_v32  ;;  %vm1445_vm12 = vcmp.gt.f32.partialorder %v8213_v57, 0.0  ;;  %vm1453_vm13 = vcmp.gt.f32.partialorder %v8263_v35, 0.0  ;;  %v6581_v61 = vld [vmem:[%s10114_s4 + $0x1c4] ss:$8 sps:$4 sm:$0xff]  }
 0x163   :  { %v7050_v21 = vpop.eup %7049  ;;  %3250 = vmatprep.subr.bf16.mxu0 %v6575_v52  ;;  %3219 = vmatprep.mubr.bf16.mxu0 %v6028_v40  ;;  %v8424_v8 = vsel %vm1437_vm9, %v8154_v22, %v5554_v60  ;;  %v5562_v46 = vadd.f32 -1.0, %v7040_v49  ;;  %v5570_v11 = vadd.f32 -1.0, %v7048_v30  ;;  %v6576_v22 = vld [vmem:[%s10114_s4 + $0x1b0] ss:$8 sps:$4 sm:$0xff]   ;;  %vm1458_vm14 = vcmp.gt.f32.partialorder %v8303_v36, 0.0 }
 0x164   :  { %v5571_v14 = vadd.f32 -1.0, %v7050_v21  ;;  %3220 = vmatmul.mubr.bf16.gmra.mrb[44].mxu0 %v6027_v45  ;;  %v8430_v7 = vsel %vm1446_vm10, %v8229_v2, %v5563_v62  ;;  %vm1457_vm15 = vcmp.gt.f32.partialorder %v8300_v4, 0.0  ;;  %v6584_v45 = vld [vmem:[%s10114_s4 + $0x1d4] ss:$8 sps:$4 sm:$0xff]   ;;  %v1237_v60 = vsub.s32 2, %v7887_v59 }
 0x165   :  { %v7052_v58 = vpop.eup %7051  ;;  %10177 = vst [vmem:[#allocation20_spill] sm:$0xff] %v8430_v7  ;;  %v8445_v2 = vsel %vm1445_vm12, %v8213_v57, %v5562_v46  ;;  %v8459_v63 = vsel %vm1453_vm13, %v8263_v35, %v5570_v11  ;;  %v1241_v21 = vsub.s32 3, %v7887_v59  ;;  %v6585_v62 = vld [vmem:[%s10114_s4 + $0x1e0] ss:$8 sps:$4 sm:$0xff]   ;;  %v6590_v59 = vld [vmem:[%s10114_s4 + $0x1f4] ss:$8 sps:$4 sm:$0xff]  }
 0x166   :  { %v7054_v6 = vpop.eup %7053  ;;  %3251 = vmatpush1.bf16.msra.mxu0 %v6573_v17  ;;  %v8440_v49 = vsel %vm1454_vm11, %v8281_v24, %v5571_v14  ;;  %10178 = vst [vmem:[#allocation21_spill] sm:$0xff] %v8445_v2  ;;  %10179 = vst [vmem:[#allocation22_spill] sm:$0xff] %v8459_v63  ;;  %v5574_v32 = vadd.f32 -1.0, %v7052_v58  ;;  %v8506_v46 = vrot.slane %v7911_v5, %v1237_v60 }
 0x167   :  { %3252 = vmatprep.subr.bf16.mxu0 %v6578_v51  ;;  %v5575_v16 = vadd.f32 -1.0, %v7054_v6  ;;  %v6587_v51 = vld [vmem:[%s10114_s4 + $0x1e4] ss:$8 sps:$4 sm:$0xff]   ;;  %v8500_v14 = vrot.slane %v7903_v3, %v1241_v21  ;;  %v8509_v11 = vrot.slane %v7911_v5, %v1241_v21 }
 0x168   :  { %v8481_v40 = vsel %vm1457_vm15, %v8300_v4, %v5574_v32  ;;  %v8494_v4 = vrot.slane %v7903_v3, %v1237_v60  ;;  %v6588_v3 = vld [vmem:[%s10114_s4 + $0x1f0] ss:$8 sps:$4 sm:$0xff]   ;;  %v6593_v32 = vld [vmem:[%s10114_s4 + $0x204] ss:$8 sps:$4 sm:$0xff]  }
 0x169   :  { %v8472_v35 = vsel %vm1458_vm14, %v8303_v36, %v5575_v16  ;;  %10181 = vst [vmem:[#allocation24_spill] sm:$0xff] %v8481_v40  ;;  %v6582_v36 = vld [vmem:[%s10114_s4 + $0x1d0] ss:$8 sps:$4 sm:$0xff]  }
 0x16a   :  { %3253 = vmatpush1.bf16.msra.mxu0 %v6576_v22  ;;  %10180 = vst [vmem:[#allocation23_spill] sm:$0xff] %v8472_v35 }
 0x16b   :  { %3254 = vmatprep.subr.bf16.mxu0 %v6581_v61 }
 0x16e   :  { %3255 = vmatpush1.bf16.msra.mxu0 %v6579_v13 }
 0x16f   :  { %3256 = vmatprep.subr.bf16.mxu0 %v6584_v45 }
 0x172   :  { %3257 = vmatpush1.bf16.msra.mxu0 %v6582_v36 }
 0x173   :  { %3258 = vmatprep.subr.bf16.mxu0 %v6587_v51 }
 0x176   :  { %v1146_v58 = vpop.f32.mrb[32].mxu1  ;;  %3259 = vmatpush1.bf16.msra.mxu0 %v6585_v62 }
 0x177   :  { %v1249_v6 = vmul.f32 %v8494_v4, %v1146_v58  ;;  %v1148_v22 = vpop.f32.mrb[33].mxu1  ;;  %3260 = vmatprep.subr.bf16.mxu0 %v6590_v59 }
 0x178   :  { %v1250_v61 = vmul.f32 %v8500_v14, %v1148_v22  ;;  %v1150_v16 = vpop.f32.mrb[34].mxu1 }
 0x179   :  { %v1335_v13 = vadd.f32 %v8506_v46, %v1249_v6  ;;  %v1253_v5 = vmul.f32 %v8494_v4, %v1150_v16  ;;  %v1152_v45 = vpop.f32.mrb[35].mxu1 }
 0x17a   :  { %v8522_v60 = vadd.f32 %v8509_v11, %v1250_v61  ;;  %v1254_v36 = vmul.f32 %v8500_v14, %v1152_v45  ;;  %3261 = vmatpush1.bf16.msra.mxu0 %v6588_v3 }
 0x17b   :  { %v1463_v21 = vmin.f32 %v1335_v13, 0.0  ;;  %v1339_v51 = vadd.f32 %v8506_v46, %v1253_v5  ;;  %3303 = vmatprep.subr.bf16.mxu0 %v6593_v32  ;;  %vm1399_vm0 = vcmp.gt.f32.partialorder %v1335_v13, 0.0 }
 0x17c   :  { %v1464_v62 = vmin.f32 %v8522_v60, 0.0  ;;  %v8528_v59 = vadd.f32 %v8509_v11, %v1254_v36  ;;  %vm1400_vm4 = vcmp.gt.f32.partialorder %v8522_v60, 0.0 }
 0x17d   :  { %v1529_v58 = vmul.f32 1.442695, %v1463_v21  ;;  %v1467_v6 = vmin.f32 %v1339_v51, 0.0  ;;  %vm1403_vm1 = vcmp.gt.f32.partialorder %v1339_v51, 0.0 }
 0x17e   :  { %v1468_v22 = vmin.f32 %v8528_v59, 0.0  ;;  %v1156_v16 = vpop.f32.mrb[36].mxu1  ;;  %v1531_v61 = vmul.f32 1.442695, %v1464_v62  ;;  %vm1404_vm2 = vcmp.gt.f32.partialorder %v8528_v59, 0.0 }
 0x17f   :  { %7055 = vpow2.f32 %v1529_v58  ;;  %v1537_v17 = vmul.f32 1.442695, %v1467_v6  ;;  %v1257_v45 = vmul.f32 %v8494_v4, %v1156_v16  ;;  %v1158_v30 = vpop.f32.mrb[37].mxu1 }
 0x180   :  { %v1539_v52 = vmul.f32 1.442695, %v1468_v22  ;;  %v1258_v3 = vmul.f32 %v8500_v14, %v1158_v30  ;;  %v1160_v5 = vpop.f32.mrb[38].mxu1 }
 0x181   :  { %7057 = vpow2.f32 %v1537_v17  ;;  %v8534_v36 = vadd.f32 %v8506_v46, %v1257_v45  ;;  %v1261_v32 = vmul.f32 %v8494_v4, %v1160_v5  ;;  %v1162_v21 = vpop.f32.mrb[39].mxu1 }
 0x182   :  { %7059 = vpow2.f32 %v1539_v52  ;;  %v8538_v57 = vadd.f32 %v8509_v11, %v1258_v3  ;;  %v1262_v62 = vmul.f32 %v8500_v14, %v1162_v21 }
 0x183   :  { %7061 = vpow2.f32 %v1531_v61  ;;  %v1471_v58 = vmin.f32 %v8534_v36, 0.0  ;;  %v8543_v6 = vadd.f32 %v8506_v46, %v1261_v32  ;;  %vm1407_vm3 = vcmp.gt.f32.partialorder %v8534_v36, 0.0 }
 0x184   :  { %v8546_v30 = vadd.f32 %v8509_v11, %v1262_v62  ;;  %v1472_v12 = vmin.f32 %v8538_v57, 0.0  ;;  %vm1408_vm9 = vcmp.gt.f32.partialorder %v8538_v57, 0.0 }
 0x185   :  { %v1545_v17 = vmul.f32 1.442695, %v1471_v58  ;;  %v1475_v3 = vmin.f32 %v8543_v6, 0.0  ;;  %vm1411_vm5 = vcmp.gt.f32.partialorder %v8543_v6, 0.0 }
 0x186   :  { %v1476_v22 = vmin.f32 %v8546_v30, 0.0  ;;  %v1166_v16 = vpop.f32.mrb[40].mxu1  ;;  %vm1412_vm6 = vcmp.gt.f32.partialorder %v8546_v30, 0.0 }
 0x187   :  { %7063 = vpow2.f32 %v1545_v17  ;;  %v1265_v52 = vmul.f32 %v8494_v4, %v1166_v16  ;;  %v1168_v45 = vpop.f32.mrb[41].mxu1 }
 0x188   :  { %v1266_v61 = vmul.f32 %v8500_v14, %v1168_v45  ;;  %v1170_v5 = vpop.f32.mrb[42].mxu1  ;;  %v1555_v48 = vmul.f32 1.442695, %v1476_v22 }
 0x189   :  { %v7056_v21 = vpop.eup %7055  ;;  %v8553_v32 = vadd.f32 %v8506_v46, %v1265_v52  ;;  %v1269_v62 = vmul.f32 %v8494_v4, %v1170_v5  ;;  %v1172_v58 = vpop.f32.mrb[43].mxu1  ;;  %v1553_v5 = vmul.f32 1.442695, %v1475_v3 }
 0x18a   :  { %v5516_v54 = vadd.f32 -1.0, %v7056_v21  ;;  %v8557_v29 = vadd.f32 %v8509_v11, %v1266_v61  ;;  %v1270_v17 = vmul.f32 %v8500_v14, %v1172_v58  ;;  %7065 = vpow2.f32 %v1555_v48 }
 0x18b   :  { %v7058_v16 = vpop.eup %7057  ;;  %v8562_v45 = vadd.f32 %v8506_v46, %v1269_v62  ;;  %v1479_v61 = vmin.f32 %v8553_v32, 0.0  ;;  %7067 = vpow2.f32 %v1553_v5 }
 0x18c   :  { %v7060_v22 = vpop.eup %7059  ;;  %v5520_v52 = vadd.f32 -1.0, %v7058_v16  ;;  %v8565_v21 = vsel %vm1399_vm0, %v1335_v13, %v5516_v54  ;;  %v1480_v38 = vmin.f32 %v8557_v29, 0.0  ;;  %v8574_v34 = vadd.f32 %v8509_v11, %v1270_v17 }
 0x18d   :  { %v7062_v24 = vpop.eup %7061  ;;  %10182 = vst [vmem:[#allocation25_spill] sm:$0xff] %v8565_v21  ;;  %v1483_v62 = vmin.f32 %v8562_v45, 0.0  ;;  %v5521_v54 = vadd.f32 -1.0, %v7060_v22  ;;  %v1547_v13 = vmul.f32 1.442695, %v1472_v12  ;;  %vm1419_vm7 = vcmp.gt.f32.partialorder %v8562_v45, 0.0 }
 0x18e   :  { %v8569_v58 = vsel %vm1403_vm1, %v1339_v51, %v5520_v52  ;;  %v1176_v16 = vpop.f32.mrb[44].mxu1  ;;  %v5517_v56 = vadd.f32 -1.0, %v7062_v24  ;;  %v1484_v52 = vmin.f32 %v8574_v34, 0.0  ;;  %v1561_v40 = vmul.f32 1.442695, %v1479_v61 }
 0x18f   :  { %10183 = vst [vmem:[#allocation26_spill] sm:$0xff] %v8569_v58  ;;  %v1783_v3 = vpack.c.bf16 %v8569_v58, %v8565_v21  ;;  %v1273_v15 = vmul.f32 %v8494_v4, %v1176_v16  ;;  %v1178_v48 = vpop.f32.mrb[45].mxu1  ;;  %v1569_v51 = vmul.f32 1.442695, %v1483_v62  ;;  %v1563_v50 = vmul.f32 1.442695, %v1480_v38 }
 0x190   :  { %v1180_v28 = vpop.f32.mrb[46].mxu1  ;;  %v1274_v27 = vmul.f32 %v8500_v14, %v1178_v48  ;;  %v1571_v16 = vmul.f32 1.442695, %v1484_v52  ;;  %v8589_v5 = vsel %vm1404_vm2, %v8528_v59, %v5521_v54  ;;  %vm1420_vm8 = vcmp.gt.f32.partialorder %v8574_v34, 0.0 }
 0x191   :  { %v7064_v1 = vpop.eup %7063  ;;  %v8581_v17 = vadd.f32 %v8506_v46, %v1273_v15  ;;  %v1277_v35 = vmul.f32 %v8494_v4, %v1180_v28  ;;  %v1182_v22 = vpop.f32.mrb[47].mxu1  ;;  %7069 = vpow2.f32 %v1569_v51  ;;  %vm1416_vm14 = vcmp.gt.f32.partialorder %v8557_v29, 0.0 }
 0x192   :  { %v5524_v12 = vadd.f32 -1.0, %v7064_v1  ;;  %v1278_v24 = vmul.f32 %v8500_v14, %v1182_v22  ;;  %v8593_v15 = vadd.f32 %v8509_v11, %v1274_v27  ;;  %7071 = vpow2.f32 %v1571_v16 }
 0x193   :  { %v1487_v61 = vmin.f32 %v8581_v17, 0.0  ;;  %v8601_v1 = vadd.f32 %v8506_v46, %v1277_v35  ;;  %v8610_v27 = vsel %vm1400_vm4, %v8522_v60, %v5517_v56  ;;  %7073 = vpow2.f32 %v1547_v13 }
 0x194   :  { %v8598_v28 = vsel %vm1407_vm3, %v8534_v36, %v5524_v12  ;;  %v8604_v38 = vadd.f32 %v8509_v11, %v1278_v24  ;;  %v7066_v48 = vpop.eup %7065  ;;  %7075 = vpow2.f32 %v1561_v40  ;;  %v1784_v52 = vpack.c.bf16 %v8589_v5, %v8610_v27 }
 0x195   :  { %10184 = vst [vmem:[#allocation27_spill] sm:$0xff] %v8598_v28  ;;  %v1491_v62 = vmin.f32 %v8601_v1, 0.0  ;;  %v1577_v35 = vmul.f32 1.442695, %v1487_v61  ;;  %v1851_v12 = vunpack.c.h.b16 %v1783_v3  ;;  %7077 = vpow2.f32 %v1563_v50  ;;  %v7068_v31 = vpop.eup %7067 }
 0x196   :  { %v1492_v36 = vmin.f32 %v8604_v38, 0.0  ;;  %v1186_v54 = vpop.f32.mrb[48].mxu1  ;;  %v1852_v59 = vunpack.c.h.b16 %v1784_v52  ;;  %v5529_v3 = vadd.f32 -1.0, %v7066_v48  ;;  %v6596_v48 = vld [vmem:[%s10114_s4 + $0x214] ss:$8 sps:$4 sm:$0xff]   ;;  %v5528_v53 = vadd.f32 -1.0, %v7068_v31 }
 0x197   :  { %v1281_v51 = vmul.f32 %v8494_v4, %v1186_v54  ;;  %v1188_v22 = vpop.f32.mrb[49].mxu1  ;;  %v1585_v13 = vmul.f32 1.442695, %v1491_v62  ;;  %v1488_v54 = vmin.f32 %v8593_v15, 0.0  ;;  %7079 = vpow2.f32 %v1577_v35 }
 0x198   :  { %v1587_v16 = vmul.f32 1.442695, %v1492_v36  ;;  %v1282_v56 = vmul.f32 %v8500_v14, %v1188_v22  ;;  %v1190_v60 = vpop.f32.mrb[50].mxu1  ;;  %v1912_v62 = vpack.c.b16 %v1852_v59, %v7995_v41  ;;  %v6591_v36 = vld [vmem:[%s10114_s4 + $0x200] ss:$8 sps:$4 sm:$0xff]   ;;  %vm1427_vm10 = vcmp.gt.f32.partialorder %v8601_v1, 0.0 }
 0x199   :  { %v8619_v24 = vadd.f32 %v8506_v46, %v1281_v51  ;;  %v1285_v40 = vmul.f32 %v8494_v4, %v1190_v60  ;;  %v1192_v61 = vpop.f32.mrb[51].mxu1  ;;  %v1911_v51 = vpack.c.b16 %v1851_v12, %v7995_v41  ;;  %v6594_v59 = vld [vmem:[%s10114_s4 + $0x210] ss:$8 sps:$4 sm:$0xff]   ;;  %vm1428_vm11 = vcmp.gt.f32.partialorder %v8604_v38, 0.0 }
 0x19a   :  { %v8624_v55 = vadd.f32 %v8509_v11, %v1282_v56  ;;  %v1286_v50 = vmul.f32 %v8500_v14, %v1192_v61  ;;  %7081 = vpow2.f32 %v1587_v16  ;;  %3262 = vmatprep.mubr.bf16.mxu0 %v1912_v62  ;;  %v1579_v16 = vmul.f32 1.442695, %v1488_v54  ;;  %v6599_v62 = vld [vmem:[%s10114_s4 + $0x224] ss:$8 sps:$4 sm:$0xff]  }
 0x19b   :  { %v8634_v52 = vadd.f32 %v8506_v46, %v1285_v40  ;;  %v7070_v35 = vpop.eup %7069  ;;  %7083 = vpow2.f32 %v1585_v13  ;;  %v1495_v56 = vmin.f32 %v8619_v24, 0.0  ;;  %3263 = vmatmul.mubr.bf16.vlgmr.msra.gmra.mrb[32].mxu0 %v1911_v51  ;;  %v8651_v61 = vsel %vm1412_vm6, %v8546_v30, %v5529_v3 }
 0x19c   :  { %v8637_v22 = vadd.f32 %v8509_v11, %v1286_v50  ;;  %v7072_v12 = vpop.eup %7071  ;;  %3304 = vmatpush1.bf16.msra.mxu0 %v6591_v36  ;;  %v1496_v51 = vmin.f32 %v8624_v55, 0.0  ;;  %v5536_v36 = vadd.f32 -1.0, %v7070_v35  ;;  %vm1424_vm15 = vcmp.gt.f32.partialorder %v8593_v15, 0.0 }
 0x19d   :  { %v1499_v60 = vmin.f32 %v8634_v52, 0.0  ;;  %v5537_v54 = vadd.f32 -1.0, %v7072_v12  ;;  %v7074_v47 = vpop.eup %7073  ;;  %3305 = vmatprep.subr.bf16.mxu0 %v6596_v48  ;;  %vm1435_vm12 = vcmp.gt.f32.partialorder %v8634_v52, 0.0  ;;  %vm1415_vm0 = vcmp.gt.f32.partialorder %v8553_v32, 0.0 }
 0x19e   :  { %v1196_v40 = vpop.f32.mrb[52].mxu1  ;;  %v1500_v50 = vmin.f32 %v8637_v22, 0.0  ;;  %v8660_v9 = vpop.eup %7075  ;;  %vm1436_vm13 = vcmp.gt.f32.partialorder %v8637_v22, 0.0  ;;  %vm1423_vm1 = vcmp.gt.f32.partialorder %v8581_v17, 0.0  ;;  %vm1432_vm2 = vcmp.gt.f32.partialorder %v8624_v55, 0.0 }
 0x19f   :  { %v1289_v13 = vmul.f32 %v8494_v4, %v1196_v40  ;;  %v1198_v41 = vpop.f32.mrb[53].mxu1  ;;  %v1601_v23 = vmul.f32 1.442695, %v1499_v60  ;;  %v8669_v31 = vsel %vm1420_vm8, %v8574_v34, %v5537_v54  ;;  %v8671_v12 = vpop.eup %7077  ;;  %v6597_v34 = vld [vmem:[%s10114_s4 + $0x220] ss:$8 sps:$4 sm:$0xff]   ;;  %vm1431_vm4 = vcmp.gt.f32.partialorder %v8619_v24, 0.0 }
 0x1a0   :  { %v1290_v30 = vmul.f32 %v8500_v14, %v1198_v41  ;;  %v1200_v3 = vpop.f32.mrb[54].mxu1  ;;  %v1603_v43 = vmul.f32 1.442695, %v1500_v50  ;;  %v6022_v35 = vpack.c.bf16 %v8669_v31, %v8651_v61  ;;  %3306 = vmatpush1.bf16.msra.mxu0 %v6594_v59  ;;  %v6602_v59 = vld [vmem:[%s10114_s4 + $0x234] ss:$8 sps:$4 sm:$0xff]  }
 0x1a1   :  { %v8663_v40 = vadd.f32 %v8506_v46, %v1289_v13  ;;  %v1293_v0 = vmul.f32 %v8494_v4, %v1200_v3  ;;  %v1202_v18 = vpop.f32.mrb[55].mxu1  ;;  %7085 = vpow2.f32 %v1601_v23  ;;  %v8690_v23 = vsel %vm1411_vm5, %v8543_v6, %v5528_v53  ;;  %3307 = vmatprep.subr.bf16.mxu0 %v6599_v62  ;;  %v8704_v54 = vpop.eup %7079  ;;  %v6600_v6 = vld [vmem:[%s10114_s4 + $0x230] ss:$8 sps:$4 sm:$0xff]  }
 0x1a2   :  { %v8675_v41 = vadd.f32 %v8509_v11, %v1290_v30  ;;  %v1294_v48 = vmul.f32 %v8500_v14, %v1202_v18  ;;  %7087 = vpow2.f32 %v1603_v43  ;;  %10185 = vst [vmem:[#allocation28_spill] sm:$0xff] %v8690_v23  ;;  %v1593_v18 = vmul.f32 1.442695, %v1495_v56  ;;  %3272 = vmatprep.mubr.bf16.mxu0 %v6022_v35 }
 0x1a3   :  { %v1503_v60 = vmin.f32 %v8663_v40, 0.0  ;;  %v8685_v50 = vadd.f32 %v8506_v46, %v1293_v0  ;;  %v8702_v0 = vsel %vm1419_vm7, %v8562_v45, %v5536_v36  ;;  %7089 = vpow2.f32 %v1579_v16  ;;  %v6605_v36 = vld [vmem:[%s10114_s4 + $0x244] ss:$8 sps:$4 sm:$0xff]  }
 0x1a4   :  { %v1504_v13 = vmin.f32 %v8675_v41, 0.0  ;;  %v8694_v43 = vadd.f32 %v8509_v11, %v1294_v48  ;;  %v6021_v56 = vpack.c.bf16 %v8702_v0, %v8690_v23  ;;  %v7082_v62 = vpop.eup %7081  ;;  %v1595_v30 = vmul.f32 1.442695, %v1496_v51  ;;  %3308 = vmatpush1.bf16.msra.mxu0 %v6597_v34 }
 0x1a5   :  { %v1507_v53 = vmin.f32 %v8685_v50, 0.0  ;;  %v5525_v48 = vadd.f32 -1.0, %v7074_v47  ;;  %v7084_v35 = vpop.eup %7083  ;;  %v1609_v21 = vmul.f32 1.442695, %v1503_v60  ;;  %7091 = vpow2.f32 %v1593_v18  ;;  %3309 = vmatprep.subr.bf16.mxu0 %v6602_v59 }
 0x1a6   :  { %v1508_v45 = vmin.f32 %v8694_v43, 0.0  ;;  %v1206_v3 = vpop.f32.mrb[56].mxu1  ;;  %v1611_v63 = vmul.f32 1.442695, %v1504_v13  ;;  %3273 = vmatmul.mubr.bf16.gmra.mrb[36].mxu0 %v6021_v56  ;;  %v5545_v34 = vadd.f32 -1.0, %v7082_v62  ;;  %v5544_v13 = vadd.f32 -1.0, %v7084_v35 }
 0x1a7   :  { %v1617_v28 = vmul.f32 1.442695, %v1507_v53  ;;  %v1297_v2 = vmul.f32 %v8494_v4, %v1206_v3  ;;  %v1208_v51 = vpop.f32.mrb[57].mxu1  ;;  %v6608_v62 = vld [vmem:[%s10114_s4 + $0x254] ss:$8 sps:$4 sm:$0xff]   ;;  %vm1440_vm3 = vcmp.gt.f32.partialorder %v8675_v41, 0.0 }
 0x1a8   :  { %v1619_v7 = vmul.f32 1.442695, %v1508_v45  ;;  %v1298_v16 = vmul.f32 %v8500_v14, %v1208_v51  ;;  %v1210_v58 = vpop.f32.mrb[58].mxu1  ;;  %3310 = vmatpush1.bf16.msra.mxu0 %v6600_v6  ;;  %v8764_v35 = vsel %vm1428_vm11, %v8604_v38, %v5545_v34  ;;  %vm1439_vm5 = vcmp.gt.f32.partialorder %v8663_v40, 0.0 }
 0x1a9   :  { %7093 = vpow2.f32 %v1617_v28  ;;  %v8724_v47 = vadd.f32 %v8506_v46, %v1297_v2  ;;  %v1301_v23 = vmul.f32 %v8494_v4, %v1210_v58  ;;  %v1212_v60 = vpop.f32.mrb[59].mxu1  ;;  %v6603_v2 = vld [vmem:[%s10114_s4 + $0x240] ss:$8 sps:$4 sm:$0xff]   ;;  %3311 = vmatprep.subr.bf16.mxu0 %v6605_v36  ;;  %v6611_v36 = vld [vmem:[%s10114_s4 + $0x264] ss:$8 sps:$4 sm:$0xff]   ;;  %vm1443_vm6 = vcmp.gt.f32.partialorder %v8685_v50, 0.0 }
 0x1aa   :  { %7095 = vpow2.f32 %v1619_v7  ;;  %v8728_v53 = vadd.f32 %v8509_v11, %v1298_v16  ;;  %v1302_v18 = vmul.f32 %v8500_v14, %v1212_v60  ;;  %v8741_v7 = vsel %vm1408_vm9, %v8538_v57, %v5525_v48 }
 0x1ab   :  { %7097 = vpow2.f32 %v1595_v30  ;;  %v1511_v59 = vmin.f32 %v8724_v47, 0.0  ;;  %v8736_v28 = vadd.f32 %v8506_v46, %v1301_v23  ;;  %v7086_v58 = vpop.eup %7085  ;;  %vm1444_vm7 = vcmp.gt.f32.partialorder %v8694_v43, 0.0 }
 0x1ac   :  { %7099 = vpow2.f32 %v1609_v21  ;;  %v1512_v56 = vmin.f32 %v8728_v53, 0.0  ;;  %v8745_v6 = vadd.f32 %v8509_v11, %v1302_v18  ;;  %v7088_v30 = vpop.eup %7087  ;;  %v6606_v21 = vld [vmem:[%s10114_s4 + $0x250] ss:$8 sps:$4 sm:$0xff]   ;;  %v5552_v45 = vadd.f32 -1.0, %v7086_v58  ;;  %3312 = vmatpush1.bf16.msra.mxu0 %v6603_v2 }
 0x1ad   :  { %7101 = vpow2.f32 %v1611_v63  ;;  %v1515_v57 = vmin.f32 %v8736_v28, 0.0  ;;  %v5553_v48 = vadd.f32 -1.0, %v7088_v30  ;;  %v8769_v63 = vsel %vm1427_vm10, %v8601_v1, %v5544_v13  ;;  %v7090_v51 = vpop.eup %7089  ;;  %3313 = vmatprep.subr.bf16.mxu0 %v6608_v62 }
 0x1ae   :  { %v1516_v16 = vmin.f32 %v8745_v6, 0.0  ;;  %v1216_v3 = vpop.f32.mrb[60].mxu1  ;;  %v1625_v60 = vmul.f32 1.442695, %v1511_v59  ;;  %v8776_v30 = vsel %vm1435_vm12, %v8634_v52, %v5552_v45  ;;  %v1627_v38 = vmul.f32 1.442695, %v1512_v56 }
 0x1af   :  { %v1633_v18 = vmul.f32 1.442695, %v1515_v57  ;;  %v1305_v58 = vmul.f32 %v8494_v4, %v1216_v3  ;;  %v1218_v23 = vpop.f32.mrb[61].mxu1  ;;  %v8783_v59 = vsel %vm1436_vm13, %v8637_v22, %v5553_v48  ;;  %v8791_v45 = vpop.eup %7091  ;;  %v6609_v3 = vld [vmem:[%s10114_s4 + $0x260] ss:$8 sps:$4 sm:$0xff]   ;;  %vm1451_vm8 = vcmp.gt.f32.partialorder %v8736_v28, 0.0 }
 0x1b0   :  { %v1635_v34 = vmul.f32 1.442695, %v1516_v16  ;;  %v1306_v1 = vmul.f32 %v8500_v14, %v1218_v23  ;;  %v1220_v13 = vpop.f32.mrb[62].mxu1  ;;  %v6026_v56 = vpack.c.bf16 %v8783_v59, %v8764_v35  ;;  %v6025_v23 = vpack.c.bf16 %v8776_v30, %v8769_v63  ;;  %3314 = vmatpush1.bf16.msra.mxu0 %v6606_v21 }
 0x1b1   :  { %7103 = vpow2.f32 %v1633_v18  ;;  %v8786_v2 = vadd.f32 %v8506_v46, %v1305_v58  ;;  %v1309_v52 = vmul.f32 %v8494_v4, %v1220_v13  ;;  %v1222_v57 = vpop.f32.mrb[63].mxu1  ;;  %3315 = vmatprep.subr.bf16.mxu0 %v6611_v36  ;;  %v6614_v18 = vld [vmem:[%s10114_s4 + $0x274] ss:$8 sps:$4 sm:$0xff]   ;;  %vm1452_vm9 = vcmp.gt.f32.partialorder %v8745_v6, 0.0 }
 0x1b2   :  { %7105 = vpow2.f32 %v1635_v34  ;;  %v8796_v22 = vadd.f32 %v8509_v11, %v1306_v1  ;;  %v1310_v62 = vmul.f32 %v8500_v14, %v1222_v57  ;;  %3282 = vmatprep.mubr.bf16.mxu0 %v6026_v56  ;;  %vm1447_vm10 = vcmp.gt.f32.partialorder %v8724_v47, 0.0 }
 0x1b3   :  { %v7094_v4 = vpop.eup %7093  ;;  %7107 = vpow2.f32 %v1625_v60  ;;  %v1519_v16 = vmin.f32 %v8786_v2, 0.0  ;;  %v8808_v48 = vadd.f32 %v8506_v46, %v1309_v52  ;;  %3283 = vmatmul.mubr.bf16.gmra.mrb[40].mxu0 %v6025_v23  ;;  %v5533_v46 = vadd.f32 -1.0, %v8671_v12  ;;  %v6612_v12 = vld [vmem:[%s10114_s4 + $0x270] ss:$8 sps:$4 sm:$0xff]  }
 0x1b4   :  { %v7096_v14 = vpop.eup %7095  ;;  %7109 = vpow2.f32 %v1627_v38  ;;  %v1520_v60 = vmin.f32 %v8796_v22, 0.0  ;;  %v8814_v21 = vadd.f32 %v8509_v11, %v1310_v62  ;;  %3316 = vmatpush1.bf16.msra.mxu0 %v6609_v3  ;;  %v5560_v56 = vadd.f32 -1.0, %v7094_v4 }
 0x1b5   :  { %v7098_v58 = vpop.eup %7097  ;;  %v1641_v34 = vmul.f32 1.442695, %v1519_v16  ;;  %v1523_v36 = vmin.f32 %v8808_v48, 0.0  ;;  %v5561_v13 = vadd.f32 -1.0, %v7096_v14  ;;  %v5541_v62 = vadd.f32 -1.0, %v7090_v51  ;;  %3317 = vmatprep.subr.bf16.mxu0 %v6614_v18 }
 0x1b6   :  { %v7100_v38 = vpop.eup %7099  ;;  %v1643_v11 = vmul.f32 1.442695, %v1520_v60  ;;  %v1524_v1 = vmin.f32 %v8814_v21, 0.0  ;;  %v6617_v16 = vld [vmem:[%s10114_s4 + $0x284] ss:$8 sps:$4 sm:$0xff]   ;;  %v8834_v14 = vsel %vm1416_vm14, %v8557_v29, %v5533_v46  ;;  %v5532_v3 = vadd.f32 -1.0, %v8660_v9 }
 0x1b7   :  { %v7102_v52 = vpop.eup %7101  ;;  %7111 = vpow2.f32 %v1641_v34  ;;  %v1649_v57 = vmul.f32 1.442695, %v1523_v36  ;;  %v8840_v4 = vsel %vm1424_vm15, %v8593_v15, %v5541_v62  ;;  %v5540_v51 = vadd.f32 -1.0, %v8704_v54  ;;  %v6615_v15 = vld [vmem:[%s10114_s4 + $0x280] ss:$8 sps:$4 sm:$0xff]  }
 0x1b8   :  { %7113 = vpow2.f32 %v1643_v11  ;;  %v1651_v23 = vmul.f32 1.442695, %v1524_v1  ;;  %v5549_v60 = vadd.f32 -1.0, %v7098_v58  ;;  %v8846_v18 = vsel %vm1444_vm7, %v8694_v43, %v5561_v13  ;;  %3318 = vmatpush1.bf16.msra.mxu0 %v6612_v12  ;;  %v6620_v11 = vld [vmem:[%s10114_s4 + $0x294] ss:$8 sps:$4 sm:$0xff]  }
 0x1b9   :  { %7115 = vpow2.f32 %v1649_v57  ;;  %v6038_v29 = vpack.c.bf16 %v8840_v4, %v8834_v14  ;;  %v5557_v46 = vadd.f32 -1.0, %v7102_v52  ;;  %v8856_v54 = vsel %vm1415_vm0, %v8553_v32, %v5532_v3  ;;  %3319 = vmatprep.subr.bf16.mxu0 %v6617_v16  ;;  %v6623_v16 = vld [vmem:[%s10114_s4 + $0x2a4] ss:$8 sps:$4 sm:$0xff]   ;;  %v6698_v14 = vld [vmem:[%s10114_s4 + $0x434] ss:$8 sps:$4 sm:$0xff]  }
 0x1ba   :  { %7117 = vpow2.f32 %v1651_v23  ;;  %v8861_v43 = vsel %vm1423_vm1, %v8581_v17, %v5540_v51  ;;  %v5548_v58 = vadd.f32 -1.0, %v8791_v45  ;;  %v5556_v34 = vadd.f32 -1.0, %v7100_v38  ;;  %v6696_v4 = vld [vmem:[%s10114_s4 + $0x430] ss:$8 sps:$4 sm:$0xff]  }
 0x1bb   :  { %v7104_v9 = vpop.eup %7103  ;;  %v6037_v13 = vpack.c.bf16 %v8861_v43, %v8856_v54  ;;  %v8872_v32 = vsel %vm1432_vm2, %v8624_v55, %v5549_v60  ;;  %v8877_v17 = vsel %vm1440_vm3, %v8675_v41, %v5557_v46  ;;  %v8895_v41 = vsel %vm1443_vm6, %v8685_v50, %v5560_v56  ;;  %v6699_v54 = vld [vmem:[%s10114_s4 + $0x440] ss:$8 sps:$4 sm:$0xff]   ;;  %v6704_v43 = vld [vmem:[%s10114_s4 + $0x454] ss:$8 sps:$4 sm:$0xff]  }
 0x1bc   :  { %v7106_v36 = vpop.eup %7105  ;;  %v5568_v1 = vadd.f32 -1.0, %v7104_v9  ;;  %v6042_v52 = vpack.c.bf16 %v8877_v17, %v8872_v32  ;;  %v8884_v57 = vsel %vm1431_vm4, %v8619_v24, %v5548_v58  ;;  %v8889_v55 = vsel %vm1439_vm5, %v8663_v40, %v5556_v34  ;;  %3320 = vmatpush1.bf16.msra.mxu0 %v6615_v15  ;;  %v6618_v40 = vld [vmem:[%s10114_s4 + $0x290] ss:$8 sps:$4 sm:$0xff]   ;;  %v6707_v32 = vld [vmem:[%s10114_s4 + $0x464] ss:$8 sps:$4 sm:$0xff]  }
 0x1bd   :  { %v7108_v45 = vpop.eup %7107  ;;  %v5569_v38 = vadd.f32 -1.0, %v7106_v36  ;;  %v6041_v24 = vpack.c.bf16 %v8889_v55, %v8884_v57  ;;  %v6050_v56 = vpack.c.bf16 %v8651_v61, %v8589_v5  ;;  %3321 = vmatprep.subr.bf16.mxu0 %v6620_v11  ;;  %v6058_v60 = vpack.c.bf16 %v8846_v18, %v8783_v59  ;;  %v6621_v11 = vld [vmem:[%s10114_s4 + $0x2a0] ss:$8 sps:$4 sm:$0xff]   ;;  %v6708_v57 = vld [vmem:[%s10114_s4 + $0x470] ss:$8 sps:$4 sm:$0xff]  }
 0x1be   :  { %v7110_v12 = vpop.eup %7109  ;;  %v8900_v62 = vsel %vm1451_vm8, %v8736_v28, %v5568_v1  ;;  %v6054_v28 = vpack.c.bf16 %v8764_v35, %v8669_v31  ;;  %v5564_v51 = vadd.f32 -1.0, %v7108_v45  ;;  %vm1448_vm11 = vcmp.gt.f32.partialorder %v8728_v53, 0.0  ;;  %v6705_v17 = vld [vmem:[%s10114_s4 + $0x460] ss:$8 sps:$4 sm:$0xff]   ;;  %v6713_v55 = vld [vmem:[%s10114_s4 + $0x484] ss:$8 sps:$4 sm:$0xff]  }
 0x1bf   :  { %v8908_v23 = vsel %vm1452_vm9, %v8745_v6, %v5569_v38  ;;  %v6029_v50 = vpack.c.bf16 %v8900_v62, %v8895_v41  ;;  %v6053_v6 = vpack.c.bf16 %v8769_v63, %v8702_v0  ;;  %v5565_v9 = vadd.f32 -1.0, %v7110_v12  ;;  %v6626_v38 = vld [vmem:[%s10114_s4 + $0x2b4] ss:$8 sps:$4 sm:$0xff]   ;;  %v6762_v61 = vld [vmem:[%s10114_s4 + $0x590] ss:$8 sps:$4 sm:$0xff]  }
 0x1c0   :  { %v6030_v3 = vpack.c.bf16 %v8908_v23, %v8846_v18  ;;  %vm1455_vm12 = vcmp.gt.f32.partialorder %v8786_v2, 0.0  ;;  %vm1456_vm13 = vcmp.gt.f32.partialorder %v8796_v22, 0.0  ;;  %3322 = vmatpush1.bf16.msra.mxu0 %v6618_v40  ;;  %vm1459_vm14 = vcmp.gt.f32.partialorder %v8808_v48, 0.0  ;;  %v6764_v5 = vld [vmem:[%s10114_s4 + $0x594] ss:$8 sps:$4 sm:$0xff]  }
 0x1c1   :  { %v7112_v46 = vpop.eup %7111  ;;  %3323 = vmatprep.subr.bf16.mxu0 %v6623_v16  ;;  %v8939_v12 = vsel %vm1447_vm10, %v8724_v47, %v5564_v51  ;;  %vm1460_vm15 = vcmp.gt.f32.partialorder %v8814_v21, 0.0  ;;  %v6627_v51 = vld [vmem:[%s10114_s4 + $0x2c0] ss:$8 sps:$4 sm:$0xff]   ;;  %v6809_v0 = vld [vmem:[%s10117_s7 + $0x84] ss:$8 sps:$4 sm:$0xff]  }
 0x1c2   :  { %v7114_v58 = vpop.eup %7113  ;;  %3292 = vmatprep.mubr.bf16.mxu0 %v6030_v3  ;;  %v5572_v34 = vadd.f32 -1.0, %v7112_v46  ;;  %v10186_v46 = vpack.c.bf16 %v8337_v33, %v8066_v39  ;;  %v6624_v39 = vld [vmem:[%s10114_s4 + $0x2b0] ss:$8 sps:$4 sm:$0xff]   ;;  %v6807_v31 = vld [vmem:[%s10117_s7 + $0x80] ss:$8 sps:$4 sm:$0xff]  }
 0x1c3   :  { %v7116_v36 = vpop.eup %7115  ;;  %v5573_v1 = vadd.f32 -1.0, %v7114_v58  ;;  %3293 = vmatmul.mubr.bf16.gmra.mrb[44].mxu0 %v6029_v50  ;;  %v8948_v58 = vsel %vm1448_vm11, %v8728_v53, %v5565_v9  ;;  %v6630_v9 = vld [vmem:[%s10114_s4 + $0x2d0] ss:$8 sps:$4 sm:$0xff]   ;;  %v6812_v63 = vld [vmem:[%s10117_s7 + $0x94] ss:$8 sps:$4 sm:$0xff]  }
 0x1c4   :  { %v7118_v45 = vpop.eup %7117  ;;  %v8942_v3 = vsel %vm1455_vm12, %v8786_v2, %v5572_v34  ;;  %v5576_v40 = vadd.f32 -1.0, %v7116_v36  ;;  %3335 = vmatprep.mubr.bf16.mxu0 %v10186_v46  ;;  %3324 = vmatpush1.bf16.msra.mxu0 %v6621_v11  ;;  %v6633_v34 = vld [vmem:[%s10114_s4 + $0x2e0] ss:$8 sps:$4 sm:$0xff]   ;;  %v6638_v36 = vld [vmem:[%s10114_s4 + $0x2f4] ss:$8 sps:$4 sm:$0xff]  }
 0x1c5   :  { %v8951_v16 = vsel %vm1456_vm13, %v8796_v22, %v5573_v1  ;;  %v6045_v50 = vpack.c.bf16 %v8942_v3, %v8939_v12  ;;  %v5577_v15 = vadd.f32 -1.0, %v7118_v45  ;;  %3325 = vmatprep.subr.bf16.mxu0 %v6626_v38  ;;  %v6629_v22 = vld [vmem:[%s10114_s4 + $0x2c4] ss:$8 sps:$4 sm:$0xff]   ;;  %v6636_v11 = vld [vmem:[%s10114_s4 + $0x2f0] ss:$8 sps:$4 sm:$0xff]  }
 0x1c6   :  { %v6046_v47 = vpack.c.bf16 %v8951_v16, %v8948_v58  ;;  %v8959_v2 = vsel %vm1459_vm14, %v8808_v48, %v5576_v40  ;;  %v6641_v1 = vld [vmem:[%s10114_s4 + $0x304] ss:$8 sps:$4 sm:$0xff]   ;;  %v6639_v45 = vld [vmem:[%s10114_s4 + $0x300] ss:$8 sps:$4 sm:$0xff]   ;;  %v6644_v38 = vld [vmem:[%s10114_s4 + $0x314] ss:$8 sps:$4 sm:$0xff]  }
 0x1c7   :  { %v8965_v33 = vsel %vm1460_vm15, %v8814_v21, %v5577_v15  ;;  %v6061_v53 = vpack.c.bf16 %v8959_v2, %v8900_v62  ;;  %v6632_v21 = vld [vmem:[%s10114_s4 + $0x2d4] ss:$8 sps:$4 sm:$0xff]   ;;  %v6635_v15 = vld [vmem:[%s10114_s4 + $0x2e4] ss:$8 sps:$4 sm:$0xff]   ;;  %v6810_v35 = vld [vmem:[%s10117_s7 + $0x90] ss:$8 sps:$4 sm:$0xff]  }
 0x1c8   :  { %v6062_v48 = vpack.c.bf16 %v8965_v33, %v8908_v23  ;;  %3326 = vmatpush1.bf16.msra.mxu0 %v6624_v39  ;;  %v10187_v40 = vld [vmem:[#allocation5_spill] sm:$0xff]  ;;  %v10189_v39 = vpack.c.bf16 %v8355_v26, %v8352_v10  ;;  %v10190_v26 = vpack.c.bf16 %v8370_v25, %v8367_v19  ;;  %v6651_v19 = vld [vmem:[%s10114_s4 + $0x340] ss:$8 sps:$4 sm:$0xff]   ;;  %v6785_v12 = vld [vmem:[%s10117_s7 + $0x4] ss:$8 sps:$4 sm:$0xff]  }
 0x1c9   :  { %3327 = vmatprep.subr.bf16.mxu0 %v6629_v22  ;;  %v10188_v46 = vpack.c.bf16 %v8078_v44, %v10187_v40  ;;  %v6642_v22 = vld [vmem:[%s10114_s4 + $0x310] ss:$8 sps:$4 sm:$0xff]   ;;  %v6645_v44 = vld [vmem:[%s10114_s4 + $0x320] ss:$8 sps:$4 sm:$0xff]   ;;  %v6650_v10 = vld [vmem:[%s10114_s4 + $0x334] ss:$8 sps:$4 sm:$0xff]   ;;  %4379 = vmatprep.subr.bf16.mxu1 %v6785_v12 }
 0x1ca   :  { %v6656_v25 = vld [vmem:[%s10114_s4 + $0x354] ss:$8 sps:$4 sm:$0xff]   ;;  %v6660_v40 = vld [vmem:[%s10114_s4 + $0x370] ss:$8 sps:$4 sm:$0xff]   ;;  %v10203_v58 = vld [vmem:[#allocation7_spill] sm:$0xff] }
 0x1cb   :  { %v6788_v3 = vld [vmem:[%s10117_s7 + $0x14] ss:$8 sps:$4 sm:$0xff]   ;;  %v10212_v12 = vld [vmem:[#allocation11_spill] sm:$0xff] }
 0x1cc   :  { %3328 = vmatpush1.bf16.msra.mxu0 %v6627_v51  ;;  %v6647_v51 = vld [vmem:[%s10114_s4 + $0x324] ss:$8 sps:$4 sm:$0xff]   ;;  %v6813_v59 = vld [vmem:[%s10117_s7 + $0xa0] ss:$8 sps:$4 sm:$0xff]   ;;  %v6818_v18 = vld [vmem:[%s10117_s7 + $0xb4] ss:$8 sps:$4 sm:$0xff]  }
 0x1cd   :  { %3329 = vmatprep.subr.bf16.mxu0 %v6632_v21  ;;  %v10191_v21 = vpack.c.bf16 %v8402_v37, %v8397_v20  ;;  %v10192_v20 = vpack.c.bf16 %v8424_v8, %v8413_v42  ;;  %v10193_v37 = vld [vmem:[#allocation20_spill] sm:$0xff]  ;;  %v6657_v42 = vld [vmem:[%s10114_s4 + $0x360] ss:$8 sps:$4 sm:$0xff]   ;;  %v6821_v62 = vld [vmem:[%s10117_s7 + $0xc4] ss:$8 sps:$4 sm:$0xff]  }
 0x1ce   :  { %v6662_v8 = vld [vmem:[%s10114_s4 + $0x374] ss:$8 sps:$4 sm:$0xff]   ;;  %v6819_v23 = vld [vmem:[%s10117_s7 + $0xc0] ss:$8 sps:$4 sm:$0xff]  }
 0x1cf   :  { %v6825_v2 = vld [vmem:[%s10117_s7 + $0xe0] ss:$8 sps:$4 sm:$0xff]   ;;  %v6830_v33 = vld [vmem:[%s10117_s7 + $0xf4] ss:$8 sps:$4 sm:$0xff]  }
 0x1d0   :  { %3330 = vmatpush1.bf16.msra.mxu0 %v6630_v9  ;;  %v6648_v9 = vld [vmem:[%s10114_s4 + $0x330] ss:$8 sps:$4 sm:$0xff]  }
 0x1d1   :  { %3331 = vmatprep.subr.bf16.mxu0 %v6635_v15  ;;  %v6653_v15 = vld [vmem:[%s10114_s4 + $0x344] ss:$8 sps:$4 sm:$0xff]  }
 0x1d4   :  { %3332 = vmatpush1.bf16.msra.mxu0 %v6633_v34  ;;  %v10194_v34 = vpack.c.bf16 %v8440_v49, %v10193_v37  ;;  %v10195_v49 = vld [vmem:[#allocation22_spill] sm:$0xff]  ;;  %v6684_v37 = vld [vmem:[%s10114_s4 + $0x3f0] ss:$8 sps:$4 sm:$0xff]  }
 0x1d5   :  { %3333 = vmatprep.subr.bf16.mxu0 %v6638_v36  ;;  %v6654_v36 = vld [vmem:[%s10114_s4 + $0x350] ss:$8 sps:$4 sm:$0xff]  }
 0x1d8   :  { %3334 = vmatpush1.bf16.msra.mxu0 %v6636_v11  ;;  %v6659_v11 = vld [vmem:[%s10114_s4 + $0x364] ss:$8 sps:$4 sm:$0xff]  }
 0x1d9   :  { %3376 = vmatprep.subr.bf16.mxu0 %v6641_v1  ;;  %v10196_v1 = vld [vmem:[#allocation21_spill] sm:$0xff] }
 0x1db   :  { %3336 = vmatmul.mubr.bf16.vlgmr.msra.gmra.mrb[32].mxu0 %v10188_v46  ;;  %v6665_v46 = vld [vmem:[%s10114_s4 + $0x384] ss:$8 sps:$4 sm:$0xff]  }
 0x1dc   :  { %3345 = vmatprep.mubr.bf16.mxu0 %v10189_v39  ;;  %3377 = vmatpush1.bf16.msra.mxu0 %v6639_v45  ;;  %v10197_v45 = vpack.c.bf16 %v10195_v49, %v10196_v1  ;;  %v6663_v39 = vld [vmem:[%s10114_s4 + $0x380] ss:$8 sps:$4 sm:$0xff]   ;;  %v6690_v1 = vld [vmem:[%s10114_s4 + $0x410] ss:$8 sps:$4 sm:$0xff]  }
 0x1dd   :  { %3378 = vmatprep.subr.bf16.mxu0 %v6644_v38  ;;  %v10198_v38 = vpack.c.bf16 %v8741_v7, %v8610_v27  ;;  %v6668_v27 = vld [vmem:[%s10114_s4 + $0x394] ss:$8 sps:$4 sm:$0xff]   ;;  %v6666_v7 = vld [vmem:[%s10114_s4 + $0x390] ss:$8 sps:$4 sm:$0xff]  }
 0x1e0   :  { %3379 = vmatpush1.bf16.msra.mxu0 %v6642_v22  ;;  %v6671_v22 = vld [vmem:[%s10114_s4 + $0x3a4] ss:$8 sps:$4 sm:$0xff]  }
 0x1e1   :  { %3380 = vmatprep.subr.bf16.mxu0 %v6647_v51  ;;  %v6669_v51 = vld [vmem:[%s10114_s4 + $0x3a0] ss:$8 sps:$4 sm:$0xff]  }
 0x1e3   :  { %3346 = vmatmul.mubr.bf16.gmra.mrb[36].mxu0 %v10190_v26  ;;  %v6677_v26 = vld [vmem:[%s10114_s4 + $0x3c4] ss:$8 sps:$4 sm:$0xff]  }
 0x1e4   :  { %3355 = vmatprep.mubr.bf16.mxu0 %v10191_v21  ;;  %3381 = vmatpush1.bf16.msra.mxu0 %v6645_v44  ;;  %v6674_v44 = vld [vmem:[%s10114_s4 + $0x3b4] ss:$8 sps:$4 sm:$0xff]   ;;  %v6675_v21 = vld [vmem:[%s10114_s4 + $0x3c0] ss:$8 sps:$4 sm:$0xff]  }
 0x1e5   :  { %3382 = vmatprep.subr.bf16.mxu0 %v6650_v10  ;;  %v6672_v10 = vld [vmem:[%s10114_s4 + $0x3b0] ss:$8 sps:$4 sm:$0xff]  }
 0x1e8   :  { %3383 = vmatpush1.bf16.msra.mxu0 %v6648_v9  ;;  %v6680_v9 = vld [vmem:[%s10114_s4 + $0x3d4] ss:$8 sps:$4 sm:$0xff]  }
 0x1e9   :  { %3384 = vmatprep.subr.bf16.mxu0 %v6653_v15  ;;  %v6678_v15 = vld [vmem:[%s10114_s4 + $0x3d0] ss:$8 sps:$4 sm:$0xff]  }
 0x1eb   :  { %3356 = vmatmul.mubr.bf16.gmra.mrb[40].mxu0 %v10192_v20  ;;  %v6686_v20 = vld [vmem:[%s10114_s4 + $0x3f4] ss:$8 sps:$4 sm:$0xff]  }
 0x1ec   :  { %3365 = vmatprep.mubr.bf16.mxu0 %v10194_v34  ;;  %3385 = vmatpush1.bf16.msra.mxu0 %v6651_v19  ;;  %v6683_v19 = vld [vmem:[%s10114_s4 + $0x3e4] ss:$8 sps:$4 sm:$0xff]  }
 0x1ed   :  { %3386 = vmatprep.subr.bf16.mxu0 %v6656_v25  ;;  %v6681_v25 = vld [vmem:[%s10114_s4 + $0x3e0] ss:$8 sps:$4 sm:$0xff]   ;;  %v6689_v34 = vld [vmem:[%s10114_s4 + $0x404] ss:$8 sps:$4 sm:$0xff]  }
 0x1f0   :  { %3387 = vmatpush1.bf16.msra.mxu0 %v6654_v36  ;;  %v6687_v36 = vld [vmem:[%s10114_s4 + $0x400] ss:$8 sps:$4 sm:$0xff]  }
 0x1f1   :  { %3388 = vmatprep.subr.bf16.mxu0 %v6659_v11  ;;  %v6692_v11 = vld [vmem:[%s10114_s4 + $0x414] ss:$8 sps:$4 sm:$0xff]  }
 0x1f3   :  { %3366 = vmatmul.mubr.bf16.gmra.mrb[44].mxu0 %v10197_v45  ;;  %v6695_v45 = vld [vmem:[%s10114_s4 + $0x424] ss:$8 sps:$4 sm:$0xff]  }
 0x1f4   :  { %3389 = vmatpush1.bf16.msra.mxu0 %v6657_v42  ;;  %3408 = vmatprep.mubr.bf16.mxu0 %v10198_v38  ;;  %v10199_v42 = vld [vmem:[#allocation27_spill] sm:$0xff] }
 0x1f5   :  { %3390 = vmatprep.subr.bf16.mxu0 %v6662_v8  ;;  %v10200_v8 = vld [vmem:[#allocation25_spill] sm:$0xff]  ;;  %v6693_v38 = vld [vmem:[%s10114_s4 + $0x420] ss:$8 sps:$4 sm:$0xff]  }
 0x1f6   :  { %v10201_v49 = vpack.c.bf16 %v10199_v42, %v10200_v8  ;;  %v6801_v42 = vld [vmem:[%s10117_s7 + $0x60] ss:$8 sps:$4 sm:$0xff]   ;;  %v6731_v8 = vld [vmem:[%s10114_s4 + $0x4e4] ss:$8 sps:$4 sm:$0xff]  }
 0x1f8   :  { %3391 = vmatpush1.bf16.msra.mxu0 %v6660_v40  ;;  %v6716_v40 = vld [vmem:[%s10114_s4 + $0x494] ss:$8 sps:$4 sm:$0xff]  }
 0x1f9   :  { %3392 = vmatprep.subr.bf16.mxu0 %v6665_v46  ;;  %v6786_v46 = vld [vmem:[%s10117_s7 + $0x10] ss:$8 sps:$4 sm:$0xff]  }
 0x1fc   :  { %3393 = vmatpush1.bf16.msra.mxu0 %v6663_v39  ;;  %v6791_v39 = vld [vmem:[%s10117_s7 + $0x24] ss:$8 sps:$4 sm:$0xff]  }
 0x1fd   :  { %3394 = vmatprep.subr.bf16.mxu0 %v6668_v27  ;;  %v6714_v27 = vld [vmem:[%s10114_s4 + $0x490] ss:$8 sps:$4 sm:$0xff]  }
 0x200   :  { %3395 = vmatpush1.bf16.msra.mxu0 %v6666_v7  ;;  %v6719_v7 = vld [vmem:[%s10114_s4 + $0x4a4] ss:$8 sps:$4 sm:$0xff]  }
 0x201   :  { %3396 = vmatprep.subr.bf16.mxu0 %v6671_v22  ;;  %v6789_v22 = vld [vmem:[%s10117_s7 + $0x20] ss:$8 sps:$4 sm:$0xff]  }
 0x204   :  { %3397 = vmatpush1.bf16.msra.mxu0 %v6669_v51  ;;  %v6794_v51 = vld [vmem:[%s10117_s7 + $0x34] ss:$8 sps:$4 sm:$0xff]  }
 0x205   :  { %3398 = vmatprep.subr.bf16.mxu0 %v6674_v44  ;;  %v6717_v44 = vld [vmem:[%s10114_s4 + $0x4a0] ss:$8 sps:$4 sm:$0xff]  }
 0x208   :  { %3399 = vmatpush1.bf16.msra.mxu0 %v6672_v10  ;;  %v6792_v10 = vld [vmem:[%s10117_s7 + $0x30] ss:$8 sps:$4 sm:$0xff]  }
 0x209   :  { %3400 = vmatprep.subr.bf16.mxu0 %v6677_v26  ;;  %v6722_v26 = vld [vmem:[%s10114_s4 + $0x4b4] ss:$8 sps:$4 sm:$0xff]  }
 0x20c   :  { %3401 = vmatpush1.bf16.msra.mxu0 %v6675_v21  ;;  %v6797_v21 = vld [vmem:[%s10117_s7 + $0x44] ss:$8 sps:$4 sm:$0xff]  }
 0x20d   :  { %3402 = vmatprep.subr.bf16.mxu0 %v6680_v9  ;;  %v6720_v9 = vld [vmem:[%s10114_s4 + $0x4b0] ss:$8 sps:$4 sm:$0xff]  }
 0x210   :  { %3403 = vmatpush1.bf16.msra.mxu0 %v6678_v15  ;;  %v6795_v15 = vld [vmem:[%s10117_s7 + $0x40] ss:$8 sps:$4 sm:$0xff]  }
 0x211   :  { %3404 = vmatprep.subr.bf16.mxu0 %v6683_v19  ;;  %v6725_v19 = vld [vmem:[%s10114_s4 + $0x4c4] ss:$8 sps:$4 sm:$0xff]  }
 0x214   :  { %3405 = vmatpush1.bf16.msra.mxu0 %v6681_v25  ;;  %v6800_v25 = vld [vmem:[%s10117_s7 + $0x54] ss:$8 sps:$4 sm:$0xff]  }
 0x215   :  { %3406 = vmatprep.subr.bf16.mxu0 %v6686_v20  ;;  %v6723_v20 = vld [vmem:[%s10114_s4 + $0x4c0] ss:$8 sps:$4 sm:$0xff]  }
 0x218   :  { %3407 = vmatpush1.bf16.msra.mxu0 %v6684_v37  ;;  %v6798_v37 = vld [vmem:[%s10117_s7 + $0x50] ss:$8 sps:$4 sm:$0xff]  }
 0x219   :  { %3449 = vmatprep.subr.bf16.mxu0 %v6689_v34  ;;  %v6728_v34 = vld [vmem:[%s10114_s4 + $0x4d4] ss:$8 sps:$4 sm:$0xff]  }
 0x21b   :  { %3409 = vmatmul.mubr.bf16.vlgmr.msra.gmra.mrb[32].mxu0 %v10201_v49  ;;  %v6806_v49 = vld [vmem:[%s10117_s7 + $0x74] ss:$8 sps:$4 sm:$0xff]  }
 0x21c   :  { %3418 = vmatprep.mubr.bf16.mxu0 %v6038_v29  ;;  %3450 = vmatpush1.bf16.msra.mxu0 %v6687_v36  ;;  %v6701_v29 = vld [vmem:[%s10114_s4 + $0x444] ss:$8 sps:$4 sm:$0xff]  }
 0x21d   :  { %3451 = vmatprep.subr.bf16.mxu0 %v6692_v11  ;;  %v6803_v36 = vld [vmem:[%s10117_s7 + $0x64] ss:$8 sps:$4 sm:$0xff]   ;;  %v6726_v11 = vld [vmem:[%s10114_s4 + $0x4d0] ss:$8 sps:$4 sm:$0xff]  }
 0x220   :  { %3452 = vmatpush1.bf16.msra.mxu0 %v6690_v1  ;;  %v6729_v1 = vld [vmem:[%s10114_s4 + $0x4e0] ss:$8 sps:$4 sm:$0xff]  }
 0x221   :  { %3453 = vmatprep.subr.bf16.mxu0 %v6695_v45  ;;  %v6804_v45 = vld [vmem:[%s10117_s7 + $0x70] ss:$8 sps:$4 sm:$0xff]  }
 0x223   :  { %3419 = vmatmul.mubr.bf16.gmra.mrb[36].mxu0 %v6037_v13  ;;  %v6702_v13 = vld [vmem:[%s10114_s4 + $0x450] ss:$8 sps:$4 sm:$0xff]  }
 0x224   :  { %3428 = vmatprep.mubr.bf16.mxu0 %v6042_v52  ;;  %3454 = vmatpush1.bf16.msra.mxu0 %v6693_v38  ;;  %v6710_v52 = vld [vmem:[%s10114_s4 + $0x474] ss:$8 sps:$4 sm:$0xff]  }
 0x225   :  { %3455 = vmatprep.subr.bf16.mxu0 %v6698_v14  ;;  %v6734_v38 = vld [vmem:[%s10114_s4 + $0x4f4] ss:$8 sps:$4 sm:$0xff]   ;;  %v6732_v14 = vld [vmem:[%s10114_s4 + $0x4f0] ss:$8 sps:$4 sm:$0xff]  }
 0x228   :  { %3456 = vmatpush1.bf16.msra.mxu0 %v6696_v4  ;;  %v6737_v4 = vld [vmem:[%s10114_s4 + $0x504] ss:$8 sps:$4 sm:$0xff]  }
 0x229   :  { %3457 = vmatprep.subr.bf16.mxu0 %v6701_v29  ;;  %v6735_v29 = vld [vmem:[%s10114_s4 + $0x500] ss:$8 sps:$4 sm:$0xff]  }
 0x22b   :  { %3429 = vmatmul.mubr.bf16.gmra.mrb[40].mxu0 %v6041_v24  ;;  %v10202_v24 = vld [vmem:[#allocation8_spill] sm:$0xff] }
 0x22c   :  { %3438 = vmatprep.mubr.bf16.mxu0 %v6046_v47  ;;  %3458 = vmatpush1.bf16.msra.mxu0 %v6699_v54  ;;  %v10204_v16 = vpack.c.bf16 %v10202_v24, %v10203_v58  ;;  %v6783_v47 = vld [vmem:[%s10117_s7] ss:$8 sps:$4 sm:$0xff]   ;;  %v6740_v54 = vld [vmem:[%s10114_s4 + $0x514] ss:$8 sps:$4 sm:$0xff]   ;;  %v6743_v24 = vld [vmem:[%s10114_s4 + $0x524] ss:$8 sps:$4 sm:$0xff]  }
 0x22d   :  { %3459 = vmatprep.subr.bf16.mxu0 %v6704_v43  ;;  %4380 = vmatpush1.bf16.msra.mxu1 %v6783_v47  ;;  %v10205_v43 = vld [vmem:[#allocation10_spill] sm:$0xff] }
 0x22e   :  { %4381 = vmatprep.subr.bf16.mxu1 %v6788_v3  ;;  %v6741_v58 = vld [vmem:[%s10114_s4 + $0x520] ss:$8 sps:$4 sm:$0xff]  }
 0x22f   :  { %v10211_v47 = vld [vmem:[#allocation14_spill] sm:$0xff] }
 0x230   :  { %3460 = vmatpush1.bf16.msra.mxu0 %v6702_v13  ;;  %v10206_v13 = vld [vmem:[#allocation6_spill] sm:$0xff]  ;;  %v10213_v3 = vpack.c.bf16 %v10211_v47, %v10212_v12  ;;  %v10231_v12 = vld [vmem:[#allocation3_spill] sm:$0xff] }
 0x231   :  { %3461 = vmatprep.subr.bf16.mxu0 %v6707_v32  ;;  %4382 = vmatpush1.bf16.msra.mxu1 %v6786_v46  ;;  %v10207_v32 = vpack.c.bf16 %v10205_v43, %v10206_v13  ;;  %v6777_v43 = vld [vmem:[%s10114_s4 + $0x5e0] ss:$8 sps:$4 sm:$0xff]   ;;  %v6782_v13 = vld [vmem:[%s10114_s4 + $0x5f4] ss:$8 sps:$4 sm:$0xff]  }
 0x232   :  { %4383 = vmatprep.subr.bf16.mxu1 %v6791_v39  ;;  %v6744_v39 = vld [vmem:[%s10114_s4 + $0x530] ss:$8 sps:$4 sm:$0xff]  }
 0x233   :  { %3439 = vmatmul.mubr.bf16.gmra.mrb[44].mxu0 %v6045_v50  ;;  %v6711_v50 = vld [vmem:[%s10114_s4 + $0x480] ss:$8 sps:$4 sm:$0xff]  }
 0x234   :  { %3462 = vmatpush1.bf16.msra.mxu0 %v6705_v17  ;;  %3481 = vmatprep.mubr.bf16.mxu0 %v10204_v16  ;;  %v10208_v17 = vld [vmem:[#allocation12_spill] sm:$0xff] }
 0x235   :  { %3463 = vmatprep.subr.bf16.mxu0 %v6710_v52  ;;  %4384 = vmatpush1.bf16.msra.mxu1 %v6789_v22  ;;  %v10209_v52 = vld [vmem:[#allocation9_spill] sm:$0xff] }
 0x236   :  { %4385 = vmatprep.subr.bf16.mxu1 %v6794_v51  ;;  %v6746_v16 = vld [vmem:[%s10114_s4 + $0x534] ss:$8 sps:$4 sm:$0xff]  }
 0x237   :  { %v6752_v22 = vld [vmem:[%s10114_s4 + $0x554] ss:$8 sps:$4 sm:$0xff]  }
 0x238   :  { %3464 = vmatpush1.bf16.msra.mxu0 %v6708_v57  ;;  %v10210_v57 = vpack.c.bf16 %v10208_v17, %v10209_v52  ;;  %v10217_v51 = vld [vmem:[#allocation17_spill] sm:$0xff]  ;;  %v10226_v17 = vld [vmem:[#allocation28_spill] sm:$0xff]  ;;  %v10227_v52 = vld [vmem:[#allocation26_spill] sm:$0xff] }
 0x239   :  { %3465 = vmatprep.subr.bf16.mxu0 %v6713_v55  ;;  %4386 = vmatpush1.bf16.msra.mxu1 %v6792_v10  ;;  %v6738_v55 = vld [vmem:[%s10114_s4 + $0x510] ss:$8 sps:$4 sm:$0xff]  }
 0x23a   :  { %4387 = vmatprep.subr.bf16.mxu1 %v6797_v21  ;;  %v10221_v21 = vld [vmem:[#allocation19_spill] sm:$0xff] }
 0x23c   :  { %3466 = vmatpush1.bf16.msra.mxu0 %v6711_v50  ;;  %v10214_v50 = vld [vmem:[#allocation16_spill] sm:$0xff] }
 0x23d   :  { %3467 = vmatprep.subr.bf16.mxu0 %v6716_v40  ;;  %4388 = vmatpush1.bf16.msra.mxu1 %v6795_v15  ;;  %v10215_v40 = vld [vmem:[#allocation13_spill] sm:$0xff] }
 0x23e   :  { %4389 = vmatprep.subr.bf16.mxu1 %v6800_v25  ;;  %v10216_v46 = vpack.c.bf16 %v10214_v50, %v10215_v40  ;;  %v6750_v15 = vld [vmem:[%s10114_s4 + $0x550] ss:$8 sps:$4 sm:$0xff]   ;;  %v6753_v25 = vld [vmem:[%s10114_s4 + $0x560] ss:$8 sps:$4 sm:$0xff]  }
 0x240   :  { %3468 = vmatpush1.bf16.msra.mxu0 %v6714_v27  ;;  %v6749_v27 = vld [vmem:[%s10114_s4 + $0x544] ss:$8 sps:$4 sm:$0xff]  }
 0x241   :  { %3469 = vmatprep.subr.bf16.mxu0 %v6719_v7  ;;  %4390 = vmatpush1.bf16.msra.mxu1 %v6798_v37  ;;  %v6747_v7 = vld [vmem:[%s10114_s4 + $0x540] ss:$8 sps:$4 sm:$0xff]   ;;  %v10223_v37 = vld [vmem:[#allocation24_spill] sm:$0xff] }
 0x242   :  { %4391 = vmatprep.subr.bf16.mxu1 %v6803_v36 }
 0x244   :  { %3470 = vmatpush1.bf16.msra.mxu0 %v6717_v44  ;;  %v10218_v44 = vld [vmem:[#allocation15_spill] sm:$0xff] }
 0x245   :  { %3471 = vmatprep.subr.bf16.mxu0 %v6722_v26  ;;  %4392 = vmatpush1.bf16.msra.mxu1 %v6801_v42  ;;  %v10219_v10 = vpack.c.bf16 %v10217_v51, %v10218_v44  ;;  %v10220_v26 = vld [vmem:[#allocation23_spill] sm:$0xff] }
 0x246   :  { %4393 = vmatprep.subr.bf16.mxu1 %v6806_v49  ;;  %v6761_v42 = vld [vmem:[%s10114_s4 + $0x584] ss:$8 sps:$4 sm:$0xff]   ;;  %v6765_v49 = vld [vmem:[%s10114_s4 + $0x5a0] ss:$8 sps:$4 sm:$0xff]  }
 0x248   :  { %3472 = vmatpush1.bf16.msra.mxu0 %v6720_v9  ;;  %v10222_v9 = vpack.c.bf16 %v10220_v26, %v10221_v21 }
 0x249   :  { %3473 = vmatprep.subr.bf16.mxu0 %v6725_v19  ;;  %4394 = vmatpush1.bf16.msra.mxu1 %v6804_v45  ;;  %v6755_v19 = vld [vmem:[%s10114_s4 + $0x564] ss:$8 sps:$4 sm:$0xff]   ;;  %v6768_v45 = vld [vmem:[%s10114_s4 + $0x5b0] ss:$8 sps:$4 sm:$0xff]  }
 0x24a   :  { %4395 = vmatprep.subr.bf16.mxu1 %v6809_v0 }
 0x24c   :  { %3474 = vmatpush1.bf16.msra.mxu0 %v6723_v20  ;;  %v6758_v20 = vld [vmem:[%s10114_s4 + $0x574] ss:$8 sps:$4 sm:$0xff]  }
 0x24d   :  { %3475 = vmatprep.subr.bf16.mxu0 %v6728_v34  ;;  %v10224_v34 = vld [vmem:[#allocation18_spill] sm:$0xff]  ;;  %4396 = vmatpush1.bf16.msra.mxu1 %v6807_v31 }
 0x24e   :  { %v10225_v36 = vpack.c.bf16 %v10223_v37, %v10224_v34  ;;  %4397 = vmatprep.subr.bf16.mxu1 %v6812_v63 }
 0x250   :  { %3476 = vmatpush1.bf16.msra.mxu0 %v6726_v11  ;;  %v6756_v11 = vld [vmem:[%s10114_s4 + $0x570] ss:$8 sps:$4 sm:$0xff]  }
 0x251   :  { %3477 = vmatprep.subr.bf16.mxu0 %v6731_v8  ;;  %v6759_v8 = vld [vmem:[%s10114_s4 + $0x580] ss:$8 sps:$4 sm:$0xff]   ;;  %4398 = vmatpush1.bf16.msra.mxu1 %v6810_v35 }
 0x254   :  { %3478 = vmatpush1.bf16.msra.mxu0 %v6729_v1  ;;  %v6770_v1 = vld [vmem:[%s10114_s4 + $0x5b4] ss:$8 sps:$4 sm:$0xff]  }
 0x255   :  { %3479 = vmatprep.subr.bf16.mxu0 %v6734_v38  ;;  %v6773_v38 = vld [vmem:[%s10114_s4 + $0x5c4] ss:$8 sps:$4 sm:$0xff]  }
 0x258   :  { %3480 = vmatpush1.bf16.msra.mxu0 %v6732_v14  ;;  %v6771_v14 = vld [vmem:[%s10114_s4 + $0x5c0] ss:$8 sps:$4 sm:$0xff]  }
 0x259   :  { %3522 = vmatprep.subr.bf16.mxu0 %v6737_v4  ;;  %v6776_v4 = vld [vmem:[%s10114_s4 + $0x5d4] ss:$8 sps:$4 sm:$0xff]  }
 0x25b   :  { %3482 = vmatmul.mubr.bf16.vlgmr.msra.gmra.mrb[32].mxu0 %v10207_v32  ;;  %v6780_v32 = vld [vmem:[%s10114_s4 + $0x5f0] ss:$8 sps:$4 sm:$0xff]  }
 0x25c   :  { %3491 = vmatprep.mubr.bf16.mxu0 %v10210_v57  ;;  %3523 = vmatpush1.bf16.msra.mxu0 %v6735_v29  ;;  %v6774_v29 = vld [vmem:[%s10114_s4 + $0x5d0] ss:$8 sps:$4 sm:$0xff]   ;;  %v10228_v57 = vpack.c.bf16 %v10226_v17, %v10227_v52 }
 0x25d   :  { %3524 = vmatprep.subr.bf16.mxu0 %v6740_v54  ;;  %v6779_v54 = vld [vmem:[%s10114_s4 + $0x5e4] ss:$8 sps:$4 sm:$0xff]  }
 0x260   :  { %3525 = vmatpush1.bf16.msra.mxu0 %v6738_v55  ;;  %v10229_v55 = vpack.c.bf16 %v8895_v41, %v8776_v30  ;;  %v6815_v30 = vld [vmem:[%s10117_s7 + $0xa4] ss:$8 sps:$4 sm:$0xff]   ;;  %v6816_v41 = vld [vmem:[%s10117_s7 + $0xb0] ss:$8 sps:$4 sm:$0xff]  }
 0x261   :  { %3526 = vmatprep.subr.bf16.mxu0 %v6743_v24  ;;  %4399 = vmatprep.subr.bf16.mxu1 %v6815_v30  ;;  %v3595_v24 = vld [vmem:[%s10118_s5] sm:$0x3] }
 0x262   :  { %4400 = vmatpush1.bf16.msra.mxu1 %v6813_v59 }
 0x263   :  { %3492 = vmatmul.mubr.bf16.gmra.mrb[36].mxu0 %v10213_v3  ;;  %4401 = vmatprep.subr.bf16.mxu1 %v6818_v18  ;;  %v9485_v3 = vrot.slane %v3595_v24, %v10231_v12 }
 0x264   :  { %3501 = vmatprep.mubr.bf16.mxu0 %v10216_v46  ;;  %3527 = vmatpush1.bf16.msra.mxu0 %v6741_v58  ;;  %v3623_v58 = vld [vmem:[%s10119_s6] sm:$0x3] }
 0x265   :  { %3528 = vmatprep.subr.bf16.mxu0 %v6746_v16  ;;  %v10230_v16 = vld [vmem:[#allocation2_spill] sm:$0xff]  ;;  %v9491_v46 = vrot.slane %v3623_v58, %v10231_v12 }
 0x266   :  { %4402 = vmatpush1.bf16.msra.mxu1 %v6816_v41  ;;  %v9482_v47 = vrot.slane %v3595_v24, %v10230_v16  ;;  %v9488_v50 = vrot.slane %v3623_v58, %v10230_v16 }
 0x267   :  { %4403 = vmatprep.subr.bf16.mxu1 %v6821_v62 }
 0x268   :  { %3529 = vmatpush1.bf16.msra.mxu0 %v6744_v39 }
 0x269   :  { %3530 = vmatprep.subr.bf16.mxu0 %v6749_v27 }
 0x26a   :  { %4404 = vmatpush1.bf16.msra.mxu1 %v6819_v23 }
 0x26b   :  { %3502 = vmatmul.mubr.bf16.gmra.mrb[40].mxu0 %v10219_v10 }
 0x26c   :  { %3511 = vmatprep.mubr.bf16.mxu0 %v10222_v9  ;;  %3531 = vmatpush1.bf16.msra.mxu0 %v6747_v7 }
 0x26d   :  { %3532 = vmatprep.subr.bf16.mxu0 %v6752_v22 }
 0x270   :  { %3533 = vmatpush1.bf16.msra.mxu0 %v6750_v15 }
 0x271   :  { %3534 = vmatprep.subr.bf16.mxu0 %v6755_v19 }
 0x273   :  { %3512 = vmatmul.mubr.bf16.gmra.mrb[44].mxu0 %v10225_v36 }
 0x274   :  { %3535 = vmatpush1.bf16.msra.mxu0 %v6753_v25  ;;  %3554 = vmatprep.mubr.bf16.mxu0 %v6050_v56  ;;  %v6767_v56 = vld [vmem:[%s10114_s4 + $0x5a4] ss:$8 sps:$4 sm:$0xff]  }
 0x275   :  { %3536 = vmatprep.subr.bf16.mxu0 %v6758_v20 }
 0x278   :  { %3537 = vmatpush1.bf16.msra.mxu0 %v6756_v11 }
 0x279   :  { %3538 = vmatprep.subr.bf16.mxu0 %v6761_v42 }
 0x27c   :  { %3539 = vmatpush1.bf16.msra.mxu0 %v6759_v8 }
 0x27d   :  { %3540 = vmatprep.subr.bf16.mxu0 %v6764_v5 }
 0x280   :  { %3541 = vmatpush1.bf16.msra.mxu0 %v6762_v61 }
 0x281   :  { %3542 = vmatprep.subr.bf16.mxu0 %v6767_v56 }
 0x284   :  { %3543 = vmatpush1.bf16.msra.mxu0 %v6765_v49 }
 0x285   :  { %3544 = vmatprep.subr.bf16.mxu0 %v6770_v1 }
 0x288   :  { %3545 = vmatpush1.bf16.msra.mxu0 %v6768_v45 }
 0x289   :  { %3546 = vmatprep.subr.bf16.mxu0 %v6773_v38 }
 0x28c   :  { %3547 = vmatpush1.bf16.msra.mxu0 %v6771_v14 }
 0x28d   :  { %3548 = vmatprep.subr.bf16.mxu0 %v6776_v4 }
 0x290   :  { %3549 = vmatpush1.bf16.msra.mxu0 %v6774_v29 }
 0x291   :  { %3550 = vmatprep.subr.bf16.mxu0 %v6779_v54 }
 0x294   :  { %3551 = vmatpush1.bf16.msra.mxu0 %v6777_v43 }
 0x295   :  { %3552 = vmatprep.subr.bf16.mxu0 %v6782_v13 }
 0x298   :  { %3553 = vmatpush1.bf16.msra.mxu0 %v6780_v32 }
 0x29b   :  { %3555 = vmatmul.mubr.bf16.vlgmr.msra.gmra.mrb[32].mxu0 %v10228_v57 }
 0x29c   :  { %3564 = vmatprep.mubr.bf16.mxu0 %v6054_v28  ;;  %v6824_v28 = vld [vmem:[%s10117_s7 + $0xd4] ss:$8 sps:$4 sm:$0xff]  }
 0x29d   :  { %4405 = vmatprep.subr.bf16.mxu1 %v6824_v28 }
 0x2a3   :  { %3565 = vmatmul.mubr.bf16.gmra.mrb[36].mxu0 %v6053_v6  ;;  %v6822_v6 = vld [vmem:[%s10117_s7 + $0xd0] ss:$8 sps:$4 sm:$0xff]  }
 0x2a4   :  { %3574 = vmatprep.mubr.bf16.mxu0 %v6058_v60  ;;  %v6827_v60 = vld [vmem:[%s10117_s7 + $0xe4] ss:$8 sps:$4 sm:$0xff]   ;;  %4406 = vmatpush1.bf16.msra.mxu1 %v6822_v6 }
 0x2a5   :  { %4407 = vmatprep.subr.bf16.mxu1 %v6827_v60 }
 0x2a8   :  { %4408 = vmatpush1.bf16.msra.mxu1 %v6825_v2 }
 0x2a9   :  { %4409 = vmatprep.subr.bf16.mxu1 %v6830_v33 }
 0x2ab   :  { %3575 = vmatmul.mubr.bf16.gmra.mrb[40].mxu0 %v10229_v55 }
 0x2ac   :  { %3584 = vmatprep.mubr.bf16.mxu0 %v6062_v48  ;;  %v6833_v48 = vld [vmem:[%s10117_s7 + $0x104] ss:$8 sps:$4 sm:$0xff]  }
 0x2b3   :  { %3585 = vmatmul.mubr.bf16.gmra.mrb[44].mxu0 %v6061_v53  ;;  %v6828_v53 = vld [vmem:[%s10117_s7 + $0xf0] ss:$8 sps:$4 sm:$0xff]  }
 0x2b4   :  { %4410 = vmatpush1.bf16.msra.mxu1 %v6828_v53 }
 0x2b5   :  { %4432 = vmatprep.subr.bf16.mxu1 %v6833_v48 }
 0x36e   :  { %v3556_v40 = vpop.f32.mrb[32].mxu0 }
 0x36f   :  { %v3607_v39 = vmul.f32 %v9482_v47, %v3556_v40  ;;  %v3558_v27 = vpop.f32.mrb[33].mxu0 }
 0x370   :  { %v3608_v7 = vmul.f32 %v9485_v3, %v3558_v27  ;;  %v3560_v22 = vpop.f32.mrb[34].mxu0 }
 0x371   :  { %v9496_v51 = vadd.f32 %v9488_v50, %v3607_v39  ;;  %v3609_v44 = vmul.f32 %v9482_v47, %v3560_v22  ;;  %v3562_v10 = vpop.f32.mrb[35].mxu0 }
 0x372   :  { %v9500_v26 = vadd.f32 %v9491_v46, %v3608_v7  ;;  %v3610_v21 = vmul.f32 %v9485_v3, %v3562_v10 }
 0x373   :  { %v3667_v9 = vmin.f32 %v9496_v51, 0.0  ;;  %v9505_v15 = vadd.f32 %v9488_v50, %v3609_v44  ;;  %vm3651_vm0 = vcmp.gt.f32.partialorder %v9496_v51, 0.0 }
 0x374   :  { %v3668_v19 = vmin.f32 %v9500_v26, 0.0  ;;  %v9509_v25 = vadd.f32 %v9491_v46, %v3610_v21  ;;  %vm3652_vm1 = vcmp.gt.f32.partialorder %v9500_v26, 0.0 }
 0x375   :  { %v3683_v20 = vmul.f32 1.442695, %v3667_v9  ;;  %v3669_v37 = vmin.f32 %v9505_v15, 0.0  ;;  %vm3653_vm2 = vcmp.gt.f32.partialorder %v9505_v15, 0.0 }
 0x376   :  { %v3670_v34 = vmin.f32 %v9509_v25, 0.0  ;;  %v3566_v36 = vpop.f32.mrb[36].mxu0  ;;  %v3685_v11 = vmul.f32 1.442695, %v3668_v19  ;;  %vm3654_vm3 = vcmp.gt.f32.partialorder %v9509_v25, 0.0 }
 0x377   :  { %7119 = vpow2.f32 %v3683_v20  ;;  %v3687_v42 = vmul.f32 1.442695, %v3669_v37  ;;  %v3611_v8 = vmul.f32 %v9482_v47, %v3566_v36  ;;  %v3568_v5 = vpop.f32.mrb[37].mxu0 }
 0x378   :  { %v3689_v61 = vmul.f32 1.442695, %v3670_v34  ;;  %v3612_v56 = vmul.f32 %v9485_v3, %v3568_v5  ;;  %v3570_v49 = vpop.f32.mrb[38].mxu0 }
 0x379   :  { %7121 = vpow2.f32 %v3687_v42  ;;  %v9516_v1 = vadd.f32 %v9488_v50, %v3611_v8  ;;  %v3613_v45 = vmul.f32 %v9482_v47, %v3570_v49  ;;  %v3572_v38 = vpop.f32.mrb[39].mxu0 }
 0x37a   :  { %7123 = vpow2.f32 %v3689_v61  ;;  %v9520_v14 = vadd.f32 %v9491_v46, %v3612_v56  ;;  %v3614_v4 = vmul.f32 %v9485_v3, %v3572_v38 }
 0x37b   :  { %7125 = vpow2.f32 %v3685_v11  ;;  %v3671_v29 = vmin.f32 %v9516_v1, 0.0  ;;  %v9525_v54 = vadd.f32 %v9488_v50, %v3613_v45  ;;  %vm3655_vm4 = vcmp.gt.f32.partialorder %v9516_v1, 0.0 }
 0x37c   :  { %v3672_v43 = vmin.f32 %v9520_v14, 0.0  ;;  %v9529_v13 = vadd.f32 %v9491_v46, %v3614_v4  ;;  %vm3656_vm6 = vcmp.gt.f32.partialorder %v9520_v14, 0.0 }
 0x37d   :  { %v3691_v32 = vmul.f32 1.442695, %v3671_v29  ;;  %v3673_v17 = vmin.f32 %v9525_v54, 0.0  ;;  %vm3657_vm7 = vcmp.gt.f32.partialorder %v9525_v54, 0.0 }
 0x37e   :  { %v3693_v52 = vmul.f32 1.442695, %v3672_v43  ;;  %v3674_v57 = vmin.f32 %v9529_v13, 0.0  ;;  %v3576_v55 = vpop.f32.mrb[40].mxu0  ;;  %vm3658_vm5 = vcmp.gt.f32.partialorder %v9529_v13, 0.0 }
 0x37f   :  { %7127 = vpow2.f32 %v3691_v32  ;;  %v3695_v31 = vmul.f32 1.442695, %v3673_v17  ;;  %v3615_v0 = vmul.f32 %v9482_v47, %v3576_v55  ;;  %v3578_v35 = vpop.f32.mrb[41].mxu0 }
 0x380   :  { %v3697_v63 = vmul.f32 1.442695, %v3674_v57  ;;  %v3616_v30 = vmul.f32 %v9485_v3, %v3578_v35  ;;  %v3580_v59 = vpop.f32.mrb[42].mxu0  ;;  %7129 = vpow2.f32 %v3693_v52 }
 0x381   :  { %v7120_v18 = vpop.eup %7119  ;;  %v9536_v41 = vadd.f32 %v9488_v50, %v3615_v0  ;;  %v3617_v62 = vmul.f32 %v9482_v47, %v3580_v59  ;;  %v3582_v23 = vpop.f32.mrb[43].mxu0 }
 0x382   :  { %v5814_v28 = vadd.f32 -1.0, %v7120_v18  ;;  %7131 = vpow2.f32 %v3697_v63  ;;  %v9540_v6 = vadd.f32 %v9491_v46, %v3616_v30  ;;  %v3618_v60 = vmul.f32 %v9485_v3, %v3582_v23 }
 0x383   :  { %v7122_v2 = vpop.eup %7121  ;;  %7133 = vpow2.f32 %v3695_v31  ;;  %v3675_v33 = vmin.f32 %v9536_v41, 0.0  ;;  %v9545_v53 = vadd.f32 %v9488_v50, %v3617_v62  ;;  %vm3659_vm10 = vcmp.gt.f32.partialorder %v9536_v41, 0.0 }
 0x384   :  { %v7124_v48 = vpop.eup %7123  ;;  %v5816_v24 = vadd.f32 -1.0, %v7122_v2  ;;  %v3676_v40 = vmin.f32 %v9540_v6, 0.0  ;;  %v9554_v39 = vsel %vm3651_vm0, %v9496_v51, %v5814_v28  ;;  %v9561_v22 = vadd.f32 %v9491_v46, %v3618_v60  ;;  %v10232_v2 = vld [vmem:[#allocation4_spill] sm:$0xff] }
 0x385   :  { %v7126_v58 = vpop.eup %7125  ;;  %v3677_v7 = vmin.f32 %v9545_v53, 0.0  ;;  %v5817_v21 = vadd.f32 -1.0, %v7124_v48  ;;  %v3699_v9 = vmul.f32 1.442695, %v3675_v33  ;;  %v6831_v48 = vld [vmem:[%s10117_s7 + $0x100] ss:$8 sps:$4 sm:$0xff]  }
 0x386   :  { %v9557_v27 = vsel %vm3653_vm2, %v9505_v15, %v5816_v24  ;;  %v3586_v44 = vpop.f32.mrb[44].mxu0  ;;  %v5815_v37 = vadd.f32 -1.0, %v7126_v58  ;;  %v3678_v15 = vmin.f32 %v9561_v22, 0.0  ;;  %v3701_v11 = vmul.f32 1.442695, %v3676_v40 }
 0x387   :  { %v3747_v10 = vpack.c.bf16 %v9557_v27, %v9554_v39  ;;  %v3619_v19 = vmul.f32 %v9482_v47, %v3586_v44  ;;  %v3588_v20 = vpop.f32.mrb[45].mxu0  ;;  %v3703_v51 = vmul.f32 1.442695, %v3677_v7  ;;  %v9578_v4 = vsel %vm3654_vm3, %v9509_v25, %v5817_v21  ;;  %v6836_v40 = vld [vmem:[%s10117_s7 + $0x114] ss:$8 sps:$4 sm:$0xff]  }
 0x388   :  { %v3590_v34 = vpop.f32.mrb[46].mxu0  ;;  %v3620_v8 = vmul.f32 %v9485_v3, %v3588_v20  ;;  %v3705_v49 = vmul.f32 1.442695, %v3678_v15  ;;  %vm3661_vm8 = vcmp.gt.f32.partialorder %v9545_v53, 0.0  ;;  %vm3662_vm9 = vcmp.gt.f32.partialorder %v9561_v22, 0.0 }
 0x389   :  { %v7128_v36 = vpop.eup %7127  ;;  %v9570_v42 = vadd.f32 %v9488_v50, %v3619_v19  ;;  %v3621_v5 = vmul.f32 %v9482_v47, %v3590_v34  ;;  %v3592_v61 = vpop.f32.mrb[47].mxu0  ;;  %7135 = vpow2.f32 %v3703_v51  ;;  %v3765_v31 = vunpack.c.h.b16 %v3747_v10 }
 0x38a   :  { %v5818_v56 = vadd.f32 -1.0, %v7128_v36  ;;  %v3622_v45 = vmul.f32 %v9485_v3, %v3592_v61  ;;  %v7130_v38 = vpop.eup %7129  ;;  %7137 = vpow2.f32 %v3699_v9  ;;  %v9582_v43 = vadd.f32 %v9491_v46, %v3620_v8  ;;  %v6834_v9 = vld [vmem:[%s10117_s7 + $0x110] ss:$8 sps:$4 sm:$0xff]   ;;  %v6837_v61 = vld [vmem:[%s10117_s7 + $0x120] ss:$8 sps:$4 sm:$0xff]  }
 0x38b   :  { %v3679_v29 = vmin.f32 %v9570_v42, 0.0  ;;  %7139 = vpow2.f32 %v3705_v49  ;;  %v9590_v3 = vadd.f32 %v9488_v50, %v3621_v5  ;;  %v5819_v62 = vadd.f32 -1.0, %v7130_v38 }
 0x38c   :  { %v7132_v32 = vpop.eup %7131  ;;  %v9587_v47 = vsel %vm3655_vm4, %v9516_v1, %v5818_v56  ;;  %v9593_v17 = vadd.f32 %v9491_v46, %v3622_v45  ;;  %7141 = vpow2.f32 %v3701_v11  ;;  %v3680_v55 = vmin.f32 %v9582_v43, 0.0 }
 0x38d   :  { %v7134_v25 = vpop.eup %7133  ;;  %v6065_v52 = vpack.c.bf16 %v9587_v47, %v9554_v39  ;;  %v3707_v57 = vmul.f32 1.442695, %v3679_v29  ;;  %v9601_v1 = vsel %vm3652_vm1, %v9500_v26, %v5815_v37  ;;  %v3681_v50 = vmin.f32 %v9590_v3, 0.0  ;;  %v6839_v37 = vld [vmem:[%s10117_s7 + $0x124] ss:$8 sps:$4 sm:$0xff]  }
 0x38e   :  { %v3682_v0 = vmin.f32 %v9593_v17, 0.0  ;;  %v3709_v46 = vmul.f32 1.442695, %v3680_v55  ;;  %v3748_v35 = vpack.c.bf16 %v9578_v4, %v9601_v1  ;;  %v5821_v63 = vadd.f32 -1.0, %v7132_v32  ;;  %v6840_v55 = vld [vmem:[%s10117_s7 + $0x130] ss:$8 sps:$4 sm:$0xff]  }
 0x38f   :  { %7143 = vpow2.f32 %v3707_v57  ;;  %v3711_v30 = vmul.f32 1.442695, %v3681_v50  ;;  %v5820_v18 = vadd.f32 -1.0, %v7134_v25  ;;  %v3736_v60 = vsel %vm3656_vm6, %v9520_v14, %v5819_v62  ;;  %v6855_v62 = vld [vmem:[%s10117_s7 + $0x180] ss:$8 sps:$4 sm:$0xff]  }
 0x390   :  { %v3713_v59 = vmul.f32 1.442695, %v3682_v0  ;;  %7145 = vpow2.f32 %v3709_v46  ;;  %v3766_v26 = vunpack.c.h.b16 %v3748_v35  ;;  %v9611_v23 = vsel %vm3658_vm5, %v9529_v13, %v5821_v63  ;;  %v6848_v46 = vld [vmem:[%s10117_s7 + $0x154] ss:$8 sps:$4 sm:$0xff]   ;;  %v6851_v35 = vld [vmem:[%s10117_s7 + $0x164] ss:$8 sps:$4 sm:$0xff]  }
 0x391   :  { %7147 = vpow2.f32 %v3711_v30  ;;  %v9614_v28 = vsel %vm3657_vm7, %v9525_v54, %v5820_v18  ;;  %v6066_v13 = vpack.c.bf16 %v3736_v60, %v9601_v1  ;;  %v3779_v54 = vpack.c.b16 %v3765_v31, %v10232_v2  ;;  %v6849_v63 = vld [vmem:[%s10117_s7 + $0x160] ss:$8 sps:$4 sm:$0xff]   ;;  %v6854_v30 = vld [vmem:[%s10117_s7 + $0x174] ss:$8 sps:$4 sm:$0xff]   ;;  %v6857_v18 = vld [vmem:[%s10117_s7 + $0x184] ss:$8 sps:$4 sm:$0xff]  }
 0x392   :  { %7149 = vpow2.f32 %v3713_v59  ;;  %v3780_v33 = vpack.c.b16 %v3766_v26, %v10232_v2  ;;  %v6069_v24 = vpack.c.bf16 %v9614_v28, %v9557_v27  ;;  %v6070_v14 = vpack.c.bf16 %v9611_v23, %v9578_v4  ;;  %v6852_v59 = vld [vmem:[%s10117_s7 + $0x170] ss:$8 sps:$4 sm:$0xff]   ;;  %v6860_v26 = vld [vmem:[%s10117_s7 + $0x194] ss:$8 sps:$4 sm:$0xff]   ;;  %v6929_v27 = vld [vmem:[%s10120_s10 + $0x48] sm:$0xff]  }
 0x393   :  { %v7136_v58 = vpop.eup %7135  ;;  %vm3663_vm11 = vcmp.gt.f32.partialorder %v9570_v42, 0.0  ;;  %vm3660_vm12 = vcmp.gt.f32.partialorder %v9540_v6, 0.0  ;;  %vm3664_vm13 = vcmp.gt.f32.partialorder %v9582_v43, 0.0  ;;  %vm3665_vm14 = vcmp.gt.f32.partialorder %v9590_v3, 0.0  ;;  %v6858_v60 = vld [vmem:[%s10117_s7 + $0x190] ss:$8 sps:$4 sm:$0xff]  }
 0x394   :  { %v7138_v7 = vpop.eup %7137  ;;  %4411 = vmatprep.mubr.bf16.mxu1 %v3780_v33  ;;  %v5824_v44 = vadd.f32 -1.0, %v7136_v58  ;;  %vm3666_vm15 = vcmp.gt.f32.partialorder %v9593_v17, 0.0  ;;  %v6863_v33 = vld [vmem:[%s10117_s7 + $0x1a4] ss:$8 sps:$4 sm:$0xff]   ;;  %v6864_v58 = vld [vmem:[%s10117_s7 + $0x1b0] ss:$8 sps:$4 sm:$0xff]  }
 0x395   :  { %v7140_v10 = vpop.eup %7139  ;;  %4412 = vmatmul.mubr.bf16.vlgmr.msra.gmra.mrb[64].mxu1 %v3779_v54  ;;  %v5822_v15 = vadd.f32 -1.0, %v7138_v7  ;;  %v6869_v54 = vld [vmem:[%s10117_s7 + $0x1c4] ss:$8 sps:$4 sm:$0xff]   ;;  %v6872_v7 = vld [vmem:[%s10117_s7 + $0x1d4] ss:$8 sps:$4 sm:$0xff]  }
 0x396   :  { %v7142_v21 = vpop.eup %7141  ;;  %4433 = vmatpush1.bf16.msra.mxu1 %v6831_v48  ;;  %v5825_v19 = vadd.f32 -1.0, %v7140_v10  ;;  %v9637_v20 = vsel %vm3661_vm8, %v9545_v53, %v5824_v44  ;;  %v6861_v48 = vld [vmem:[%s10117_s7 + $0x1a0] ss:$8 sps:$4 sm:$0xff]   ;;  %v6870_v44 = vld [vmem:[%s10117_s7 + $0x1d0] ss:$8 sps:$4 sm:$0xff]  }
 0x397   :  { %4434 = vmatprep.subr.bf16.mxu1 %v6836_v40  ;;  %v6063_v51 = vpack.c.bf16 %v9637_v20, %v9614_v28  ;;  %v5823_v53 = vadd.f32 -1.0, %v7142_v21  ;;  %v9659_v45 = vsel %vm3659_vm10, %v9536_v41, %v5822_v15  ;;  %v6867_v40 = vld [vmem:[%s10117_s7 + $0x1c0] ss:$8 sps:$4 sm:$0xff]   ;;  %v6875_v10 = vld [vmem:[%s10117_s7 + $0x1e4] ss:$8 sps:$4 sm:$0xff]  }
 0x398   :  { %v9646_v36 = vsel %vm3662_vm9, %v9561_v22, %v5825_v19  ;;  %v6842_v22 = vld [vmem:[%s10117_s7 + $0x134] ss:$8 sps:$4 sm:$0xff]   ;;  %v6873_v21 = vld [vmem:[%s10117_s7 + $0x1e0] ss:$8 sps:$4 sm:$0xff]   ;;  %v6876_v19 = vld [vmem:[%s10117_s7 + $0x1f0] ss:$8 sps:$4 sm:$0xff]  }
 0x399   :  { %v7144_v34 = vpop.eup %7143  ;;  %v6064_v11 = vpack.c.bf16 %v9646_v36, %v9611_v23  ;;  %v9670_v57 = vsel %vm3660_vm12, %v9540_v6, %v5823_v53  ;;  %v6845_v6 = vld [vmem:[%s10117_s7 + $0x144] ss:$8 sps:$4 sm:$0xff]   ;;  %v6884_v15 = vld [vmem:[%s10117_s7 + $0x214] ss:$8 sps:$4 sm:$0xff]   ;;  %v6885_v53 = vld [vmem:[%s10117_s7 + $0x220] ss:$8 sps:$4 sm:$0xff]  }
 0x39a   :  { %v5826_v8 = vadd.f32 -1.0, %v7144_v34  ;;  %v7146_v5 = vpop.eup %7145  ;;  %4435 = vmatpush1.bf16.msra.mxu1 %v6834_v9  ;;  %v6878_v9 = vld [vmem:[%s10117_s7 + $0x1f4] ss:$8 sps:$4 sm:$0xff]   ;;  %v6882_v34 = vld [vmem:[%s10117_s7 + $0x210] ss:$8 sps:$4 sm:$0xff]   ;;  %v6930_v28 = vld [vmem:[%s10120_s10 + $0x8] sm:$0xff]  }
 0x39b   :  { %v7148_v56 = vpop.eup %7147  ;;  %4436 = vmatprep.subr.bf16.mxu1 %v6839_v37  ;;  %4421 = vmatprep.mubr.bf16.mxu1 %v6064_v11  ;;  %v5827_v49 = vadd.f32 -1.0, %v7146_v5  ;;  %v6881_v37 = vld [vmem:[%s10117_s7 + $0x204] ss:$8 sps:$4 sm:$0xff]   ;;  %v6890_v39 = vld [vmem:[%s10117_s7 + $0x234] ss:$8 sps:$4 sm:$0xff]  }
 0x39c   :  { %v9662_v38 = vsel %vm3663_vm11, %v9570_v42, %v5826_v8  ;;  %v7150_v29 = vpop.eup %7149  ;;  %v5828_v25 = vadd.f32 -1.0, %v7148_v56  ;;  %v6887_v11 = vld [vmem:[%s10117_s7 + $0x224] ss:$8 sps:$4 sm:$0xff]   ;;  %v6888_v47 = vld [vmem:[%s10117_s7 + $0x230] ss:$8 sps:$4 sm:$0xff]   ;;  %vm5388_vm11 = vcmask 523264  }
 0x39d   :  { %v6067_v32 = vpack.c.bf16 %v9662_v38, %v9659_v45  ;;  %4422 = vmatmul.mubr.bf16.gmra.mrb[68].mxu1 %v6063_v51  ;;  %v9673_v41 = vsel %vm3664_vm13, %v9582_v43, %v5827_v49  ;;  %v5829_v42 = vadd.f32 -1.0, %v7150_v29  ;;  %v6879_v51 = vld [vmem:[%s10117_s7 + $0x200] ss:$8 sps:$4 sm:$0xff]   ;;  %v6896_v4 = vld [vmem:[%s10117_s7 + $0x254] ss:$8 sps:$4 sm:$0xff]  }
 0x39e   :  { %4437 = vmatpush1.bf16.msra.mxu1 %v6837_v61  ;;  %4464 = vmatprep.mubr.bf16.mxu1 %v6066_v13  ;;  %v6068_v1 = vpack.c.bf16 %v9673_v41, %v9670_v57  ;;  %v9682_v31 = vsel %vm3665_vm14, %v9590_v3, %v5828_v25  ;;  %v6843_v3 = vld [vmem:[%s10117_s7 + $0x140] ss:$8 sps:$4 sm:$0xff]   ;;  %v6866_v13 = vld [vmem:[%s10117_s7 + $0x1b4] ss:$8 sps:$4 sm:$0xff]   ;;  %v6894_v23 = vld [vmem:[%s10117_s7 + $0x250] ss:$8 sps:$4 sm:$0xff]  }
 0x39f   :  { %4438 = vmatprep.subr.bf16.mxu1 %v6842_v22  ;;  %v9688_v43 = vsel %vm3666_vm15, %v9593_v17, %v5829_v42  ;;  %v6071_v50 = vpack.c.bf16 %v9682_v31, %v9637_v20  ;;  %v6846_v17 = vld [vmem:[%s10117_s7 + $0x150] ss:$8 sps:$4 sm:$0xff]   ;;  %v6891_v8 = vld [vmem:[%s10117_s7 + $0x240] ss:$8 sps:$4 sm:$0xff]   ;;  %v6902_v61 = vld [vmem:[%s10117_s7 + $0x274] ss:$8 sps:$4 sm:$0xff]  }
 0x3a0   :  { %v6072_v0 = vpack.c.bf16 %v9688_v43, %v9646_v36  ;;  %v6897_v5 = vld [vmem:[%s10117_s7 + $0x260] ss:$8 sps:$4 sm:$0xff]   ;;  %v6900_v56 = vld [vmem:[%s10117_s7 + $0x270] ss:$8 sps:$4 sm:$0xff]   ;;  %v6905_v22 = vld [vmem:[%s10117_s7 + $0x284] ss:$8 sps:$4 sm:$0xff]  }
 0x3a1   :  { %v6903_v49 = vld [vmem:[%s10117_s7 + $0x280] ss:$8 sps:$4 sm:$0xff]   ;;  %v6908_v45 = vld [vmem:[%s10117_s7 + $0x294] ss:$8 sps:$4 sm:$0xff]   ;;  %v6906_v38 = vld [vmem:[%s10117_s7 + $0x290] ss:$8 sps:$4 sm:$0xff]  }
 0x3a2   :  { %4439 = vmatpush1.bf16.msra.mxu1 %v6840_v55  ;;  %v6911_v29 = vld [vmem:[%s10117_s7 + $0x2a4] ss:$8 sps:$4 sm:$0xff]   ;;  %v6914_v25 = vld [vmem:[%s10117_s7 + $0x2b4] ss:$8 sps:$4 sm:$0xff]   ;;  %v6912_v57 = vld [vmem:[%s10117_s7 + $0x2b0] ss:$8 sps:$4 sm:$0xff]  }
 0x3a3   :  { %4440 = vmatprep.subr.bf16.mxu1 %v6845_v6  ;;  %v6917_v41 = vld [vmem:[%s10117_s7 + $0x2c4] ss:$8 sps:$4 sm:$0xff]   ;;  %v6915_v42 = vld [vmem:[%s10117_s7 + $0x2c0] ss:$8 sps:$4 sm:$0xff]   ;;  %v6920_v55 = vld [vmem:[%s10117_s7 + $0x2d4] ss:$8 sps:$4 sm:$0xff]  }
 0x3a4   :  { %v6923_v6 = vld [vmem:[%s10117_s7 + $0x2e4] ss:$8 sps:$4 sm:$0xff]   ;;  %v6932_v20 = vld [vmem:[%s10120_s10 + $0x10] sm:$0xff]   ;;  %v6933_v36 = vld [vmem:[%s10120_s10 + $0x58] sm:$0xff]  }
 0x3a5   :  { %v6934_v31 = vld [vmem:[%s10120_s10 + $0x18] sm:$0xff]   ;;  %v6935_v43 = vld [vmem:[%s10120_s10 + $0x60] sm:$0xff]  }
 0x3a6   :  { %4441 = vmatpush1.bf16.msra.mxu1 %v6843_v3  ;;  %v6921_v3 = vld [vmem:[%s10117_s7 + $0x2e0] ss:$8 sps:$4 sm:$0xff]  }
 0x3a7   :  { %4442 = vmatprep.subr.bf16.mxu1 %v6848_v46  ;;  %v6926_v46 = vld [vmem:[%s10117_s7 + $0x2f4] ss:$8 sps:$4 sm:$0xff]  }
 0x3aa   :  { %4443 = vmatpush1.bf16.msra.mxu1 %v6846_v17  ;;  %v6924_v17 = vld [vmem:[%s10117_s7 + $0x2f0] ss:$8 sps:$4 sm:$0xff]  }
 0x3ab   :  { %4444 = vmatprep.subr.bf16.mxu1 %v6851_v35  ;;  %v6927_v35 = vld [vmem:[%s10120_s10 + $0x40] sm:$0xff]  }
 0x3ae   :  { %4445 = vmatpush1.bf16.msra.mxu1 %v6849_v63  ;;  %v6928_v63 = vld [vmem:[%s10120_s10] sm:$0xff]  }
 0x3af   :  { %4446 = vmatprep.subr.bf16.mxu1 %v6854_v30  ;;  %v6938_v30 = vld [vmem:[%s10120_s10 + $0x28] sm:$0xff]  }
 0x3b2   :  { %4447 = vmatpush1.bf16.msra.mxu1 %v6852_v59  ;;  %v6939_v59 = vld [vmem:[%s10120_s10 + $0x70] sm:$0xff]  }
 0x3b3   :  { %4448 = vmatprep.subr.bf16.mxu1 %v6857_v18  ;;  %v6940_v18 = vld [vmem:[%s10120_s10 + $0x30] sm:$0xff]  }
 0x3b6   :  { %4449 = vmatpush1.bf16.msra.mxu1 %v6855_v62  ;;  %v6941_v62 = vld [vmem:[%s10120_s10 + $0x78] sm:$0xff]  }
 0x3b7   :  { %4450 = vmatprep.subr.bf16.mxu1 %v6860_v26  ;;  %v6942_v26 = vld [vmem:[%s10120_s10 + $0x38] sm:$0xff]  }
 0x3ba   :  { %4451 = vmatpush1.bf16.msra.mxu1 %v6858_v60  ;;  %v6943_v60 = vld [vmem:[%s10120_s10 + $0xc0] sm:$0xff]  }
 0x3bb   :  { %4452 = vmatprep.subr.bf16.mxu1 %v6863_v33  ;;  %v4538_v33 = vld [vmem:[%s10121_s8] sm:$0x3] }
 0x3be   :  { %4453 = vmatpush1.bf16.msra.mxu1 %v6861_v48  ;;  %v4558_v48 = vld [vmem:[%s10122_s9] sm:$0x3] }
 0x3bf   :  { %4454 = vmatprep.subr.bf16.mxu1 %v6866_v13  ;;  %v4543_v13 = vrot.slane %v4538_v33, %v10230_v16 }
 0x3c2   :  { %4455 = vmatpush1.bf16.msra.mxu1 %v6864_v58  ;;  %v4547_v58 = vrot.slane %v4538_v33, %v10231_v12 }
 0x3c3   :  { %4456 = vmatprep.subr.bf16.mxu1 %v6869_v54  ;;  %v4563_v54 = vrot.slane %v4558_v48, %v10230_v16 }
 0x3c6   :  { %4457 = vmatpush1.bf16.msra.mxu1 %v6867_v40 }
 0x3c7   :  { %4458 = vmatprep.subr.bf16.mxu1 %v6872_v7  ;;  %v4567_v7 = vrot.slane %v4558_v48, %v10231_v12 }
 0x3ca   :  { %4459 = vmatpush1.bf16.msra.mxu1 %v6870_v44 }
 0x3cb   :  { %4460 = vmatprep.subr.bf16.mxu1 %v6875_v10 }
 0x3ce   :  { %4461 = vmatpush1.bf16.msra.mxu1 %v6873_v21 }
 0x3cf   :  { %4462 = vmatprep.subr.bf16.mxu1 %v6878_v9 }
 0x3d2   :  { %4463 = vmatpush1.bf16.msra.mxu1 %v6876_v19 }
 0x3d3   :  { %4485 = vmatprep.subr.bf16.mxu1 %v6881_v37 }
 0x3d5   :  { %4465 = vmatmul.mubr.bf16.vlgmr.msra.gmra.mrb[64].mxu1 %v6065_v52  ;;  %v6893_v52 = vld [vmem:[%s10117_s7 + $0x244] ss:$8 sps:$4 sm:$0xff]  }
 0x3d6   :  { %4474 = vmatprep.mubr.bf16.mxu1 %v6068_v1  ;;  %4486 = vmatpush1.bf16.msra.mxu1 %v6879_v51  ;;  %v6918_v1 = vld [vmem:[%s10117_s7 + $0x2d0] ss:$8 sps:$4 sm:$0xff]  }
 0x3d7   :  { %4487 = vmatprep.subr.bf16.mxu1 %v6884_v15 }
 0x3da   :  { %4488 = vmatpush1.bf16.msra.mxu1 %v6882_v34 }
 0x3db   :  { %4489 = vmatprep.subr.bf16.mxu1 %v6887_v11 }
 0x3dd   :  { %4475 = vmatmul.mubr.bf16.gmra.mrb[68].mxu1 %v6067_v32  ;;  %v6909_v32 = vld [vmem:[%s10117_s7 + $0x2a0] ss:$8 sps:$4 sm:$0xff]  }
 0x3de   :  { %4490 = vmatpush1.bf16.msra.mxu1 %v6885_v53  ;;  %4517 = vmatprep.mubr.bf16.mxu1 %v6070_v14  ;;  %v6899_v14 = vld [vmem:[%s10117_s7 + $0x264] ss:$8 sps:$4 sm:$0xff]  }
 0x3df   :  { %4491 = vmatprep.subr.bf16.mxu1 %v6890_v39 }
 0x3e2   :  { %4492 = vmatpush1.bf16.msra.mxu1 %v6888_v47 }
 0x3e3   :  { %4493 = vmatprep.subr.bf16.mxu1 %v6893_v52 }
 0x3e6   :  { %4494 = vmatpush1.bf16.msra.mxu1 %v6891_v8 }
 0x3e7   :  { %4495 = vmatprep.subr.bf16.mxu1 %v6896_v4 }
 0x3ea   :  { %4496 = vmatpush1.bf16.msra.mxu1 %v6894_v23 }
 0x3eb   :  { %4497 = vmatprep.subr.bf16.mxu1 %v6899_v14 }
 0x3ee   :  { %4498 = vmatpush1.bf16.msra.mxu1 %v6897_v5 }
 0x3ef   :  { %4499 = vmatprep.subr.bf16.mxu1 %v6902_v61 }
 0x3f2   :  { %4500 = vmatpush1.bf16.msra.mxu1 %v6900_v56 }
 0x3f3   :  { %4501 = vmatprep.subr.bf16.mxu1 %v6905_v22 }
 0x3f6   :  { %4502 = vmatpush1.bf16.msra.mxu1 %v6903_v49 }
 0x3f7   :  { %4503 = vmatprep.subr.bf16.mxu1 %v6908_v45 }
 0x3fa   :  { %4504 = vmatpush1.bf16.msra.mxu1 %v6906_v38 }
 0x3fb   :  { %4505 = vmatprep.subr.bf16.mxu1 %v6911_v29 }
 0x3fe   :  { %4506 = vmatpush1.bf16.msra.mxu1 %v6909_v32 }
 0x3ff   :  { %4507 = vmatprep.subr.bf16.mxu1 %v6914_v25 }
 0x402   :  { %4508 = vmatpush1.bf16.msra.mxu1 %v6912_v57 }
 0x403   :  { %4509 = vmatprep.subr.bf16.mxu1 %v6917_v41 }
 0x406   :  { %4510 = vmatpush1.bf16.msra.mxu1 %v6915_v42 }
 0x407   :  { %4511 = vmatprep.subr.bf16.mxu1 %v6920_v55 }
 0x40a   :  { %4512 = vmatpush1.bf16.msra.mxu1 %v6918_v1 }
 0x40b   :  { %4513 = vmatprep.subr.bf16.mxu1 %v6923_v6 }
 0x40e   :  { %4514 = vmatpush1.bf16.msra.mxu1 %v6921_v3 }
 0x40f   :  { %4515 = vmatprep.subr.bf16.mxu1 %v6926_v46 }
 0x412   :  { %4516 = vmatpush1.bf16.msra.mxu1 %v6924_v17 }
 0x413   :  { %6079 = vmatprep.subr.bf16.mxu1 %v6927_v35 }
 0x415   :  { %4518 = vmatmul.mubr.bf16.vlgmr.msra.gmra.mrb[64].mxu1 %v6069_v24  ;;  %v6931_v24 = vld [vmem:[%s10120_s10 + $0x50] sm:$0xff]  }
 0x416   :  { %4527 = vmatprep.mubr.bf16.mxu1 %v6072_v0  ;;  %6080 = vmatpush3.bf16.msra.mxu1 %v6928_v63  ;;  %v6937_v0 = vld [vmem:[%s10120_s10 + $0x68] sm:$0xff]  }
 0x417   :  { %6081 = vmatprep.subr.bf16.mxu1 %v6929_v27 }
 0x41a   :  { %6082 = vmatpush3.bf16.msra.mxu1 %v6930_v28 }
 0x41b   :  { %6083 = vmatprep.subr.bf16.mxu1 %v6931_v24 }
 0x41d   :  { %4528 = vmatmul.mubr.bf16.gmra.mrb[68].mxu1 %v6071_v50  ;;  %v6936_v50 = vld [vmem:[%s10120_s10 + $0x20] sm:$0xff]  }
 0x41e   :  { %6084 = vmatpush3.bf16.msra.mxu1 %v6932_v20 }
 0x41f   :  { %6085 = vmatprep.subr.bf16.mxu1 %v6933_v36 }
 0x422   :  { %6086 = vmatpush3.bf16.msra.mxu1 %v6934_v31 }
 0x423   :  { %6087 = vmatprep.subr.bf16.mxu1 %v6935_v43 }
 0x426   :  { %6088 = vmatpush3.bf16.msra.mxu1 %v6936_v50 }
 0x427   :  { %6089 = vmatprep.subr.bf16.mxu1 %v6937_v0 }
 0x42a   :  { %6090 = vmatpush3.bf16.msra.mxu1 %v6938_v30 }
 0x42b   :  { %6091 = vmatprep.subr.bf16.mxu1 %v6939_v59 }
 0x42e   :  { %6092 = vmatpush3.bf16.msra.mxu1 %v6940_v18 }
 0x42f   :  { %6093 = vmatprep.subr.bf16.mxu1 %v6941_v62 }
 0x432   :  { %6094 = vmatpush3.bf16.msra.mxu1 %v6942_v26 }
 0x433   :  { %6101 = vmatprep.subr.bf16.mxu1 %v6943_v60 }
 0x4e8   :  { %v4519_v40 = vpop.f32.mrb[64].mxu1 }
 0x4e9   :  { %v4550_v44 = vmul.f32 %v4543_v13, %v4519_v40  ;;  %v4521_v10 = vpop.f32.mrb[65].mxu1 }
 0x4ea   :  { %v4551_v21 = vmul.f32 %v4547_v58, %v4521_v10  ;;  %v4523_v9 = vpop.f32.mrb[66].mxu1  ;;  %v6944_v10 = vld [vmem:[%s10120_s10 + $0x80] sm:$0xff]  }
 0x4eb   :  { %v4570_v19 = vadd.f32 %v4563_v54, %v4550_v44  ;;  %v4552_v37 = vmul.f32 %v4543_v13, %v4523_v9  ;;  %v4525_v51 = vpop.f32.mrb[67].mxu1 }
 0x4ec   :  { %v4571_v15 = vadd.f32 %v4567_v7, %v4551_v21  ;;  %v4553_v34 = vmul.f32 %v4547_v58, %v4525_v51 }
 0x4ed   :  { %v4586_v11 = vmin.f32 %v4570_v19, 0.0  ;;  %v4572_v53 = vadd.f32 %v4563_v54, %v4552_v37  ;;  %vm4578_vm0 = vcmp.gt.f32.partialorder %v4570_v19, 0.0 }
 0x4ee   :  { %v4587_v39 = vmin.f32 %v4571_v15, 0.0  ;;  %v4573_v47 = vadd.f32 %v4567_v7, %v4553_v34  ;;  %vm4579_vm2 = vcmp.gt.f32.partialorder %v4571_v15, 0.0 }
 0x4ef   :  { %v4594_v52 = vmul.f32 1.442695, %v4586_v11  ;;  %v4588_v8 = vmin.f32 %v4572_v53, 0.0  ;;  %vm4580_vm1 = vcmp.gt.f32.partialorder %v4572_v53, 0.0 }
 0x4f0   :  { %v4596_v4 = vmul.f32 1.442695, %v4587_v39  ;;  %v4589_v16 = vmin.f32 %v4573_v47, 0.0  ;;  %v4529_v23 = vpop.f32.mrb[68].mxu1  ;;  %vm4581_vm3 = vcmp.gt.f32.partialorder %v4573_v47, 0.0 }
 0x4f1   :  { %7151 = vpow2.f32 %v4594_v52  ;;  %v4598_v12 = vmul.f32 1.442695, %v4588_v8  ;;  %v4554_v14 = vmul.f32 %v4543_v13, %v4529_v23  ;;  %v4531_v5 = vpop.f32.mrb[69].mxu1  ;;  %v6948_v52 = vld [vmem:[%s10120_s10 + $0x90] sm:$0xff]   ;;  %v6949_v8 = vld [vmem:[%s10120_s10 + $0xd8] sm:$0xff]   ;;  %v6952_v23 = vld [vmem:[%s10120_s10 + $0xa0] sm:$0xff]  }
 0x4f2   :  { %7153 = vpow2.f32 %v4596_v4  ;;  %v4600_v61 = vmul.f32 1.442695, %v4589_v16  ;;  %v4555_v56 = vmul.f32 %v4547_v58, %v4531_v5  ;;  %v4533_v22 = vpop.f32.mrb[70].mxu1  ;;  %v6950_v4 = vld [vmem:[%s10120_s10 + $0x98] sm:$0xff]   ;;  %v6951_v16 = vld [vmem:[%s10120_s10 + $0xe0] sm:$0xff]   ;;  %v6955_v5 = vld [vmem:[%s10120_s10 + $0xf0] sm:$0xff]  }
 0x4f3   :  { %7155 = vpow2.f32 %v4598_v12  ;;  %v4574_v49 = vadd.f32 %v4563_v54, %v4554_v14  ;;  %v4556_v45 = vmul.f32 %v4543_v13, %v4533_v22  ;;  %v4535_v38 = vpop.f32.mrb[71].mxu1  ;;  %v6953_v12 = vld [vmem:[%s10120_s10 + $0xe8] sm:$0xff]   ;;  %v6958_v22 = vld [vmem:[%s10120_s10 + $0xb8] sm:$0xff]  }
 0x4f4   :  { %7157 = vpow2.f32 %v4600_v61  ;;  %v4575_v29 = vadd.f32 %v4567_v7, %v4555_v56  ;;  %v4557_v32 = vmul.f32 %v4547_v58, %v4535_v38  ;;  %v6954_v14 = vld [vmem:[%s10120_s10 + $0xa8] sm:$0xff]   ;;  %v6956_v61 = vld [vmem:[%s10120_s10 + $0xb0] sm:$0xff]   ;;  %v6957_v56 = vld [vmem:[%s10120_s10 + $0xf8] sm:$0xff]  }
 0x4f5   :  { %v4590_v25 = vmin.f32 %v4574_v49, 0.0  ;;  %v4576_v57 = vadd.f32 %v4563_v54, %v4556_v45  ;;  %vm4582_vm4 = vcmp.gt.f32.partialorder %v4574_v49, 0.0  ;;  %v6960_v45 = vld [vmem:[%s10120_s10 + $0x100] sm:$0xff]   ;;  %v6961_v38 = vld [vmem:[%s10120_s10 + $0x148] sm:$0xff]  }
 0x4f6   :  { %v4591_v41 = vmin.f32 %v4575_v29, 0.0  ;;  %v4577_v42 = vadd.f32 %v4567_v7, %v4557_v32  ;;  %vm4583_vm5 = vcmp.gt.f32.partialorder %v4575_v29, 0.0  ;;  %v6963_v32 = vld [vmem:[%s10120_s10 + $0x150] sm:$0xff]  }
 0x4f7   :  { %v4602_v55 = vmul.f32 1.442695, %v4590_v25  ;;  %v4592_v1 = vmin.f32 %v4576_v57, 0.0  ;;  %vm4584_vm6 = vcmp.gt.f32.partialorder %v4576_v57, 0.0  ;;  %v6964_v25 = vld [vmem:[%s10120_s10 + $0x110] sm:$0xff]  }
 0x4f8   :  { %v4604_v6 = vmul.f32 1.442695, %v4591_v41  ;;  %v4593_v3 = vmin.f32 %v4577_v42, 0.0  ;;  %vm4585_vm7 = vcmp.gt.f32.partialorder %v4577_v42, 0.0  ;;  %v6966_v41 = vld [vmem:[%s10120_s10 + $0x118] sm:$0xff]  }
 0x4f9   :  { %7159 = vpow2.f32 %v4602_v55  ;;  %v4606_v46 = vmul.f32 1.442695, %v4592_v1  ;;  %v6968_v55 = vld [vmem:[%s10120_s10 + $0x120] sm:$0xff]   ;;  %v6969_v1 = vld [vmem:[%s10120_s10 + $0x168] sm:$0xff]  }
 0x4fa   :  { %7161 = vpow2.f32 %v4604_v6  ;;  %v4608_v17 = vmul.f32 1.442695, %v4593_v3  ;;  %v6970_v6 = vld [vmem:[%s10120_s10 + $0x128] sm:$0xff]   ;;  %v6971_v3 = vld [vmem:[%s10120_s10 + $0x170] sm:$0xff]  }
 0x4fb   :  { %v7152_v35 = vpop.eup %7151  ;;  %7163 = vpow2.f32 %v4606_v46  ;;  %v6972_v46 = vld [vmem:[%s10120_s10 + $0x130] sm:$0xff]  }
 0x4fc   :  { %v7154_v63 = vpop.eup %7153  ;;  %v5936_v27 = vadd.f32 -1.0, %v7152_v35  ;;  %7165 = vpow2.f32 %v4608_v17  ;;  %v6973_v17 = vld [vmem:[%s10120_s10 + $0x178] sm:$0xff]  }
 0x4fd   :  { %v7156_v28 = vpop.eup %7155  ;;  %v5937_v24 = vadd.f32 -1.0, %v7154_v63  ;;  %v6974_v35 = vld [vmem:[%s10120_s10 + $0x138] sm:$0xff]   ;;  %v6975_v63 = vld [vmem:[%s10123_s13 + $0x40] sm:$0xff]  }
 0x4fe   :  { %v7158_v20 = vpop.eup %7157  ;;  %v5938_v36 = vadd.f32 -1.0, %v7156_v28  ;;  %v9938_v43 = vsel %vm4578_vm0, %v4570_v19, %v5936_v27  ;;  %v6945_v19 = vld [vmem:[%s10120_s10 + $0xc8] sm:$0xff]   ;;  %v6976_v27 = vld [vmem:[%s10123_s13] sm:$0xff]  }
 0x4ff   :  { %v5939_v31 = vadd.f32 -1.0, %v7158_v20  ;;  %v4619_v0 = vsel %vm4579_vm2, %v4571_v15, %v5937_v24  ;;  %v6977_v28 = vld [vmem:[%s10123_s13 + $0x48] sm:$0xff]   ;;  %v6979_v20 = vld [vmem:[%s10123_s13 + $0x50] sm:$0xff]  }
 0x500   :  { %v9940_v50 = vsel %vm4580_vm1, %v4572_v53, %v5938_v36  ;;  %v6978_v24 = vld [vmem:[%s10123_s13 + $0x8] sm:$0xff]   ;;  %v6980_v36 = vld [vmem:[%s10123_s13 + $0x10] sm:$0xff]  }
 0x501   :  { %v4626_v30 = vpack.c.bf16 %v9940_v50, %v9938_v43  ;;  %v9944_v59 = vsel %vm4581_vm3, %v4573_v47, %v5939_v31  ;;  %v6947_v47 = vld [vmem:[%s10120_s10 + $0xd0] sm:$0xff]   ;;  %v6981_v31 = vld [vmem:[%s10123_s13 + $0x58] sm:$0xff]  }
 0x502   :  { %v4627_v18 = vpack.c.bf16 %v9944_v59, %v4619_v0 }
 0x503   :  { %v7160_v62 = vpop.eup %7159  ;;  %v4632_v26 = vunpack.c.h.b16 %v4626_v30  ;;  %v6985_v30 = vld [vmem:[%s10123_s13 + $0x68] sm:$0xff]  }
 0x504   :  { %v7162_v60 = vpop.eup %7161  ;;  %v5940_v33 = vadd.f32 -1.0, %v7160_v62  ;;  %v4633_v48 = vunpack.c.h.b16 %v4627_v18  ;;  %v6987_v18 = vld [vmem:[%s10123_s13 + $0x70] sm:$0xff]  }
 0x505   :  { %v7164_v13 = vpop.eup %7163  ;;  %v5941_v58 = vadd.f32 -1.0, %v7162_v60  ;;  %v4642_v21 = vpack.c.b16 %v4632_v26, %v10232_v2  ;;  %v6988_v62 = vld [vmem:[%s10123_s13 + $0x30] sm:$0xff]   ;;  %v6989_v26 = vld [vmem:[%s10123_s13 + $0x78] sm:$0xff]  }
 0x506   :  { %v7166_v54 = vpop.eup %7165  ;;  %v4622_v40 = vsel %vm4582_vm4, %v4574_v49, %v5940_v33  ;;  %v5942_v7 = vadd.f32 -1.0, %v7164_v13  ;;  %v4643_v44 = vpack.c.b16 %v4633_v48, %v10232_v2  ;;  %v6946_v2 = vld [vmem:[%s10120_s10 + $0x88] sm:$0xff]   ;;  %v6959_v49 = vld [vmem:[%s10120_s10 + $0x140] sm:$0xff]   ;;  %v6990_v60 = vld [vmem:[%s10123_s13 + $0x38] sm:$0xff]  }
 0x507   :  { %v4623_v9 = vsel %vm4583_vm5, %v4575_v29, %v5941_v58  ;;  %v6073_v37 = vpack.c.bf16 %v4622_v40, %v9938_v43  ;;  %v5943_v51 = vadd.f32 -1.0, %v7166_v54  ;;  %v6962_v29 = vld [vmem:[%s10120_s10 + $0x108] sm:$0xff]   ;;  %v6982_v43 = vld [vmem:[%s10123_s13 + $0x18] sm:$0xff]  }
 0x508   :  { %v9956_v15 = vsel %vm4584_vm6, %v4576_v57, %v5942_v7  ;;  %5070 = vmatprep.mubr.bf16.mxu1 %v4643_v44  ;;  %v6074_v34 = vpack.c.bf16 %v4623_v9, %v4619_v0  ;;  %v6965_v57 = vld [vmem:[%s10120_s10 + $0x158] sm:$0xff]   ;;  %v6984_v0 = vld [vmem:[%s10123_s13 + $0x20] sm:$0xff]  }
 0x509   :  { %5071 = vmatmul.mubr.bf16.vlgmr.msra.gmra.mrb[72].mxu1 %v4642_v21  ;;  %v4625_v11 = vsel %vm4585_vm7, %v4577_v42, %v5943_v51  ;;  %v6075_v53 = vpack.c.bf16 %v9956_v15, %v9940_v50  ;;  %v6967_v42 = vld [vmem:[%s10120_s10 + $0x160] sm:$0xff]  }
 0x50a   :  { %6102 = vmatpush3.bf16.msra.mxu1 %v6944_v10  ;;  %5111 = vmatprep.mubr.bf16.mxu1 %v6074_v34  ;;  %v6076_v39 = vpack.c.bf16 %v4625_v11, %v9944_v59  ;;  %v6983_v50 = vld [vmem:[%s10123_s13 + $0x60] sm:$0xff]   ;;  %v6986_v59 = vld [vmem:[%s10123_s13 + $0x28] sm:$0xff]  }
 0x50b   :  { %6103 = vmatprep.subr.bf16.mxu1 %v6945_v19 }
 0x50e   :  { %6104 = vmatpush3.bf16.msra.mxu1 %v6946_v2  ;;  %v5996_v2 = vld [vmem:[%s10124_s11] ss:$0 sm:$0xff] }
 0x50f   :  { %6105 = vmatprep.subr.bf16.mxu1 %v6947_v47 }
 0x512   :  { %6106 = vmatpush3.bf16.msra.mxu1 %v6948_v52 }
 0x513   :  { %6107 = vmatprep.subr.bf16.mxu1 %v6949_v8  ;;  %v5997_v8 = vld [vmem:[%s10125_s12] ss:$0 sm:$0xff] }
 0x516   :  { %6108 = vmatpush3.bf16.msra.mxu1 %v6950_v4 }
 0x517   :  { %6109 = vmatprep.subr.bf16.mxu1 %v6951_v16 }
 0x51a   :  { %6110 = vmatpush3.bf16.msra.mxu1 %v6952_v23 }
 0x51b   :  { %6111 = vmatprep.subr.bf16.mxu1 %v6953_v12 }
 0x51e   :  { %6112 = vmatpush3.bf16.msra.mxu1 %v6954_v14 }
 0x51f   :  { %6113 = vmatprep.subr.bf16.mxu1 %v6955_v5 }
 0x522   :  { %6114 = vmatpush3.bf16.msra.mxu1 %v6956_v61 }
 0x523   :  { %6115 = vmatprep.subr.bf16.mxu1 %v6957_v56 }
 0x526   :  { %6116 = vmatpush3.bf16.msra.mxu1 %v6958_v22 }
 0x527   :  { %6123 = vmatprep.subr.bf16.mxu1 %v6959_v49 }
 0x529   :  { %5112 = vmatmul.mubr.bf16.vlgmr.msra.gmra.mrb[76].mxu1 %v6073_v37 }
 0x52a   :  { %6124 = vmatpush3.bf16.msra.mxu1 %v6960_v45  ;;  %5152 = vmatprep.mubr.bf16.mxu1 %v6076_v39 }
 0x52b   :  { %6125 = vmatprep.subr.bf16.mxu1 %v6961_v38 }
 0x52e   :  { %6126 = vmatpush3.bf16.msra.mxu1 %v6962_v29 }
 0x52f   :  { %6127 = vmatprep.subr.bf16.mxu1 %v6963_v32 }
 0x532   :  { %6128 = vmatpush3.bf16.msra.mxu1 %v6964_v25 }
 0x533   :  { %6129 = vmatprep.subr.bf16.mxu1 %v6965_v57 }
 0x536   :  { %6130 = vmatpush3.bf16.msra.mxu1 %v6966_v41 }
 0x537   :  { %6131 = vmatprep.subr.bf16.mxu1 %v6967_v42 }
 0x53a   :  { %6132 = vmatpush3.bf16.msra.mxu1 %v6968_v55  ;;  %v6002_v55 = vld [vmem:[%s10126_s14] ss:$0 sm:$0xff] }
 0x53b   :  { %6133 = vmatprep.subr.bf16.mxu1 %v6969_v1 }
 0x53e   :  { %6134 = vmatpush3.bf16.msra.mxu1 %v6970_v6 }
 0x53f   :  { %6135 = vmatprep.subr.bf16.mxu1 %v6971_v3 }
 0x542   :  { %6136 = vmatpush3.bf16.msra.mxu1 %v6972_v46 }
 0x543   :  { %6137 = vmatprep.subr.bf16.mxu1 %v6973_v17 }
 0x546   :  { %6138 = vmatpush3.bf16.msra.mxu1 %v6974_v35 }
 0x547   :  { %6145 = vmatprep.subr.bf16.mxu1 %v6975_v63 }
 0x549   :  { %5153 = vmatmul.mubr.bf16.vlgmr.msra.gmra.mrb[80].mxu1 %v6075_v53 }
 0x54a   :  { %6146 = vmatpush3.bf16.msra.mxu1 %v6976_v27 }
 0x54b   :  { %6147 = vmatprep.subr.bf16.mxu1 %v6977_v28 }
 0x54e   :  { %6148 = vmatpush3.bf16.msra.mxu1 %v6978_v24 }
 0x54f   :  { %6149 = vmatprep.subr.bf16.mxu1 %v6979_v20 }
 0x552   :  { %6150 = vmatpush3.bf16.msra.mxu1 %v6980_v36  ;;  %v10233_v36 = vlaneseq }
 0x553   :  { %6151 = vmatprep.subr.bf16.mxu1 %v6981_v31 }
 0x554   :  { %v5375_v31 = vand.u32 127, %v10233_v36 }
 0x556   :  { %6152 = vmatpush3.bf16.msra.mxu1 %v6982_v43  ;;  %vm5385_vm10 = vcmp.lt.s32.totalorder %v5375_v31, 32 }
 0x557   :  { %6153 = vmatprep.subr.bf16.mxu1 %v6983_v50 }
 0x55a   :  { %6154 = vmatpush3.bf16.msra.mxu1 %v6984_v0 }
 0x55b   :  { %6155 = vmatprep.subr.bf16.mxu1 %v6985_v30 }
 0x55e   :  { %6156 = vmatpush3.bf16.msra.mxu1 %v6986_v59 }
 0x55f   :  { %6157 = vmatprep.subr.bf16.mxu1 %v6987_v18 }
 0x562   :  { %6158 = vmatpush3.bf16.msra.mxu1 %v6988_v62 }
 0x563   :  { %6159 = vmatprep.subr.bf16.mxu1 %v6989_v26 }
 0x566   :  { %6160 = vmatpush3.bf16.msra.mxu1 %v6990_v60 }
 0x5dc   :  { %v6095_v33 = vpop.f32.mrb[72].mxu1 }
 0x5dd   :  { %v6096_v48 = vpop.f32.mrb[73].mxu1 }
 0x5de   :  { %v6097_v13 = vadd.f32 %v6096_v48, %v6095_v33  ;;  %v6098_v58 = vpop.f32.mrb[74].mxu1 }
 0x5df   :  { %v6099_v54 = vpop.f32.mrb[75].mxu1 }
 0x5e0   :  { %v6100_v40 = vadd.f32 %v6099_v54, %v6098_v58 }
 0x5fc   :  { %v6117_v7 = vpop.f32.mrb[76].mxu1 }
 0x5fd   :  { %v6118_v44 = vpop.f32.mrb[77].mxu1 }
 0x5fe   :  { %v6119_v10 = vadd.f32 %v6118_v44, %v6117_v7  ;;  %v6120_v21 = vpop.f32.mrb[78].mxu1 }
 0x5ff   :  { %v6121_v9 = vpop.f32.mrb[79].mxu1 }
 0x600   :  { %v5114_v19 = vadd.f32 %v6119_v10, %v6097_v13  ;;  %v6122_v37 = vadd.f32 %v6121_v9, %v6120_v21 }
 0x602   :  { %v5117_v51 = vadd.f32 %v6122_v37, %v6100_v40 }
 0x61c   :  { %v6139_v15 = vpop.f32.mrb[80].mxu1 }
 0x61d   :  { %v6140_v34 = vpop.f32.mrb[81].mxu1 }
 0x61e   :  { %v6141_v11 = vadd.f32 %v6140_v34, %v6139_v15  ;;  %v6142_v53 = vpop.f32.mrb[82].mxu1 }
 0x61f   :  { %v6143_v39 = vpop.f32.mrb[83].mxu1 }
 0x620   :  { %v5155_v47 = vadd.f32 %v6141_v11, %v5114_v19  ;;  %v6144_v52 = vadd.f32 %v6143_v39, %v6142_v53 }
 0x622   :  { %v5168_v4 = vmul.f32 %v5996_v2, %v5155_v47  ;;  %v5158_v16 = vadd.f32 %v6144_v52, %v5117_v51 }
 0x624   :  { %v5177_v23 = vadd.f32 %v5997_v8, %v5168_v4  ;;  %v5169_v12 = vmul.f32 %v5996_v2, %v5158_v16 }
 0x626   :  { %v5181_v14 = vmin.f32 %v5177_v23, 0.0  ;;  %v5178_v5 = vadd.f32 %v5997_v8, %v5169_v12  ;;  %vm5179_vm8 = vcmp.gt.f32.partialorder %v5177_v23, 0.0 }
 0x628   :  { %v5183_v61 = vmul.f32 1.442695, %v5181_v14  ;;  %v5182_v56 = vmin.f32 %v5178_v5, 0.0  ;;  %vm5180_vm9 = vcmp.gt.f32.partialorder %v5178_v5, 0.0 }
 0x62a   :  { %7167 = vpow2.f32 %v5183_v61  ;;  %v5185_v22 = vmul.f32 1.442695, %v5182_v56 }
 0x62c   :  { %7169 = vpow2.f32 %v5185_v22 }
 0x634   :  { %v7168_v49 = vpop.eup %7167 }
 0x635   :  { %v5998_v45 = vadd.f32 -1.0, %v7168_v49 }
 0x636   :  { %v7170_v38 = vpop.eup %7169 }
 0x637   :  { %v5999_v29 = vadd.f32 -1.0, %v7170_v38  ;;  %v5189_v32 = vsel %vm5179_vm8, %v5177_v23, %v5998_v45 }
 0x638   :  { %v6077_v41 = vpack.c.bf16 %v5189_v32, %v5189_v32 }
 0x639   :  { %v5190_v25 = vsel %vm5180_vm9, %v5178_v5, %v5999_v29 }
 0x63a   :  { %v6078_v57 = vpack.c.bf16 %v5190_v25, %v5190_v25 }
 0x63c   :  { %5366 = vmatprep.mubr.bf16.mxu1 %v6078_v57 }
 0x63d   :  { %5367 = vmatmul.mubr.bf16.vlgmr.msra.gmra.mrb[84].mxu1 %v6077_v41 }
 0x710   :  { %v6161_v42 = vpop.f32.mrb[84].mxu1 }
 0x711   :  { %v6162_v1 = vpop.f32.mrb[85].mxu1 }
 0x712   :  { %v6163_v6 = vadd.f32 %v6162_v1, %v6161_v42  ;;  %v6164_v3 = vpop.f32.mrb[86].mxu1 }
 0x713   :  { %v6165_v46 = vpop.f32.mrb[87].mxu1 }
 0x714   :  { %v5369_v17 = vadd.f32 %v6163_v6, %v6002_v55 }
 0x716   :  { %v5377_v35 = vand.u32 2147483647, %v5369_v17  ;;  %v5376_v43 = vmax.f32 %v5369_v17, 0.0 }
 0x718   :  { %v5378_v63 = vsub.f32 0.0, %v5377_v35 }
 0x71a   :  { %v5379_v27 = vmul.f32 1.442695, %v5378_v63 }
 0x71c   :  { %7171 = vpow2.f32 %v5379_v27 }
 0x726   :  { %v7172_v28 = vpop.eup %7171 }
 0x727   :  { %v5381_v24 = vadd.f32 1.0, %v7172_v28 }
 0x729   :  { %7173 = vlog2.f32 %v5381_v24 }
 0x733   :  { %v7174_v20 = vpop.eup %7173 }
 0x734   :  { %v5383_v50 = vmul.f32 0.6931472, %v7174_v20 }
 0x736   :  { %v5384_v0 = vadd.f32 %v5383_v50, %v5376_v43 }
 0x738   :  { %v5386_v30 = vadd.f32 0.0001, %v5384_v0 }
 0x73a   :  { %v5387_v59 = vsel %vm5385_vm10, %v5369_v17, %v5386_v30 }
 0x73b   :  { %5389 = vst.msk [vmem:[%s10127_s15] sm:$0xff] %vm5388_vm11, %v5387_v59 }

</bundles_post_ra>
